<compile_context>
chip_gen: v6e
topology: v6e:2x2x1
jax: 0.10.0
libtpu: 0.0.40
codegen_flags: <defaults>
</compile_context>

<pallas_src>
import functools

import jax
import jax.numpy as jnp
from jax.experimental import pallas as pl
from jax.experimental.pallas import tpu as pltpu


# ----------------------------------------------------------------------------
# Kernel 1: fused conv / pool / deconv pipeline (NB row-stacked samples / step)
# ----------------------------------------------------------------------------

def conv_pipeline_kernel(xc_ref,
                         w1_ref, b1_ref, pavg_ref, lnst_ref, lng_ref, lnb_ref,
                         w2_ref, b2_ref, s1_ref, t1_ref,
                         mf16_ref, ml16_ref, w3a_ref, w3b_ref, w3c_ref,
                         b3_ref, s2_ref, t2_ref,
                         mf8_ref, ml8_ref, d1m_ref, d1p_ref, d1n_ref, d1b_ref,
                         wd2i_ref, d2b_ref,
                         o_ref, y3_sc):
    """NB row-stacked samples.  xc_ref: (NB*16, 256), row b*16+m, lane s*4+k =
    xpad[b, 64m+s+k].

    Packed layouts (time packed into lanes, samples stacked along rows):
      y1n (NB*16,192): [b*16+m, s*3+c]      = LN(conv1)[pos 64m+s, ch c]
      y2  (NB*16,512): even/odd-time halves of conv2+ReLU+BN   (t = 8m+q)
      p2  (NB*16,256): [b*16+m, r*64+c]     = pool1 out[time 4m+r, ch c]
      y3  (NB*16, 32):                        conv3+ReLU+BN (time = row%16)
      p3  (NB*8 , 32):                        pool2 out
      y4  (NB*8 ,128): [b*8+v, r*32+o]      = ReLU(deconv1)[time 4v+r, ch o]
      out (NB*8,2048): [b*8+v,(8r+r')*64+o] = BN3(deconv2)[time 32v+8r+r', ch o]
    """
    f32 = jnp.float32
    nr = xc_ref.shape[0]          # NB * 16
    nr2 = nr // 2                 # NB * 8

    # Conv1d(1->3, k=4, 'same') + LayerNorm(1024)   (Dropout = identity)
    y1 = jnp.dot(xc_ref[...], w1_ref[...], preferred_element_type=f32) + b1_ref[...]
    # per-(sample, channel) mean/var over all 1024 positions, via tiny matmuls
    mean_bc = jnp.dot(jnp.dot(pavg_ref[...], y1, preferred_element_type=f32),
                      lnst_ref[...], preferred_element_type=f32)
    xcen = y1 - mean_bc
    var_bc = jnp.dot(jnp.dot(pavg_ref[...], xcen * xcen, preferred_element_type=f32),
                     lnst_ref[...], preferred_element_type=f32)
    y1n = xcen * jax.lax.rsqrt(var_bc + 1e-5) * lng_ref[...] + lnb_ref[...]

    # Conv1d(3->64, k=8, s=8) + ReLU + BN1 (+Dropout) + MaxPool1d(2)
    y2 = jnp.dot(y1n, w2_ref[...], preferred_element_type=f32) + b2_ref[...]
    y2 = jnp.maximum(y2, 0.0) * s1_ref[...] + t1_ref[...]
    p2 = jnp.maximum(y2[:, 0:256], y2[:, 256:512])                  # (NB*16, 256)

    # Conv1d(64->32, k=8, s=4, 'same' pad 2/2) + ReLU + BN2
    # +/-1-row shifts on the XLU (roll) with per-sample boundary masks.
    pm1 = pltpu.roll(p2, shift=1, axis=0) * mf16_ref[...]           # rows m-1
    pp1 = pltpu.roll(p2, shift=nr - 1, axis=0) * ml16_ref[...]      # rows m+1
    y3 = (jnp.dot(pm1, w3a_ref[...], preferred_element_type=f32)
          + jnp.dot(p2, w3b_ref[...], preferred_element_type=f32)
          + jnp.dot(pp1, w3c_ref[...], preferred_element_type=f32)
          + b3_ref[...])
    y3_sc[...] = jnp.maximum(y3, 0.0) * s2_ref[...] + t2_ref[...]   # (NB*16, 32)

    # MaxPool1d(2) over rows: even/odd strided reads (no selection matmul).
    p3 = jnp.maximum(y3_sc[pl.ds(0, nr2, stride=2), :],
                     y3_sc[pl.ds(1, nr2, stride=2), :])             # (NB*8, 32)

    # ConvTranspose1d(32->32, k=8, s=4, 'same' crop 2/2) + ReLU
    prev = pltpu.roll(p3, shift=1, axis=0) * mf8_ref[...]           # rows v-1
    nxt = pltpu.roll(p3, shift=nr2 - 1, axis=0) * ml8_ref[...]      # rows v+1
    y4 = (jnp.dot(p3, d1m_ref[...], preferred_element_type=f32)
          + jnp.dot(prev, d1p_ref[...], preferred_element_type=f32)
          + jnp.dot(nxt, d1n_ref[...], preferred_element_type=f32)
          + d1b_ref[...])
    y4 = jnp.maximum(y4, 0.0)                                       # (NB*8, 128)

    # ConvTranspose1d(32->64, k=8, s=8) + BN3 (folded).  Full weight is
    # kron(eye(4), inner) -> 4 dots against the (32,512) inner block only.
    wd2i = wd2i_ref[...]
    d2b = d2b_ref[...]
    for r in range(4):
        o_ref[:, 512 * r:512 * (r + 1)] = (
            jnp.dot(y4[:, 32 * r:32 * (r + 1)], wd2i,
                    preferred_element_type=f32) + d2b)


CONV_WEIGHT_NAMES = [
    'w1bd', 'b1row', 'pavg', 'lnst', 'ln_g', 'ln_b',
    'w2bd', 'b2row', 'bn1_s', 'bn1_t',
    'mask_f16', 'mask_l16', 'w3a', 'w3b', 'w3c', 'b3row', 'bn2_s', 'bn2_t',
    'mask_f8', 'mask_l8', 'd1_main', 'd1_prev', 'd1_next', 'd1_b',
    'wd2i', 'd2_b',
]


def conv_pipeline(xc_rows, kp):
    rows = xc_rows.shape[0]                  # B * 16
    B = rows // 16
    nb = kp['pavg'].shape[0] // 16           # samples row-stacked per grid step
    assert B % nb == 0
    weights = [kp[n] for n in CONV_WEIGHT_NAMES]
    return pl.pallas_call(
        conv_pipeline_kernel,
        out_shape=jax.ShapeDtypeStruct((B * 8, 2048), jnp.float32),
        grid=(B // nb,),
        in_specs=([pl.BlockSpec((nb * 16, 256), lambda i: (i, 0))]
                  + [pl.BlockSpec(w.shape, lambda i: (0, 0)) for w in weights]),
        out_specs=pl.BlockSpec((nb * 8, 2048), lambda i: (i, 0)),
        scratch_shapes=[pltpu.VMEM((nb * 16, 32), jnp.float32)],
        compiler_params=pltpu.CompilerParams(dimension_semantics=("parallel",)),
    )(xc_rows, *weights)


# ----------------------------------------------------------------------------
# Kernel 2: BiLSTM (both directions, whole batch) + collapsed FC head
# ----------------------------------------------------------------------------

def bilstm_fc_kernel(batch, seq,
                     x_ref, wih_ref, bih_ref, mask_ref, wrec_ref,
                     gsc_ref, gadd_ref, wfcf_ref, wfcb_ref, bfc_ref,
                     o_ref, pref_sc, preb_sc, hf_sc, hb_sc):
    """x_ref: (T*B, 64) time-major (row t*B+b).  Gate lane layout:
    [i_f,i_b,f_f,f_b,g_f,g_b,o_f,o_b] x 8 lanes each.  State h/c: (B,16) =
    [h_fwd | h_bwd]; the forward direction runs at time s and the backward
    direction at time T-1-s within the same merged step.
    """
    f32 = jnp.float32
    B, T = batch, seq

    # Hoisted input projection (all gates, both directions): ONE matmul.
    pre = jnp.dot(x_ref[...], wih_ref[...], preferred_element_type=f32) + bih_ref[...]
    mask = mask_ref[...]                 # 1.0 on forward-gate lanes
    pref_sc[...] = pre * mask            # forward-lane projections (time-major)
    preb_sc[...] = pre * (1.0 - mask)    # backward-lane projections (time-major)

    wrec = wrec_ref[...]                 # (16,64) block recurrent weights
    gsc = gsc_ref[...]                   # 0.5 on i/f/o lanes, 1.0 on g lanes
    gadd = gadd_ref[...]                 # 0.5 on i/f/o lanes, 0.0 on g lanes

    def lstm_step(s, h, c):
        t_rev = (T - 1) - s
        xg = (pref_sc[pl.ds(s * B, B), :]
              + preb_sc[pl.ds(t_rev * B, B), :])                    # (B,64)
        gates = xg + jnp.dot(h, wrec, preferred_element_type=f32)
        # sigmoid(x) = 0.5*tanh(x/2)+0.5 -> one tanh covers all 4 gates.
        act = jnp.tanh(gates * gsc) * gsc + gadd
        c_new = act[:, 16:32] * c + act[:, 0:16] * act[:, 32:48]
        h_new = act[:, 48:64] * jnp.tanh(c_new)
        hf_sc[pl.ds(s * B, B), :] = h_new       # fwd half valid at time s
        hb_sc[pl.ds(t_rev * B, B), :] = h_new   # bwd half valid at time t_rev
        return h_new, c_new

    def two_steps(i, carry):             # hand-unrolled by 2
        h, c = carry
        h, c = lstm_step(2 * i, h, c)
        h, c = lstm_step(2 * i + 1, h, c)
        return (h, c)

    # TODO(synk): on v7x the fwd/bwd recurrences could be split across the two
    # TensorCores via pl.core_map; kept merged here for single-TC chips.
    init = (jnp.zeros((B, 16), f32), jnp.zeros((B, 16), f32))
    _ = jax.lax.fori_loop(0, T // 2, two_steps, init)

    # FC head Linear(16->4->2->1) collapsed to one (16,1) projection; the fwd
    # half lives in hf_sc[:, 0:8] and the bwd half in hb_sc[:, 8:16] (weights
    # zero-padded accordingly): two (T*B,16)@(16,1) dots + one store.
    o_ref[...] = (jnp.dot(hf_sc[...], wfcf_ref[...], preferred_element_type=f32)
                  + jnp.dot(hb_sc[...], wfcb_ref[...], preferred_element_type=f32)
                  + bfc_ref[...])


def bilstm_head(x_tm, kp, batch, seq):
    kernel = functools.partial(bilstm_fc_kernel, batch, seq)
    return pl.pallas_call(
        kernel,
        out_shape=jax.ShapeDtypeStruct((seq * batch, 1), jnp.float32),
        scratch_shapes=[
            pltpu.VMEM((seq * batch, 64), jnp.float32),   # fwd-lane gate inputs
            pltpu.VMEM((seq * batch, 64), jnp.float32),   # bwd-lane gate inputs
            pltpu.VMEM((seq * batch, 16), jnp.float32),   # h in fwd time order
            pltpu.VMEM((seq * batch, 16), jnp.float32),   # h in bwd time order
        ],
    )(x_tm, kp['wih'], kp['bih'], kp['gate_mask'], kp['wrec'],
      kp['gate_scale'], kp['gate_add'], kp['wfc_f'], kp['wfc_b'], kp['bfc'])


# ----------------------------------------------------------------------------
# Deterministic PyTorch-shaped parameters + kernel-layout preparation
# ----------------------------------------------------------------------------

def init_params(key):
    ks = jax.random.split(key, 40)
    it = iter(ks)

    def nrm(shape, s=0.1):
        return (s * jax.random.normal(next(it), shape)).astype(jnp.float32)

    p = {}
    p['conv1_w'] = nrm((3, 1, 4));     p['conv1_b'] = nrm((3,))
    p['ln_w'] = 1.0 + nrm((1024,));    p['ln_b'] = nrm((1024,))
    p['conv2_w'] = nrm((64, 3, 8));    p['conv2_b'] = nrm((64,))
    p['bn1_g'] = 1.0 + nrm((64,));     p['bn1_b'] = nrm((64,))
    p['bn1_m'] = nrm((64,));           p['bn1_v'] = 1.0 + jnp.abs(nrm((64,)))
    p['conv3_w'] = nrm((32, 64, 8));   p['conv3_b'] = nrm((32,))
    p['bn2_g'] = 1.0 + nrm((32,));     p['bn2_b'] = nrm((32,))
    p['bn2_m'] = nrm((32,));           p['bn2_v'] = 1.0 + jnp.abs(nrm((32,)))
    p['dc1_w'] = nrm((32, 32, 8));     p['dc1_b'] = nrm((32,))
    p['dc2_w'] = nrm((32, 64, 8));     p['dc2_b'] = nrm((64,))
    p['bn3_g'] = 1.0 + nrm((64,));     p['bn3_b'] = nrm((64,))
    p['bn3_m'] = nrm((64,));           p['bn3_v'] = 1.0 + jnp.abs(nrm((64,)))
    p['w_ih_f'] = nrm((32, 64));       p['w_hh_f'] = nrm((32, 8))
    p['b_ih_f'] = nrm((32,));          p['b_hh_f'] = nrm((32,))
    p['w_ih_b'] = nrm((32, 64));       p['w_hh_b'] = nrm((32, 8))
    p['b_ih_b'] = nrm((32,));          p['b_hh_b'] = nrm((32,))
    p['fc1_w'] = nrm((4, 16));         p['fc1_b'] = nrm((4,))
    p['fc2_w'] = nrm((2, 4));          p['fc2_b'] = nrm((2,))
    p['fc3_w'] = nrm((1, 2));          p['fc3_b'] = nrm((1,))
    return p


def prepare(p, nb):
    """Re-pack PyTorch-shaped params into the kernels' packed layouts.
    nb = number of samples row-stacked per kernel-1 grid step."""
    eps = 1e-5
    f32 = jnp.float32
    kp = {}

    # stage 1: Conv1d(1->3,k=4,'same') + LayerNorm(1024), packed (nb*16,192)
    w1t = p['conv1_w'][:, 0, :].T                                    # (4,3) [k,c]
    kp['w1bd'] = jnp.kron(jnp.eye(64, dtype=f32), w1t)               # (256,192)
    kp['b1row'] = jnp.tile(p['conv1_b'], 64)[None, :]
    # per-sample row-average operator and per-channel lane average/broadcast
    kp['pavg'] = jnp.kron(jnp.eye(nb, dtype=f32),
                          jnp.full((16, 16), 1.0 / 16.0, f32))       # (nb*16,nb*16)
    kp['lnst'] = jnp.kron(jnp.full((64, 64), 1.0 / 64.0, f32),
                          jnp.eye(3, dtype=f32))                     # (192,192)
    ln_g16 = jnp.repeat(p['ln_w'].reshape(16, 64), 3, axis=1)        # (16,192)
    ln_b16 = jnp.repeat(p['ln_b'].reshape(16, 64), 3, axis=1)
    kp['ln_g'] = jnp.tile(ln_g16, (nb, 1))
    kp['ln_b'] = jnp.tile(ln_b16, (nb, 1))

    # Conv1d(3->64,k=8,s=8): block-diag weights, columns permuted [even t | odd t]
    base2 = jnp.transpose(p['conv2_w'], (2, 1, 0)).reshape(24, 64)   # [p*3+c, o]
    nat2 = jnp.kron(jnp.eye(8, dtype=f32), base2)                    # (192,512)
    j = jnp.arange(512)
    q = jnp.where(j < 256, 2 * (j // 64), 2 * ((j - 256) // 64) + 1)
    kp['w2bd'] = nat2[:, q * 64 + (j % 64)]
    kp['b2row'] = jnp.tile(p['conv2_b'], 8)[None, :]
    s1 = p['bn1_g'] / jnp.sqrt(p['bn1_v'] + eps)
    kp['bn1_s'] = jnp.tile(s1, 8)[None, :]
    kp['bn1_t'] = jnp.tile(p['bn1_b'] - p['bn1_m'] * s1, 8)[None, :]

    # Conv1d(64->32,k=8,s=4,'same' pad 2/2): three shifted matmuls on (nb*16,256)
    t3w = jnp.transpose(p['conv3_w'], (2, 1, 0))                     # (8,64,32) [p,c,o]
    z128 = jnp.zeros((128, 32), f32)
    kp['w3a'] = jnp.concatenate([z128, t3w[0:2].reshape(128, 32)], axis=0)
    kp['w3b'] = t3w[2:6].reshape(256, 32)
    kp['w3c'] = jnp.concatenate([t3w[6:8].reshape(128, 32), z128], axis=0)
    kp['b3row'] = p['conv3_b'][None, :]
    s2 = p['bn2_g'] / jnp.sqrt(p['bn2_v'] + eps)
    kp['bn2_s'] = s2[None, :]
    kp['bn2_t'] = (p['bn2_b'] - p['bn2_m'] * s2)[None, :]

    # per-sample boundary masks for the pltpu.roll row shifts
    r16 = jnp.arange(nb * 16)
    r8 = jnp.arange(nb * 8)
    kp['mask_f16'] = (r16 % 16 != 0).astype(f32)[:, None]
    kp['mask_l16'] = (r16 % 16 != 15).astype(f32)[:, None]
    kp['mask_f8'] = (r8 % 8 != 0).astype(f32)[:, None]
    kp['mask_l8'] = (r8 % 8 != 7).astype(f32)[:, None]

    # ConvTranspose1d(32->32,k=8,s=4,'same' crop 2/2): residue decomposition
    #   out[4v+r] = p3[v]@W[:,:,r+2] + p3[v-1]@W[:,:,r+6] (r<2) + p3[v+1]@W[:,:,r-2] (r>=2)
    td1 = jnp.transpose(p['dc1_w'], (0, 2, 1))                       # (32,8,32) [c,p,o]
    z64 = jnp.zeros((32, 64), f32)
    kp['d1_main'] = td1[:, 2:6, :].reshape(32, 128)
    kp['d1_prev'] = jnp.concatenate([td1[:, 6:8, :].reshape(32, 64), z64], axis=1)
    kp['d1_next'] = jnp.concatenate([z64, td1[:, 0:2, :].reshape(32, 64)], axis=1)
    kp['d1_b'] = jnp.tile(p['dc1_b'], 4)[None, :]

    # ConvTranspose1d(32->64,k=8,s=8) with BN3 folded; keep only the (32,512)
    # inner block of the kron(eye(4), inner) weight.
    s3 = p['bn3_g'] / jnp.sqrt(p['bn3_v'] + eps)
    t3b = p['bn3_b'] - p['bn3_m'] * s3
    td2 = jnp.transpose(p['dc2_w'], (0, 2, 1))                       # (32,8,64) [c,r',o]
    kp['wd2i'] = (td2 * s3[None, None, :]).reshape(32, 512)
    kp['d2_b'] = jnp.tile(p['dc2_b'] * s3 + t3b, 8)[None, :]         # (1,512)

    # BiLSTM: interleaved gate layout [i_f,i_b,f_f,f_b,g_f,g_b,o_f,o_b] (8 each)
    wih_blocks, b_blocks, rec_blocks = [], [], []
    z8 = jnp.zeros((8, 8), f32)
    for g in range(4):
        sl = slice(g * 8, (g + 1) * 8)
        wih_blocks += [p['w_ih_f'][sl, :].T, p['w_ih_b'][sl, :].T]
        b_blocks += [(p['b_ih_f'] + p['b_hh_f'])[sl], (p['b_ih_b'] + p['b_hh_b'])[sl]]
        rf = p['w_hh_f'][sl, :].T
        rb = p['w_hh_b'][sl, :].T
        rec_blocks.append(jnp.concatenate(
            [jnp.concatenate([rf, z8], axis=1),
             jnp.concatenate([z8, rb], axis=1)], axis=0))
    kp['wih'] = jnp.concatenate(wih_blocks, axis=1)                  # (64,64)
    kp['bih'] = jnp.concatenate(b_blocks)[None, :]                   # (1,64)
    kp['wrec'] = jnp.concatenate(rec_blocks, axis=1)                 # (16,64)
    kp['gate_mask'] = jnp.tile(
        jnp.concatenate([jnp.ones(8, f32), jnp.zeros(8, f32)]), 4)[None, :]
    lane = jnp.arange(64)
    is_g = (lane >= 32) & (lane < 48)
    kp['gate_scale'] = jnp.where(is_g, 1.0, 0.5).astype(f32)[None, :]
    kp['gate_add'] = jnp.where(is_g, 0.0, 0.5).astype(f32)[None, :]

    # FC head Linear(16->4->2->1): purely linear -> collapse to one projection,
    # zero-padded per direction for the two hidden-state buffers.
    wfc = p['fc1_w'].T @ p['fc2_w'].T @ p['fc3_w'].T                 # (16,1)
    z81 = jnp.zeros((8, 1), f32)
    kp['wfc_f'] = jnp.concatenate([wfc[0:8], z81], axis=0)
    kp['wfc_b'] = jnp.concatenate([z81, wfc[8:16]], axis=0)
    kp['bfc'] = ((p['fc1_b'] @ p['fc2_w'].T + p['fc2_b']) @ p['fc3_w'].T
                 + p['fc3_b'])[None, :]                              # (1,1)
    return kp


# ----------------------------------------------------------------------------
# Forward pass (XLA glue = patch prep, layout reshapes / transposes only)
# ----------------------------------------------------------------------------

def forward(x, kp):
    B, L = x.shape                                                   # (B, 1024)
    T = L // 4                                                       # 256
    # conv1 'same' padding (1 left, 2 right), packed patch layout (B*16, 256)
    xpad = jnp.pad(x, ((0, 0), (1, 2)))
    xc = jnp.stack([xpad[:, k:k + L] for k in range(4)], axis=-1)    # (B,1024,4)
    xc = xc.reshape(B * 16, 256)                                     # [b*16+m, s*4+k]

    y5 = conv_pipeline(xc, kp)                                       # (B*8, 2048)
    lstm_in = y5.reshape(B, T, 64)                                   # (B, 256, 64)
    x_tm = jnp.transpose(lstm_in, (1, 0, 2)).reshape(T * B, 64)      # time-major

    out = bilstm_head(x_tm, kp, B, T)                                # (T*B, 1)
    return out.reshape(T, B).T                                       # (B, 256)


if __name__ == "__main__":
    key = jax.random.PRNGKey(0)
    pkey, xkey = jax.random.split(key)
    params = init_params(pkey)

    B = 2
    # row-stack as many samples as possible per kernel-1 grid step (<= 8)
    NB = max(d for d in range(1, min(B, 8) + 1) if B % d == 0)
    kp = prepare(params, NB)

    x = jax.random.normal(xkey, (B, 1024), dtype=jnp.float32)

    fwd = jax.jit(forward)
    y = jax.block_until_ready(fwd(x, kp))

    assert y.shape == (B, 256), y.shape
    assert bool(jnp.all(jnp.isfinite(y)))
    print("KERNEL_OK")
</pallas_src>

<mosaic_0001>
module attributes {stable_mosaic.version = 11 : i64} {
  func.func @conv_pipeline_kernel(%arg0: i32, %arg1: memref<32x256xf32, #tpu.memory_space<vmem>>, %arg2: memref<256x192xf32, #tpu.memory_space<vmem>>, %arg3: memref<1x192xf32, #tpu.memory_space<vmem>>, %arg4: memref<32x32xf32, #tpu.memory_space<vmem>>, %arg5: memref<192x192xf32, #tpu.memory_space<vmem>>, %arg6: memref<32x192xf32, #tpu.memory_space<vmem>>, %arg7: memref<32x192xf32, #tpu.memory_space<vmem>>, %arg8: memref<192x512xf32, #tpu.memory_space<vmem>>, %arg9: memref<1x512xf32, #tpu.memory_space<vmem>>, %arg10: memref<1x512xf32, #tpu.memory_space<vmem>>, %arg11: memref<1x512xf32, #tpu.memory_space<vmem>>, %arg12: memref<32x1xf32, #tpu.memory_space<vmem>>, %arg13: memref<32x1xf32, #tpu.memory_space<vmem>>, %arg14: memref<256x32xf32, #tpu.memory_space<vmem>>, %arg15: memref<256x32xf32, #tpu.memory_space<vmem>>, %arg16: memref<256x32xf32, #tpu.memory_space<vmem>>, %arg17: memref<1x32xf32, #tpu.memory_space<vmem>>, %arg18: memref<1x32xf32, #tpu.memory_space<vmem>>, %arg19: memref<1x32xf32, #tpu.memory_space<vmem>>, %arg20: memref<16x1xf32, #tpu.memory_space<vmem>>, %arg21: memref<16x1xf32, #tpu.memory_space<vmem>>, %arg22: memref<32x128xf32, #tpu.memory_space<vmem>>, %arg23: memref<32x128xf32, #tpu.memory_space<vmem>>, %arg24: memref<32x128xf32, #tpu.memory_space<vmem>>, %arg25: memref<1x128xf32, #tpu.memory_space<vmem>>, %arg26: memref<32x512xf32, #tpu.memory_space<vmem>>, %arg27: memref<1x512xf32, #tpu.memory_space<vmem>>, %arg28: memref<16x2048xf32, #tpu.memory_space<vmem>>, %arg29: memref<32x32xf32, #tpu.memory_space<vmem>>) attributes {dimension_semantics = [#tpu.dimension_semantics<parallel>], iteration_bounds = array<i64: 1>, scalar_prefetch = 0 : i64, scratch_operands = 1 : i64, tpu.core_type = #tpu.core_type<tc>, window_params = [{transform_indices = @transform_0, window_bounds = array<i64: 32, 256>}, {pipeline_mode = #tpu.pipeline_mode<synchronous>, transform_indices = @transform_1, window_bounds = array<i64: 256, 192>}, {pipeline_mode = #tpu.pipeline_mode<synchronous>, transform_indices = @transform_2, window_bounds = array<i64: 1, 192>}, {pipeline_mode = #tpu.pipeline_mode<synchronous>, transform_indices = @transform_3, window_bounds = array<i64: 32, 32>}, {pipeline_mode = #tpu.pipeline_mode<synchronous>, transform_indices = @transform_4, window_bounds = array<i64: 192, 192>}, {pipeline_mode = #tpu.pipeline_mode<synchronous>, transform_indices = @transform_5, window_bounds = array<i64: 32, 192>}, {pipeline_mode = #tpu.pipeline_mode<synchronous>, transform_indices = @transform_6, window_bounds = array<i64: 32, 192>}, {pipeline_mode = #tpu.pipeline_mode<synchronous>, transform_indices = @transform_7, window_bounds = array<i64: 192, 512>}, {pipeline_mode = #tpu.pipeline_mode<synchronous>, transform_indices = @transform_8, window_bounds = array<i64: 1, 512>}, {pipeline_mode = #tpu.pipeline_mode<synchronous>, transform_indices = @transform_9, window_bounds = array<i64: 1, 512>}, {pipeline_mode = #tpu.pipeline_mode<synchronous>, transform_indices = @transform_10, window_bounds = array<i64: 1, 512>}, {pipeline_mode = #tpu.pipeline_mode<synchronous>, transform_indices = @transform_11, window_bounds = array<i64: 32, 1>}, {pipeline_mode = #tpu.pipeline_mode<synchronous>, transform_indices = @transform_12, window_bounds = array<i64: 32, 1>}, {pipeline_mode = #tpu.pipeline_mode<synchronous>, transform_indices = @transform_13, window_bounds = array<i64: 256, 32>}, {pipeline_mode = #tpu.pipeline_mode<synchronous>, transform_indices = @transform_14, window_bounds = array<i64: 256, 32>}, {pipeline_mode = #tpu.pipeline_mode<synchronous>, transform_indices = @transform_15, window_bounds = array<i64: 256, 32>}, {pipeline_mode = #tpu.pipeline_mode<synchronous>, transform_indices = @transform_16, window_bounds = array<i64: 1, 32>}, {pipeline_mode = #tpu.pipeline_mode<synchronous>, transform_indices = @transform_17, window_bounds = array<i64: 1, 32>}, {pipeline_mode = #tpu.pipeline_mode<synchronous>, transform_indices = @transform_18, window_bounds = array<i64: 1, 32>}, {pipeline_mode = #tpu.pipeline_mode<synchronous>, transform_indices = @transform_19, window_bounds = array<i64: 16, 1>}, {pipeline_mode = #tpu.pipeline_mode<synchronous>, transform_indices = @transform_20, window_bounds = array<i64: 16, 1>}, {pipeline_mode = #tpu.pipeline_mode<synchronous>, transform_indices = @transform_21, window_bounds = array<i64: 32, 128>}, {pipeline_mode = #tpu.pipeline_mode<synchronous>, transform_indices = @transform_22, window_bounds = array<i64: 32, 128>}, {pipeline_mode = #tpu.pipeline_mode<synchronous>, transform_indices = @transform_23, window_bounds = array<i64: 32, 128>}, {pipeline_mode = #tpu.pipeline_mode<synchronous>, transform_indices = @transform_24, window_bounds = array<i64: 1, 128>}, {pipeline_mode = #tpu.pipeline_mode<synchronous>, transform_indices = @transform_25, window_bounds = array<i64: 32, 512>}, {pipeline_mode = #tpu.pipeline_mode<synchronous>, transform_indices = @transform_26, window_bounds = array<i64: 1, 512>}, {transform_indices = @transform_27, window_bounds = array<i64: 16, 2048>}]} {
    %c0 = arith.constant 0 : index
    %c0_0 = arith.constant 0 : index
    %0 = vector.load %arg1[%c0, %c0_0] : memref<32x256xf32, #tpu.memory_space<vmem>>, vector<32x256xf32>
    %c0_1 = arith.constant 0 : index
    %c0_2 = arith.constant 0 : index
    %1 = vector.load %arg2[%c0_1, %c0_2] : memref<256x192xf32, #tpu.memory_space<vmem>>, vector<256x192xf32>
    %cst = arith.constant dense<0.000000e+00> : vector<32x192xf32>
    %2 = tpu.matmul %0, %1, %cst {dimension_numbers = #tpu.dot_dimension_numbers<[1], [0], [0], [1], [0, 0, 1, 1], [], []>} : vector<32x256xf32>, vector<256x192xf32>, vector<32x192xf32> -> vector<32x192xf32>
    %c0_3 = arith.constant 0 : index
    %c0_4 = arith.constant 0 : index
    %3 = vector.load %arg3[%c0_3, %c0_4] : memref<1x192xf32, #tpu.memory_space<vmem>>, vector<1x192xf32>
    %4 = vector.broadcast %3 : vector<1x192xf32> to vector<32x192xf32>
    %5 = arith.addf %2, %4 : vector<32x192xf32>
    %c0_5 = arith.constant 0 : index
    %c0_6 = arith.constant 0 : index
    %6 = vector.load %arg4[%c0_5, %c0_6] : memref<32x32xf32, #tpu.memory_space<vmem>>, vector<32x32xf32>
    %cst_7 = arith.constant dense<0.000000e+00> : vector<32x192xf32>
    %7 = tpu.matmul %6, %5, %cst_7 {dimension_numbers = #tpu.dot_dimension_numbers<[1], [0], [0], [1], [0, 0, 1, 1], [], []>} : vector<32x32xf32>, vector<32x192xf32>, vector<32x192xf32> -> vector<32x192xf32>
    %c0_8 = arith.constant 0 : index
    %c0_9 = arith.constant 0 : index
    %8 = vector.load %arg5[%c0_8, %c0_9] : memref<192x192xf32, #tpu.memory_space<vmem>>, vector<192x192xf32>
    %cst_10 = arith.constant dense<0.000000e+00> : vector<32x192xf32>
    %9 = tpu.matmul %7, %8, %cst_10 {dimension_numbers = #tpu.dot_dimension_numbers<[1], [0], [0], [1], [0, 0, 1, 1], [], []>} : vector<32x192xf32>, vector<192x192xf32>, vector<32x192xf32> -> vector<32x192xf32>
    %10 = arith.subf %5, %9 : vector<32x192xf32>
    %c0_11 = arith.constant 0 : index
    %c0_12 = arith.constant 0 : index
    %11 = vector.load %arg4[%c0_11, %c0_12] : memref<32x32xf32, #tpu.memory_space<vmem>>, vector<32x32xf32>
    %12 = arith.mulf %10, %10 : vector<32x192xf32>
    %cst_13 = arith.constant dense<0.000000e+00> : vector<32x192xf32>
    %13 = tpu.matmul %11, %12, %cst_13 {dimension_numbers = #tpu.dot_dimension_numbers<[1], [0], [0], [1], [0, 0, 1, 1], [], []>} : vector<32x32xf32>, vector<32x192xf32>, vector<32x192xf32> -> vector<32x192xf32>
    %c0_14 = arith.constant 0 : index
    %c0_15 = arith.constant 0 : index
    %14 = vector.load %arg5[%c0_14, %c0_15] : memref<192x192xf32, #tpu.memory_space<vmem>>, vector<192x192xf32>
    %cst_16 = arith.constant dense<0.000000e+00> : vector<32x192xf32>
    %15 = tpu.matmul %13, %14, %cst_16 {dimension_numbers = #tpu.dot_dimension_numbers<[1], [0], [0], [1], [0, 0, 1, 1], [], []>} : vector<32x192xf32>, vector<192x192xf32>, vector<32x192xf32> -> vector<32x192xf32>
    %cst_17 = arith.constant 9.99999974E-6 : f32
    %16 = vector.broadcast %cst_17 : f32 to vector<32x192xf32>
    %17 = arith.addf %15, %16 : vector<32x192xf32>
    %18 = math.rsqrt %17 : vector<32x192xf32>
    %19 = arith.mulf %10, %18 : vector<32x192xf32>
    %c0_18 = arith.constant 0 : index
    %c0_19 = arith.constant 0 : index
    %20 = vector.load %arg6[%c0_18, %c0_19] : memref<32x192xf32, #tpu.memory_space<vmem>>, vector<32x192xf32>
    %21 = arith.mulf %19, %20 : vector<32x192xf32>
    %c0_20 = arith.constant 0 : index
    %c0_21 = arith.constant 0 : index
    %22 = vector.load %arg7[%c0_20, %c0_21] : memref<32x192xf32, #tpu.memory_space<vmem>>, vector<32x192xf32>
    %23 = arith.addf %21, %22 : vector<32x192xf32>
    %c0_22 = arith.constant 0 : index
    %c0_23 = arith.constant 0 : index
    %24 = vector.load %arg8[%c0_22, %c0_23] : memref<192x512xf32, #tpu.memory_space<vmem>>, vector<192x512xf32>
    %cst_24 = arith.constant dense<0.000000e+00> : vector<32x512xf32>
    %25 = tpu.matmul %23, %24, %cst_24 {dimension_numbers = #tpu.dot_dimension_numbers<[1], [0], [0], [1], [0, 0, 1, 1], [], []>} : vector<32x192xf32>, vector<192x512xf32>, vector<32x512xf32> -> vector<32x512xf32>
    %c0_25 = arith.constant 0 : index
    %c0_26 = arith.constant 0 : index
    %26 = vector.load %arg9[%c0_25, %c0_26] : memref<1x512xf32, #tpu.memory_space<vmem>>, vector<1x512xf32>
    %27 = vector.broadcast %26 : vector<1x512xf32> to vector<32x512xf32>
    %28 = arith.addf %25, %27 : vector<32x512xf32>
    %cst_27 = arith.constant 0.000000e+00 : f32
    %29 = vector.broadcast %cst_27 : f32 to vector<32x512xf32>
    %30 = arith.maximumf %28, %29 : vector<32x512xf32>
    %c0_28 = arith.constant 0 : index
    %c0_29 = arith.constant 0 : index
    %31 = vector.load %arg10[%c0_28, %c0_29] : memref<1x512xf32, #tpu.memory_space<vmem>>, vector<1x512xf32>
    %32 = vector.broadcast %31 : vector<1x512xf32> to vector<32x512xf32>
    %33 = arith.mulf %30, %32 : vector<32x512xf32>
    %c0_30 = arith.constant 0 : index
    %c0_31 = arith.constant 0 : index
    %34 = vector.load %arg11[%c0_30, %c0_31] : memref<1x512xf32, #tpu.memory_space<vmem>>, vector<1x512xf32>
    %35 = vector.broadcast %34 : vector<1x512xf32> to vector<32x512xf32>
    %36 = arith.addf %33, %35 : vector<32x512xf32>
    %37 = vector.extract_strided_slice %36 {offsets = [0, 0], sizes = [32, 256], strides = [1, 1]} : vector<32x512xf32> to vector<32x256xf32>
    %38 = vector.extract_strided_slice %36 {offsets = [0, 256], sizes = [32, 256], strides = [1, 1]} : vector<32x512xf32> to vector<32x256xf32>
    %39 = arith.maximumf %37, %38 : vector<32x256xf32>
    %c1_i32 = arith.constant 1 : i32
    %40 = tpu.dynamic_rotate %39 by %c1_i32 dim 0 : vector<32x256xf32>, i32 -> vector<32x256xf32>
    %c0_32 = arith.constant 0 : index
    %c0_33 = arith.constant 0 : index
    %41 = vector.load %arg12[%c0_32, %c0_33] : memref<32x1xf32, #tpu.memory_space<vmem>>, vector<32x1xf32>
    %42 = vector.broadcast %41 : vector<32x1xf32> to vector<32x256xf32>
    %43 = arith.mulf %40, %42 : vector<32x256xf32>
    %c31_i32 = arith.constant 31 : i32
    %44 = tpu.dynamic_rotate %39 by %c31_i32 dim 0 : vector<32x256xf32>, i32 -> vector<32x256xf32>
    %c0_34 = arith.constant 0 : index
    %c0_35 = arith.constant 0 : index
    %45 = vector.load %arg13[%c0_34, %c0_35] : memref<32x1xf32, #tpu.memory_space<vmem>>, vector<32x1xf32>
    %46 = vector.broadcast %45 : vector<32x1xf32> to vector<32x256xf32>
    %47 = arith.mulf %44, %46 : vector<32x256xf32>
    %c0_36 = arith.constant 0 : index
    %c0_37 = arith.constant 0 : index
    %48 = vector.load %arg14[%c0_36, %c0_37] : memref<256x32xf32, #tpu.memory_space<vmem>>, vector<256x32xf32>
    %cst_38 = arith.constant dense<0.000000e+00> : vector<32x32xf32>
    %49 = tpu.matmul %43, %48, %cst_38 {dimension_numbers = #tpu.dot_dimension_numbers<[1], [0], [0], [1], [0, 0, 1, 1], [], []>} : vector<32x256xf32>, vector<256x32xf32>, vector<32x32xf32> -> vector<32x32xf32>
    %c0_39 = arith.constant 0 : index
    %c0_40 = arith.constant 0 : index
    %50 = vector.load %arg15[%c0_39, %c0_40] : memref<256x32xf32, #tpu.memory_space<vmem>>, vector<256x32xf32>
    %cst_41 = arith.constant dense<0.000000e+00> : vector<32x32xf32>
    %51 = tpu.matmul %39, %50, %cst_41 {dimension_numbers = #tpu.dot_dimension_numbers<[1], [0], [0], [1], [0, 0, 1, 1], [], []>} : vector<32x256xf32>, vector<256x32xf32>, vector<32x32xf32> -> vector<32x32xf32>
    %52 = arith.addf %49, %51 : vector<32x32xf32>
    %c0_42 = arith.constant 0 : index
    %c0_43 = arith.constant 0 : index
    %53 = vector.load %arg16[%c0_42, %c0_43] : memref<256x32xf32, #tpu.memory_space<vmem>>, vector<256x32xf32>
    %cst_44 = arith.constant dense<0.000000e+00> : vector<32x32xf32>
    %54 = tpu.matmul %47, %53, %cst_44 {dimension_numbers = #tpu.dot_dimension_numbers<[1], [0], [0], [1], [0, 0, 1, 1], [], []>} : vector<32x256xf32>, vector<256x32xf32>, vector<32x32xf32> -> vector<32x32xf32>
    %55 = arith.addf %52, %54 : vector<32x32xf32>
    %c0_45 = arith.constant 0 : index
    %c0_46 = arith.constant 0 : index
    %56 = vector.load %arg17[%c0_45, %c0_46] : memref<1x32xf32, #tpu.memory_space<vmem>>, vector<1x32xf32>
    %57 = vector.broadcast %56 : vector<1x32xf32> to vector<32x32xf32>
    %58 = arith.addf %55, %57 : vector<32x32xf32>
    %cst_47 = arith.constant 0.000000e+00 : f32
    %59 = vector.broadcast %cst_47 : f32 to vector<32x32xf32>
    %60 = arith.maximumf %58, %59 : vector<32x32xf32>
    %c0_48 = arith.constant 0 : index
    %c0_49 = arith.constant 0 : index
    %61 = vector.load %arg18[%c0_48, %c0_49] : memref<1x32xf32, #tpu.memory_space<vmem>>, vector<1x32xf32>
    %62 = vector.broadcast %61 : vector<1x32xf32> to vector<32x32xf32>
    %63 = arith.mulf %60, %62 : vector<32x32xf32>
    %c0_50 = arith.constant 0 : index
    %c0_51 = arith.constant 0 : index
    %64 = vector.load %arg19[%c0_50, %c0_51] : memref<1x32xf32, #tpu.memory_space<vmem>>, vector<1x32xf32>
    %65 = vector.broadcast %64 : vector<1x32xf32> to vector<32x32xf32>
    %66 = arith.addf %63, %65 : vector<32x32xf32>
    %c0_52 = arith.constant 0 : index
    %c0_53 = arith.constant 0 : index
    %67 = vector.load %arg29[%c0_52, %c0_53] : memref<32x32xf32, #tpu.memory_space<vmem>>, vector<32x32xf32>
    tpu.vector_store %arg29[%c0_52, %c0_53], %66 {strides = array<i32>} : memref<32x32xf32, #tpu.memory_space<vmem>>, vector<32x32xf32>,
    %c0_54 = arith.constant 0 : index
    %c0_55 = arith.constant 0 : index
    %68 = tpu.strided_load %arg29[%c0_54, %c0_55] {strides = array<i32: 2, 1>} : memref<32x32xf32, #tpu.memory_space<vmem>>, vector<16x32xf32>
    %c1 = arith.constant 1 : index
    %c0_56 = arith.constant 0 : index
    %69 = tpu.strided_load %arg29[%c1, %c0_56] {strides = array<i32: 2, 1>} : memref<32x32xf32, #tpu.memory_space<vmem>>, vector<16x32xf32>
    %70 = arith.maximumf %68, %69 : vector<16x32xf32>
    %c1_i32_57 = arith.constant 1 : i32
    %71 = tpu.dynamic_rotate %70 by %c1_i32_57 dim 0 : vector<16x32xf32>, i32 -> vector<16x32xf32>
    %c0_58 = arith.constant 0 : index
    %c0_59 = arith.constant 0 : index
    %72 = vector.load %arg20[%c0_58, %c0_59] : memref<16x1xf32, #tpu.memory_space<vmem>>, vector<16x1xf32>
    %73 = vector.broadcast %72 : vector<16x1xf32> to vector<16x32xf32>
    %74 = arith.mulf %71, %73 : vector<16x32xf32>
    %c15_i32 = arith.constant 15 : i32
    %75 = tpu.dynamic_rotate %70 by %c15_i32 dim 0 : vector<16x32xf32>, i32 -> vector<16x32xf32>
    %c0_60 = arith.constant 0 : index
    %c0_61 = arith.constant 0 : index
    %76 = vector.load %arg21[%c0_60, %c0_61] : memref<16x1xf32, #tpu.memory_space<vmem>>, vector<16x1xf32>
    %77 = vector.broadcast %76 : vector<16x1xf32> to vector<16x32xf32>
    %78 = arith.mulf %75, %77 : vector<16x32xf32>
    %c0_62 = arith.constant 0 : index
    %c0_63 = arith.constant 0 : index
    %79 = vector.load %arg22[%c0_62, %c0_63] : memref<32x128xf32, #tpu.memory_space<vmem>>, vector<32x128xf32>
    %cst_64 = arith.constant dense<0.000000e+00> : vector<16x128xf32>
    %80 = tpu.matmul %70, %79, %cst_64 {dimension_numbers = #tpu.dot_dimension_numbers<[1], [0], [0], [1], [0, 0, 1, 1], [], []>} : vector<16x32xf32>, vector<32x128xf32>, vector<16x128xf32> -> vector<16x128xf32>
    %c0_65 = arith.constant 0 : index
    %c0_66 = arith.constant 0 : index
    %81 = vector.load %arg23[%c0_65, %c0_66] : memref<32x128xf32, #tpu.memory_space<vmem>>, vector<32x128xf32>
    %cst_67 = arith.constant dense<0.000000e+00> : vector<16x128xf32>
    %82 = tpu.matmul %74, %81, %cst_67 {dimension_numbers = #tpu.dot_dimension_numbers<[1], [0], [0], [1], [0, 0, 1, 1], [], []>} : vector<16x32xf32>, vector<32x128xf32>, vector<16x128xf32> -> vector<16x128xf32>
    %83 = arith.addf %80, %82 : vector<16x128xf32>
    %c0_68 = arith.constant 0 : index
    %c0_69 = arith.constant 0 : index
    %84 = vector.load %arg24[%c0_68, %c0_69] : memref<32x128xf32, #tpu.memory_space<vmem>>, vector<32x128xf32>
    %cst_70 = arith.constant dense<0.000000e+00> : vector<16x128xf32>
    %85 = tpu.matmul %78, %84, %cst_70 {dimension_numbers = #tpu.dot_dimension_numbers<[1], [0], [0], [1], [0, 0, 1, 1], [], []>} : vector<16x32xf32>, vector<32x128xf32>, vector<16x128xf32> -> vector<16x128xf32>
    %86 = arith.addf %83, %85 : vector<16x128xf32>
    %c0_71 = arith.constant 0 : index
    %c0_72 = arith.constant 0 : index
    %87 = vector.load %arg25[%c0_71, %c0_72] : memref<1x128xf32, #tpu.memory_space<vmem>>, vector<1x128xf32>
    %88 = vector.broadcast %87 : vector<1x128xf32> to vector<16x128xf32>
    %89 = arith.addf %86, %88 : vector<16x128xf32>
    %cst_73 = arith.constant 0.000000e+00 : f32
    %90 = vector.broadcast %cst_73 : f32 to vector<16x128xf32>
    %91 = arith.maximumf %89, %90 : vector<16x128xf32>
    %c0_74 = arith.constant 0 : index
    %c0_75 = arith.constant 0 : index
    %92 = vector.load %arg26[%c0_74, %c0_75] : memref<32x512xf32, #tpu.memory_space<vmem>>, vector<32x512xf32>
    %c0_76 = arith.constant 0 : index
    %c0_77 = arith.constant 0 : index
    %93 = vector.load %arg27[%c0_76, %c0_77] : memref<1x512xf32, #tpu.memory_space<vmem>>, vector<1x512xf32>
    %94 = vector.extract_strided_slice %91 {offsets = [0, 0], sizes = [16, 32], strides = [1, 1]} : vector<16x128xf32> to vector<16x32xf32>
    %cst_78 = arith.constant dense<0.000000e+00> : vector<16x512xf32>
    %95 = tpu.matmul %94, %92, %cst_78 {dimension_numbers = #tpu.dot_dimension_numbers<[1], [0], [0], [1], [0, 0, 1, 1], [], []>} : vector<16x32xf32>, vector<32x512xf32>, vector<16x512xf32> -> vector<16x512xf32>
    %96 = vector.broadcast %93 : vector<1x512xf32> to vector<16x512xf32>
    %97 = arith.addf %95, %96 : vector<16x512xf32>
    %c0_79 = arith.constant 0 : index
    %c0_80 = arith.constant 0 : index
    %98 = vector.load %arg28[%c0_79, %c0_80] : memref<16x2048xf32, #tpu.memory_space<vmem>>, vector<16x512xf32>
    tpu.vector_store %arg28[%c0_79, %c0_80], %97 {strides = array<i32>} : memref<16x2048xf32, #tpu.memory_space<vmem>>, vector<16x512xf32>,
    %99 = vector.extract_strided_slice %91 {offsets = [0, 32], sizes = [16, 32], strides = [1, 1]} : vector<16x128xf32> to vector<16x32xf32>
    %cst_81 = arith.constant dense<0.000000e+00> : vector<16x512xf32>
    %100 = tpu.matmul %99, %92, %cst_81 {dimension_numbers = #tpu.dot_dimension_numbers<[1], [0], [0], [1], [0, 0, 1, 1], [], []>} : vector<16x32xf32>, vector<32x512xf32>, vector<16x512xf32> -> vector<16x512xf32>
    %101 = vector.broadcast %93 : vector<1x512xf32> to vector<16x512xf32>
    %102 = arith.addf %100, %101 : vector<16x512xf32>
    %c0_82 = arith.constant 0 : index
    %c512 = arith.constant 512 : index
    %103 = vector.load %arg28[%c0_82, %c512] : memref<16x2048xf32, #tpu.memory_space<vmem>>, vector<16x512xf32>
    tpu.vector_store %arg28[%c0_82, %c512], %102 {strides = array<i32>} : memref<16x2048xf32, #tpu.memory_space<vmem>>, vector<16x512xf32>,
    %104 = vector.extract_strided_slice %91 {offsets = [0, 64], sizes = [16, 32], strides = [1, 1]} : vector<16x128xf32> to vector<16x32xf32>
    %cst_83 = arith.constant dense<0.000000e+00> : vector<16x512xf32>
    %105 = tpu.matmul %104, %92, %cst_83 {dimension_numbers = #tpu.dot_dimension_numbers<[1], [0], [0], [1], [0, 0, 1, 1], [], []>} : vector<16x32xf32>, vector<32x512xf32>, vector<16x512xf32> -> vector<16x512xf32>
    %106 = vector.broadcast %93 : vector<1x512xf32> to vector<16x512xf32>
    %107 = arith.addf %105, %106 : vector<16x512xf32>
    %c0_84 = arith.constant 0 : index
    %c1024 = arith.constant 1024 : index
    %108 = vector.load %arg28[%c0_84, %c1024] : memref<16x2048xf32, #tpu.memory_space<vmem>>, vector<16x512xf32>
    tpu.vector_store %arg28[%c0_84, %c1024], %107 {strides = array<i32>} : memref<16x2048xf32, #tpu.memory_space<vmem>>, vector<16x512xf32>,
    %109 = vector.extract_strided_slice %91 {offsets = [0, 96], sizes = [16, 32], strides = [1, 1]} : vector<16x128xf32> to vector<16x32xf32>
    %cst_85 = arith.constant dense<0.000000e+00> : vector<16x512xf32>
    %110 = tpu.matmul %109, %92, %cst_85 {dimension_numbers = #tpu.dot_dimension_numbers<[1], [0], [0], [1], [0, 0, 1, 1], [], []>} : vector<16x32xf32>, vector<32x512xf32>, vector<16x512xf32> -> vector<16x512xf32>
    %111 = vector.broadcast %93 : vector<1x512xf32> to vector<16x512xf32>
    %112 = arith.addf %110, %111 : vector<16x512xf32>
    %c0_86 = arith.constant 0 : index
    %c1536 = arith.constant 1536 : index
    %113 = vector.load %arg28[%c0_86, %c1536] : memref<16x2048xf32, #tpu.memory_space<vmem>>, vector<16x512xf32>
    tpu.vector_store %arg28[%c0_86, %c1536], %112 {strides = array<i32>} : memref<16x2048xf32, #tpu.memory_space<vmem>>, vector<16x512xf32>,
    return
  }
  func.func @transform_0(%arg0: i32) -> (i32, i32) {
    %c0_i32 = arith.constant 0 : i32
    %c0_i32_0 = arith.constant 0 : i32
    return %arg0, %c0_i32 : i32, i32
  }
  func.func @transform_1(%arg0: i32) -> (i32, i32) {
    %c0_i32 = arith.constant 0 : i32
    %c0_i32_0 = arith.constant 0 : i32
    %c0_i32_1 = arith.constant 0 : i32
    return %c0_i32, %c0_i32_0 : i32, i32
  }
  func.func @transform_2(%arg0: i32) -> (i32, i32) {
    %c0_i32 = arith.constant 0 : i32
    %c0_i32_0 = arith.constant 0 : i32
    %c0_i32_1 = arith.constant 0 : i32
    return %c0_i32, %c0_i32_0 : i32, i32
  }
  func.func @transform_3(%arg0: i32) -> (i32, i32) {
    %c0_i32 = arith.constant 0 : i32
    %c0_i32_0 = arith.constant 0 : i32
    %c0_i32_1 = arith.constant 0 : i32
    return %c0_i32, %c0_i32_0 : i32, i32
  }
  func.func @transform_4(%arg0: i32) -> (i32, i32) {
    %c0_i32 = arith.constant 0 : i32
    %c0_i32_0 = arith.constant 0 : i32
    %c0_i32_1 = arith.constant 0 : i32
    return %c0_i32, %c0_i32_0 : i32, i32
  }
  func.func @transform_5(%arg0: i32) -> (i32, i32) {
    %c0_i32 = arith.constant 0 : i32
    %c0_i32_0 = arith.constant 0 : i32
    %c0_i32_1 = arith.constant 0 : i32
    return %c0_i32, %c0_i32_0 : i32, i32
  }
  func.func @transform_6(%arg0: i32) -> (i32, i32) {
    %c0_i32 = arith.constant 0 : i32
    %c0_i32_0 = arith.constant 0 : i32
    %c0_i32_1 = arith.constant 0 : i32
    return %c0_i32, %c0_i32_0 : i32, i32
  }
  func.func @transform_7(%arg0: i32) -> (i32, i32) {
    %c0_i32 = arith.constant 0 : i32
    %c0_i32_0 = arith.constant 0 : i32
    %c0_i32_1 = arith.constant 0 : i32
    return %c0_i32, %c0_i32_0 : i32, i32
  }
  func.func @transform_8(%arg0: i32) -> (i32, i32) {
    %c0_i32 = arith.constant 0 : i32
    %c0_i32_0 = arith.constant 0 : i32
    %c0_i32_1 = arith.constant 0 : i32
    return %c0_i32, %c0_i32_0 : i32, i32
  }
  func.func @transform_9(%arg0: i32) -> (i32, i32) {
    %c0_i32 = arith.constant 0 : i32
    %c0_i32_0 = arith.constant 0 : i32
    %c0_i32_1 = arith.constant 0 : i32
    return %c0_i32, %c0_i32_0 : i32, i32
  }
  func.func @transform_10(%arg0: i32) -> (i32, i32) {
    %c0_i32 = arith.constant 0 : i32
    %c0_i32_0 = arith.constant 0 : i32
    %c0_i32_1 = arith.constant 0 : i32
    return %c0_i32, %c0_i32_0 : i32, i32
  }
  func.func @transform_11(%arg0: i32) -> (i32, i32) {
    %c0_i32 = arith.constant 0 : i32
    %c0_i32_0 = arith.constant 0 : i32
    %c0_i32_1 = arith.constant 0 : i32
    return %c0_i32, %c0_i32_0 : i32, i32
  }
  func.func @transform_12(%arg0: i32) -> (i32, i32) {
    %c0_i32 = arith.constant 0 : i32
    %c0_i32_0 = arith.constant 0 : i32
    %c0_i32_1 = arith.constant 0 : i32
    return %c0_i32, %c0_i32_0 : i32, i32
  }
  func.func @transform_13(%arg0: i32) -> (i32, i32) {
    %c0_i32 = arith.constant 0 : i32
    %c0_i32_0 = arith.constant 0 : i32
    %c0_i32_1 = arith.constant 0 : i32
    return %c0_i32, %c0_i32_0 : i32, i32
  }
  func.func @transform_14(%arg0: i32) -> (i32, i32) {
    %c0_i32 = arith.constant 0 : i32
    %c0_i32_0 = arith.constant 0 : i32
    %c0_i32_1 = arith.constant 0 : i32
    return %c0_i32, %c0_i32_0 : i32, i32
  }
  func.func @transform_15(%arg0: i32) -> (i32, i32) {
    %c0_i32 = arith.constant 0 : i32
    %c0_i32_0 = arith.constant 0 : i32
    %c0_i32_1 = arith.constant 0 : i32
    return %c0_i32, %c0_i32_0 : i32, i32
  }
  func.func @transform_16(%arg0: i32) -> (i32, i32) {
    %c0_i32 = arith.constant 0 : i32
    %c0_i32_0 = arith.constant 0 : i32
    %c0_i32_1 = arith.constant 0 : i32
    return %c0_i32, %c0_i32_0 : i32, i32
  }
  func.func @transform_17(%arg0: i32) -> (i32, i32) {
    %c0_i32 = arith.constant 0 : i32
    %c0_i32_0 = arith.constant 0 : i32
    %c0_i32_1 = arith.constant 0 : i32
    return %c0_i32, %c0_i32_0 : i32, i32
  }
  func.func @transform_18(%arg0: i32) -> (i32, i32) {
    %c0_i32 = arith.constant 0 : i32
    %c0_i32_0 = arith.constant 0 : i32
    %c0_i32_1 = arith.constant 0 : i32
    return %c0_i32, %c0_i32_0 : i32, i32
  }
  func.func @transform_19(%arg0: i32) -> (i32, i32) {
    %c0_i32 = arith.constant 0 : i32
    %c0_i32_0 = arith.constant 0 : i32
    %c0_i32_1 = arith.constant 0 : i32
    return %c0_i32, %c0_i32_0 : i32, i32
  }
  func.func @transform_20(%arg0: i32) -> (i32, i32) {
    %c0_i32 = arith.constant 0 : i32
    %c0_i32_0 = arith.constant 0 : i32
    %c0_i32_1 = arith.constant 0 : i32
    return %c0_i32, %c0_i32_0 : i32, i32
  }
  func.func @transform_21(%arg0: i32) -> (i32, i32) {
    %c0_i32 = arith.constant 0 : i32
    %c0_i32_0 = arith.constant 0 : i32
    %c0_i32_1 = arith.constant 0 : i32
    return %c0_i32, %c0_i32_0 : i32, i32
  }
  func.func @transform_22(%arg0: i32) -> (i32, i32) {
    %c0_i32 = arith.constant 0 : i32
    %c0_i32_0 = arith.constant 0 : i32
    %c0_i32_1 = arith.constant 0 : i32
    return %c0_i32, %c0_i32_0 : i32, i32
  }
  func.func @transform_23(%arg0: i32) -> (i32, i32) {
    %c0_i32 = arith.constant 0 : i32
    %c0_i32_0 = arith.constant 0 : i32
    %c0_i32_1 = arith.constant 0 : i32
    return %c0_i32, %c0_i32_0 : i32, i32
  }
  func.func @transform_24(%arg0: i32) -> (i32, i32) {
    %c0_i32 = arith.constant 0 : i32
    %c0_i32_0 = arith.constant 0 : i32
    %c0_i32_1 = arith.constant 0 : i32
    return %c0_i32, %c0_i32_0 : i32, i32
  }
  func.func @transform_25(%arg0: i32) -> (i32, i32) {
    %c0_i32 = arith.constant 0 : i32
    %c0_i32_0 = arith.constant 0 : i32
    %c0_i32_1 = arith.constant 0 : i32
    return %c0_i32, %c0_i32_0 : i32, i32
  }
  func.func @transform_26(%arg0: i32) -> (i32, i32) {
    %c0_i32 = arith.constant 0 : i32
    %c0_i32_0 = arith.constant 0 : i32
    %c0_i32_1 = arith.constant 0 : i32
    return %c0_i32, %c0_i32_0 : i32, i32
  }
  func.func @transform_27(%arg0: i32) -> (i32, i32) {
    %c0_i32 = arith.constant 0 : i32
    %c0_i32_0 = arith.constant 0 : i32
    return %arg0, %c0_i32 : i32, i32
  }
}

module attributes {stable_mosaic.version = 11 : i64} {
  func.func @bilstm_fc_kernel(%arg0: memref<512x64xf32, #tpu.memory_space<vmem>>, %arg1: memref<64x64xf32, #tpu.memory_space<vmem>>, %arg2: memref<1x64xf32, #tpu.memory_space<vmem>>, %arg3: memref<1x64xf32, #tpu.memory_space<vmem>>, %arg4: memref<16x64xf32, #tpu.memory_space<vmem>>, %arg5: memref<1x64xf32, #tpu.memory_space<vmem>>, %arg6: memref<1x64xf32, #tpu.memory_space<vmem>>, %arg7: memref<16x1xf32, #tpu.memory_space<vmem>>, %arg8: memref<16x1xf32, #tpu.memory_space<vmem>>, %arg9: memref<1x1xf32, #tpu.memory_space<vmem>>, %arg10: memref<512x1xf32, #tpu.memory_space<vmem>>, %arg11: memref<512x64xf32, #tpu.memory_space<vmem>>, %arg12: memref<512x64xf32, #tpu.memory_space<vmem>>, %arg13: memref<512x16xf32, #tpu.memory_space<vmem>>, %arg14: memref<512x16xf32, #tpu.memory_space<vmem>>) attributes {dimension_semantics = [], scalar_prefetch = 0 : i64, scratch_operands = 4 : i64, tpu.core_type = #tpu.core_type<tc>} {
    %c0 = arith.constant 0 : index
    %c0_0 = arith.constant 0 : index
    %0 = vector.load %arg0[%c0, %c0_0] : memref<512x64xf32, #tpu.memory_space<vmem>>, vector<512x64xf32>
    %c0_1 = arith.constant 0 : index
    %c0_2 = arith.constant 0 : index
    %1 = vector.load %arg1[%c0_1, %c0_2] : memref<64x64xf32, #tpu.memory_space<vmem>>, vector<64x64xf32>
    %cst = arith.constant dense<0.000000e+00> : vector<512x64xf32>
    %2 = tpu.matmul %0, %1, %cst {dimension_numbers = #tpu.dot_dimension_numbers<[1], [0], [0], [1], [0, 0, 1, 1], [], []>} : vector<512x64xf32>, vector<64x64xf32>, vector<512x64xf32> -> vector<512x64xf32>
    %c0_3 = arith.constant 0 : index
    %c0_4 = arith.constant 0 : index
    %3 = vector.load %arg2[%c0_3, %c0_4] : memref<1x64xf32, #tpu.memory_space<vmem>>, vector<1x64xf32>
    %4 = vector.broadcast %3 : vector<1x64xf32> to vector<512x64xf32>
    %5 = arith.addf %2, %4 : vector<512x64xf32>
    %c0_5 = arith.constant 0 : index
    %c0_6 = arith.constant 0 : index
    %6 = vector.load %arg3[%c0_5, %c0_6] : memref<1x64xf32, #tpu.memory_space<vmem>>, vector<1x64xf32>
    %7 = vector.broadcast %6 : vector<1x64xf32> to vector<512x64xf32>
    %8 = arith.mulf %5, %7 : vector<512x64xf32>
    %c0_7 = arith.constant 0 : index
    %c0_8 = arith.constant 0 : index
    %9 = vector.load %arg11[%c0_7, %c0_8] : memref<512x64xf32, #tpu.memory_space<vmem>>, vector<512x64xf32>
    tpu.vector_store %arg11[%c0_7, %c0_8], %8 {strides = array<i32>} : memref<512x64xf32, #tpu.memory_space<vmem>>, vector<512x64xf32>,
    %cst_9 = arith.constant 1.000000e+00 : f32
    %10 = vector.broadcast %cst_9 : f32 to vector<1x64xf32>
    %11 = arith.subf %10, %6 : vector<1x64xf32>
    %12 = vector.broadcast %11 : vector<1x64xf32> to vector<512x64xf32>
    %13 = arith.mulf %5, %12 : vector<512x64xf32>
    %c0_10 = arith.constant 0 : index
    %c0_11 = arith.constant 0 : index
    %14 = vector.load %arg12[%c0_10, %c0_11] : memref<512x64xf32, #tpu.memory_space<vmem>>, vector<512x64xf32>
    tpu.vector_store %arg12[%c0_10, %c0_11], %13 {strides = array<i32>} : memref<512x64xf32, #tpu.memory_space<vmem>>, vector<512x64xf32>,
    %c0_12 = arith.constant 0 : index
    %c0_13 = arith.constant 0 : index
    %15 = vector.load %arg4[%c0_12, %c0_13] : memref<16x64xf32, #tpu.memory_space<vmem>>, vector<16x64xf32>
    %c0_14 = arith.constant 0 : index
    %c0_15 = arith.constant 0 : index
    %16 = vector.load %arg5[%c0_14, %c0_15] : memref<1x64xf32, #tpu.memory_space<vmem>>, vector<1x64xf32>
    %c0_16 = arith.constant 0 : index
    %c0_17 = arith.constant 0 : index
    %17 = vector.load %arg6[%c0_16, %c0_17] : memref<1x64xf32, #tpu.memory_space<vmem>>, vector<1x64xf32>
    %cst_18 = arith.constant 0.000000e+00 : f32
    %18 = vector.broadcast %cst_18 : f32 to vector<2x16xf32>
    %cst_19 = arith.constant 0.000000e+00 : f32
    %19 = vector.broadcast %cst_19 : f32 to vector<2x16xf32>
    %c0_i32 = arith.constant 0 : i32
    %c128_i32 = arith.constant 128 : i32
    %20 = arith.addi %c0_i32, %c128_i32 : i32
    %c1_i32 = arith.constant 1 : i32
    %21:2 = scf.for %arg15 = %c0_i32 to %20 step %c1_i32 iter_args(%arg16 = %18, %arg17 = %19) -> (vector<2x16xf32>, vector<2x16xf32>)  : i32 {
      %c2_i32 = arith.constant 2 : i32
      %33 = arith.muli %c2_i32, %arg15 : i32
      %c255_i32 = arith.constant 255 : i32
      %34 = arith.subi %c255_i32, %33 : i32
      %c2_i32_35 = arith.constant 2 : i32
      %35 = arith.muli %33, %c2_i32_35 : i32
      %36 = arith.index_cast %35 : i32 to index
      %c0_36 = arith.constant 0 : index
      %37 = vector.load %arg11[%36, %c0_36] : memref<512x64xf32, #tpu.memory_space<vmem>>, vector<2x64xf32>
      %c2_i32_37 = arith.constant 2 : i32
      %38 = arith.muli %34, %c2_i32_37 : i32
      %39 = arith.index_cast %38 : i32 to index
      %c0_38 = arith.constant 0 : index
      %40 = vector.load %arg12[%39, %c0_38] : memref<512x64xf32, #tpu.memory_space<vmem>>, vector<2x64xf32>
      %41 = arith.addf %37, %40 : vector<2x64xf32>
      %cst_39 = arith.constant dense<0.000000e+00> : vector<2x64xf32>
      %42 = tpu.matmul %arg16, %15, %cst_39 {dimension_numbers = #tpu.dot_dimension_numbers<[1], [0], [0], [1], [0, 0, 1, 1], [], []>} : vector<2x16xf32>, vector<16x64xf32>, vector<2x64xf32> -> vector<2x64xf32>
      %43 = arith.addf %41, %42 : vector<2x64xf32>
      %44 = vector.broadcast %16 : vector<1x64xf32> to vector<2x64xf32>
      %45 = arith.mulf %43, %44 : vector<2x64xf32>
      %46 = math.tanh %45 : vector<2x64xf32>
      %47 = vector.broadcast %16 : vector<1x64xf32> to vector<2x64xf32>
      %48 = arith.mulf %46, %47 : vector<2x64xf32>
      %49 = vector.broadcast %17 : vector<1x64xf32> to vector<2x64xf32>
      %50 = arith.addf %48, %49 : vector<2x64xf32>
      %51 = vector.extract_strided_slice %50 {offsets = [0, 16], sizes = [2, 16], strides = [1, 1]} : vector<2x64xf32> to vector<2x16xf32>
      %52 = arith.mulf %51, %arg17 : vector<2x16xf32>
      %53 = vector.extract_strided_slice %50 {offsets = [0, 0], sizes = [2, 16], strides = [1, 1]} : vector<2x64xf32> to vector<2x16xf32>
      %54 = vector.extract_strided_slice %50 {offsets = [0, 32], sizes = [2, 16], strides = [1, 1]} : vector<2x64xf32> to vector<2x16xf32>
      %55 = arith.mulf %53, %54 : vector<2x16xf32>
      %56 = arith.addf %52, %55 : vector<2x16xf32>
      %57 = vector.extract_strided_slice %50 {offsets = [0, 48], sizes = [2, 16], strides = [1, 1]} : vector<2x64xf32> to vector<2x16xf32>
      %58 = math.tanh %56 : vector<2x16xf32>
      %59 = arith.mulf %57, %58 : vector<2x16xf32>
      %c2_i32_40 = arith.constant 2 : i32
      %60 = arith.muli %33, %c2_i32_40 : i32
      %61 = arith.index_cast %60 : i32 to index
      %c0_41 = arith.constant 0 : index
      %62 = vector.load %arg13[%61, %c0_41] : memref<512x16xf32, #tpu.memory_space<vmem>>, vector<2x16xf32>
      tpu.vector_store %arg13[%61, %c0_41], %59 {strides = array<i32>} : memref<512x16xf32, #tpu.memory_space<vmem>>, vector<2x16xf32>,
      %c2_i32_42 = arith.constant 2 : i32
      %63 = arith.muli %34, %c2_i32_42 : i32
      %64 = arith.index_cast %63 : i32 to index
      %c0_43 = arith.constant 0 : index
      %65 = vector.load %arg14[%64, %c0_43] : memref<512x16xf32, #tpu.memory_space<vmem>>, vector<2x16xf32>
      tpu.vector_store %arg14[%64, %c0_43], %59 {strides = array<i32>} : memref<512x16xf32, #tpu.memory_space<vmem>>, vector<2x16xf32>,
      %c2_i32_44 = arith.constant 2 : i32
      %66 = arith.muli %c2_i32_44, %arg15 : i32
      %c1_i32_45 = arith.constant 1 : i32
      %67 = arith.addi %66, %c1_i32_45 : i32
      %c255_i32_46 = arith.constant 255 : i32
      %68 = arith.subi %c255_i32_46, %67 : i32
      %c2_i32_47 = arith.constant 2 : i32
      %69 = arith.muli %67, %c2_i32_47 : i32
      %70 = arith.index_cast %69 : i32 to index
      %c0_48 = arith.constant 0 : index
      %71 = vector.load %arg11[%70, %c0_48] : memref<512x64xf32, #tpu.memory_space<vmem>>, vector<2x64xf32>
      %c2_i32_49 = arith.constant 2 : i32
      %72 = arith.muli %68, %c2_i32_49 : i32
      %73 = arith.index_cast %72 : i32 to index
      %c0_50 = arith.constant 0 : index
      %74 = vector.load %arg12[%73, %c0_50] : memref<512x64xf32, #tpu.memory_space<vmem>>, vector<2x64xf32>
      %75 = arith.addf %71, %74 : vector<2x64xf32>
      %cst_51 = arith.constant dense<0.000000e+00> : vector<2x64xf32>
      %76 = tpu.matmul %59, %15, %cst_51 {dimension_numbers = #tpu.dot_dimension_numbers<[1], [0], [0], [1], [0, 0, 1, 1], [], []>} : vector<2x16xf32>, vector<16x64xf32>, vector<2x64xf32> -> vector<2x64xf32>
      %77 = arith.addf %75, %76 : vector<2x64xf32>
      %78 = vector.broadcast %16 : vector<1x64xf32> to vector<2x64xf32>
      %79 = arith.mulf %77, %78 : vector<2x64xf32>
      %80 = math.tanh %79 : vector<2x64xf32>
      %81 = vector.broadcast %16 : vector<1x64xf32> to vector<2x64xf32>
      %82 = arith.mulf %80, %81 : vector<2x64xf32>
      %83 = vector.broadcast %17 : vector<1x64xf32> to vector<2x64xf32>
      %84 = arith.addf %82, %83 : vector<2x64xf32>
      %85 = vector.extract_strided_slice %84 {offsets = [0, 16], sizes = [2, 16], strides = [1, 1]} : vector<2x64xf32> to vector<2x16xf32>
      %86 = arith.mulf %85, %56 : vector<2x16xf32>
      %87 = vector.extract_strided_slice %84 {offsets = [0, 0], sizes = [2, 16], strides = [1, 1]} : vector<2x64xf32> to vector<2x16xf32>
      %88 = vector.extract_strided_slice %84 {offsets = [0, 32], sizes = [2, 16], strides = [1, 1]} : vector<2x64xf32> to vector<2x16xf32>
      %89 = arith.mulf %87, %88 : vector<2x16xf32>
      %90 = arith.addf %86, %89 : vector<2x16xf32>
      %91 = vector.extract_strided_slice %84 {offsets = [0, 48], sizes = [2, 16], strides = [1, 1]} : vector<2x64xf32> to vector<2x16xf32>
      %92 = math.tanh %90 : vector<2x16xf32>
      %93 = arith.mulf %91, %92 : vector<2x16xf32>
      %c2_i32_52 = arith.constant 2 : i32
      %94 = arith.muli %67, %c2_i32_52 : i32
      %95 = arith.index_cast %94 : i32 to index
      %c0_53 = arith.constant 0 : index
      %96 = vector.load %arg13[%95, %c0_53] : memref<512x16xf32, #tpu.memory_space<vmem>>, vector<2x16xf32>
      tpu.vector_store %arg13[%95, %c0_53], %93 {strides = array<i32>} : memref<512x16xf32, #tpu.memory_space<vmem>>, vector<2x16xf32>,
      %c2_i32_54 = arith.constant 2 : i32
      %97 = arith.muli %68, %c2_i32_54 : i32
      %98 = arith.index_cast %97 : i32 to index
      %c0_55 = arith.constant 0 : index
      %99 = vector.load %arg14[%98, %c0_55] : memref<512x16xf32, #tpu.memory_space<vmem>>, vector<2x16xf32>
      tpu.vector_store %arg14[%98, %c0_55], %93 {strides = array<i32>} : memref<512x16xf32, #tpu.memory_space<vmem>>, vector<2x16xf32>,
      scf.yield %93, %90 : vector<2x16xf32>, vector<2x16xf32>
    }
    %c128_i32_20 = arith.constant 128 : i32
    %c0_21 = arith.constant 0 : index
    %c0_22 = arith.constant 0 : index
    %22 = vector.load %arg13[%c0_21, %c0_22] : memref<512x16xf32, #tpu.memory_space<vmem>>, vector<512x16xf32>
    %c0_23 = arith.constant 0 : index
    %c0_24 = arith.constant 0 : index
    %23 = vector.load %arg7[%c0_23, %c0_24] : memref<16x1xf32, #tpu.memory_space<vmem>>, vector<16x1xf32>
    %cst_25 = arith.constant dense<0.000000e+00> : vector<512x1xf32>
    %24 = tpu.matmul %22, %23, %cst_25 {dimension_numbers = #tpu.dot_dimension_numbers<[1], [0], [0], [1], [0, 0, 1, 1], [], []>} : vector<512x16xf32>, vector<16x1xf32>, vector<512x1xf32> -> vector<512x1xf32>
    %c0_26 = arith.constant 0 : index
    %c0_27 = arith.constant 0 : index
    %25 = vector.load %arg14[%c0_26, %c0_27] : memref<512x16xf32, #tpu.memory_space<vmem>>, vector<512x16xf32>
    %c0_28 = arith.constant 0 : index
    %c0_29 = arith.constant 0 : index
    %26 = vector.load %arg8[%c0_28, %c0_29] : memref<16x1xf32, #tpu.memory_space<vmem>>, vector<16x1xf32>
    %cst_30 = arith.constant dense<0.000000e+00> : vector<512x1xf32>
    %27 = tpu.matmul %25, %26, %cst_30 {dimension_numbers = #tpu.dot_dimension_numbers<[1], [0], [0], [1], [0, 0, 1, 1], [], []>} : vector<512x16xf32>, vector<16x1xf32>, vector<512x1xf32> -> vector<512x1xf32>
    %28 = arith.addf %24, %27 : vector<512x1xf32>
    %c0_31 = arith.constant 0 : index
    %c0_32 = arith.constant 0 : index
    %29 = vector.load %arg9[%c0_31, %c0_32] : memref<1x1xf32, #tpu.memory_space<vmem>>, vector<1x1xf32>
    %30 = vector.broadcast %29 : vector<1x1xf32> to vector<512x1xf32>
    %31 = arith.addf %28, %30 : vector<512x1xf32>
    %c0_33 = arith.constant 0 : index
    %c0_34 = arith.constant 0 : index
    %32 = vector.load %arg10[%c0_33, %c0_34] : memref<512x1xf32, #tpu.memory_space<vmem>>, vector<512x1xf32>
    tpu.vector_store %arg10[%c0_33, %c0_34], %31 {strides = array<i32>} : memref<512x1xf32, #tpu.memory_space<vmem>>, vector<512x1xf32>,
    return
  }
}

</mosaic_0001>

<bundles_post_ra>
// kernel: forward.3
= control target key start
LH: loop header
LB: loop body
LE: loop exit
PB: predicated region body
PF: predicated region fallthrough
CT: control target
= control target key end

     0   :  { %vm116_vm0 = vcmask 523264   ;;  %s4726_s1 = inlined_call_operand.vmem [shape: f32[64,64], index: 1, kind: input, shape index: {}]   ;;  %s4727_s7 = inlined_call_operand.vmem [shape: f32[16,1], index: 7, kind: input, shape index: {}]   ;;  %s4728_s8 = inlined_call_operand.vmem [shape: f32[16,1], index: 8, kind: input, shape index: {}]   ;;  %s4729_s9 = inlined_call_operand.<no memory space> [shape: f32[1,1], index: 9, kind: input, shape index: {}]   ;;  %s4730_s10 = inlined_call_operand.vmem [shape: f32[512,1], index: 10, kind: output, shape index: {}]   ;;  %s4731_s0 = inlined_call_operand.vmem [shape: f32[512,64], index: 0, kind: input, shape index: {}]   ;;  %s4732_s4 = inlined_call_operand.vmem [shape: f32[16,64], index: 4, kind: input, shape index: {}]   ;;  %s4733_s5 = inlined_call_operand.vmem [shape: f32[1,64], index: 5, kind: input, shape index: {}]   ;;  %s4734_s6 = inlined_call_operand.vmem [shape: f32[1,64], index: 6, kind: input, shape index: {}]   ;;  %s4735_s3 = inlined_call_operand.vmem [shape: f32[1,64], index: 3, kind: input, shape index: {}]   ;;  %s4736_s2 = inlined_call_operand.vmem [shape: f32[1,64], index: 2, kind: input, shape index: {}]  }
   0x1   :  { %v15_v0 = vstv %s4729_s9  ;;  %v108_v1 = vld [vmem:[%s4726_s1 + $0x38] sm:$0xff]  ;;  %v107_v2 = vld [vmem:[%s4726_s1 + $0x30] sm:$0xff]  ;;  %v106_v3 = vld [vmem:[%s4726_s1 + $0x28] sm:$0xff] }
   0x2   :  { %16 = vst [vmem:[#allocation6] sm:$0x1] %v15_v0  ;;  %3093 = vmatprep.subr.mxu0 %v108_v1  ;;  %3419 = vmatprep.subr.mxu1 %v108_v1  ;;  %v105_v4 = vld [vmem:[%s4726_s1 + $0x20] sm:$0xff]  ;;  %v104_v5 = vld [vmem:[%s4726_s1 + $0x18] sm:$0xff]  ;;  %v103_v6 = vld [vmem:[%s4726_s1 + $0x10] sm:$0xff] }
   0x3   :  { %3094 = vmatpush3.msra.mxu0 %v108_v1  ;;  %3427 = vmatpush3.msra.mxu1 %v108_v1  ;;  %v102_v7 = vld [vmem:[%s4726_s1 + $0x8] sm:$0xff]  ;;  %v101_v8 = vld [vmem:[%s4726_s1] sm:$0xff]  ;;  %v39_v13 = vld [vmem:[%s4731_s0 + $0x10] sm:$0xff] }
   0x4   :  { %3095 = vmatprep.subr.mxu0 %v107_v2  ;;  %3420 = vmatprep.subr.mxu1 %v107_v2  ;;  %v37_v9 = vld [vmem:[%s4731_s0] sm:$0xff]  ;;  %v38_v11 = vld [vmem:[%s4731_s0 + $0x8] sm:$0xff]  ;;  %v71_v14 = vld [vmem:[%s4731_s0 + $0x110] sm:$0xff] }
   0x5   :  { %3096 = vmatpush3.msra.mxu0 %v107_v2  ;;  %3428 = vmatpush3.msra.mxu1 %v107_v2  ;;  %v69_v10 = vld [vmem:[%s4731_s0 + $0x100] sm:$0xff]  ;;  %v70_v12 = vld [vmem:[%s4731_s0 + $0x108] sm:$0xff]  ;;  %v40_v15 = vld [vmem:[%s4731_s0 + $0x18] sm:$0xff] }
   0x6   :  { %3097 = vmatprep.subr.mxu0 %v106_v3  ;;  %3421 = vmatprep.subr.mxu1 %v106_v3  ;;  %v72_v16 = vld [vmem:[%s4731_s0 + $0x118] sm:$0xff]  ;;  %v41_v17 = vld [vmem:[%s4731_s0 + $0x20] sm:$0xff]  ;;  %v42_v19 = vld [vmem:[%s4731_s0 + $0x28] sm:$0xff] }
   0x7   :  { %3098 = vmatpush3.msra.mxu0 %v106_v3  ;;  %3429 = vmatpush3.msra.mxu1 %v106_v3  ;;  %v73_v18 = vld [vmem:[%s4731_s0 + $0x120] sm:$0xff]  ;;  %v74_v20 = vld [vmem:[%s4731_s0 + $0x128] sm:$0xff]  ;;  %v43_v21 = vld [vmem:[%s4731_s0 + $0x30] sm:$0xff] }
   0x8   :  { %3099 = vmatprep.subr.mxu0 %v105_v4  ;;  %3422 = vmatprep.subr.mxu1 %v105_v4  ;;  %v75_v22 = vld [vmem:[%s4731_s0 + $0x130] sm:$0xff]  ;;  %v44_v23 = vld [vmem:[%s4731_s0 + $0x38] sm:$0xff]  ;;  %v45_v25 = vld [vmem:[%s4731_s0 + $0x40] sm:$0xff] }
   0x9   :  { %3100 = vmatpush3.msra.mxu0 %v105_v4  ;;  %3430 = vmatpush3.msra.mxu1 %v105_v4  ;;  %v76_v24 = vld [vmem:[%s4731_s0 + $0x138] sm:$0xff]  ;;  %v77_v26 = vld [vmem:[%s4731_s0 + $0x140] sm:$0xff]  ;;  %v46_v27 = vld [vmem:[%s4731_s0 + $0x48] sm:$0xff] }
   0xa   :  { %3101 = vmatprep.subr.mxu0 %v104_v5  ;;  %3423 = vmatprep.subr.mxu1 %v104_v5  ;;  %v78_v28 = vld [vmem:[%s4731_s0 + $0x148] sm:$0xff]  ;;  %v47_v29 = vld [vmem:[%s4731_s0 + $0x50] sm:$0xff]  ;;  %v48_v31 = vld [vmem:[%s4731_s0 + $0x58] sm:$0xff] }
   0xb   :  { %3102 = vmatpush3.msra.mxu0 %v104_v5  ;;  %3431 = vmatpush3.msra.mxu1 %v104_v5  ;;  %v79_v30 = vld [vmem:[%s4731_s0 + $0x150] sm:$0xff]  ;;  %v80_v32 = vld [vmem:[%s4731_s0 + $0x158] sm:$0xff]  ;;  %v49_v33 = vld [vmem:[%s4731_s0 + $0x60] sm:$0xff] }
   0xc   :  { %3103 = vmatprep.subr.mxu0 %v103_v6  ;;  %3424 = vmatprep.subr.mxu1 %v103_v6  ;;  %v81_v34 = vld [vmem:[%s4731_s0 + $0x160] sm:$0xff]  ;;  %v50_v35 = vld [vmem:[%s4731_s0 + $0x68] sm:$0xff]  ;;  %v51_v37 = vld [vmem:[%s4731_s0 + $0x70] sm:$0xff] }
   0xd   :  { %3104 = vmatpush3.msra.mxu0 %v103_v6  ;;  %3432 = vmatpush3.msra.mxu1 %v103_v6  ;;  %v82_v36 = vld [vmem:[%s4731_s0 + $0x168] sm:$0xff]  ;;  %v83_v38 = vld [vmem:[%s4731_s0 + $0x170] sm:$0xff]  ;;  %v52_v39 = vld [vmem:[%s4731_s0 + $0x78] sm:$0xff] }
   0xe   :  { %3105 = vmatprep.subr.mxu0 %v102_v7  ;;  %3425 = vmatprep.subr.mxu1 %v102_v7  ;;  %v84_v40 = vld [vmem:[%s4731_s0 + $0x178] sm:$0xff]  ;;  %v53_v41 = vld [vmem:[%s4731_s0 + $0x80] sm:$0xff]  ;;  %v54_v43 = vld [vmem:[%s4731_s0 + $0x88] sm:$0xff] }
   0xf   :  { %3106 = vmatpush3.msra.mxu0 %v102_v7  ;;  %3433 = vmatpush3.msra.mxu1 %v102_v7  ;;  %v85_v42 = vld [vmem:[%s4731_s0 + $0x180] sm:$0xff]  ;;  %v86_v44 = vld [vmem:[%s4731_s0 + $0x188] sm:$0xff]  ;;  %v55_v45 = vld [vmem:[%s4731_s0 + $0x90] sm:$0xff] }
  0x10   :  { %3107 = vmatprep.subr.mxu0 %v101_v8  ;;  %3426 = vmatprep.subr.mxu1 %v101_v8  ;;  %v87_v46 = vld [vmem:[%s4731_s0 + $0x190] sm:$0xff]  ;;  %v56_v47 = vld [vmem:[%s4731_s0 + $0x98] sm:$0xff]  ;;  %v57_v49 = vld [vmem:[%s4731_s0 + $0xa0] sm:$0xff] }
  0x11   :  { %3108 = vmatpush3.msra.mxu0 %v101_v8  ;;  %3434 = vmatpush3.msra.mxu1 %v101_v8  ;;  %v88_v48 = vld [vmem:[%s4731_s0 + $0x198] sm:$0xff]  ;;  %v89_v50 = vld [vmem:[%s4731_s0 + $0x1a0] sm:$0xff]  ;;  %v58_v51 = vld [vmem:[%s4731_s0 + $0xa8] sm:$0xff] }
  0x12   :  { %3109 = vmatprep.mubr.msk.f32.mxu0 %vm116_vm0, %v37_v9  ;;  %3157 = vmatprep.mubr.msk.f32.mxu1 %vm116_vm0, %v69_v10  ;;  %v90_v52 = vld [vmem:[%s4731_s0 + $0x1a8] sm:$0xff]  ;;  %v59_v53 = vld [vmem:[%s4731_s0 + $0xb0] sm:$0xff]  ;;  %v60_v55 = vld [vmem:[%s4731_s0 + $0xb8] sm:$0xff] }
  0x13   :  { %3110 = vmatmul.mubr.msk.f32.vlgmr.msra.gmra.mxu0 %vm116_vm0, %v38_v11  ;;  %3158 = vmatmul.mubr.msk.f32.vlgmr.msra.gmra.mxu1 %vm116_vm0, %v70_v12  ;;  %v91_v54 = vld [vmem:[%s4731_s0 + $0x1b0] sm:$0xff]  ;;  %v92_v56 = vld [vmem:[%s4731_s0 + $0x1b8] sm:$0xff]  ;;  %v61_v57 = vld [vmem:[%s4731_s0 + $0xc0] sm:$0xff] }
  0x14   :  { %3112 = vmatprep.mubr.msk.f32.mxu0 %vm116_vm0, %v39_v13  ;;  %3160 = vmatprep.mubr.msk.f32.mxu1 %vm116_vm0, %v71_v14  ;;  %v93_v58 = vld [vmem:[%s4731_s0 + $0x1c0] sm:$0xff]  ;;  %v62_v59 = vld [vmem:[%s4731_s0 + $0xc8] sm:$0xff]  ;;  %v63_v61 = vld [vmem:[%s4731_s0 + $0xd0] sm:$0xff]  ;;  %v696_v13 = vlaneseq }
  0x15   :  { %v94_v60 = vld [vmem:[%s4731_s0 + $0x1c8] sm:$0xff]  ;;  %v95_v62 = vld [vmem:[%s4731_s0 + $0x1d0] sm:$0xff]  ;;  %v64_v63 = vld [vmem:[%s4731_s0 + $0xd8] sm:$0xff] }
  0x16   :  { %v96_v0 = vld [vmem:[%s4731_s0 + $0x1d8] sm:$0xff]  ;;  %v65_v1 = vld [vmem:[%s4731_s0 + $0xe0] sm:$0xff]  ;;  %v66_v3 = vld [vmem:[%s4731_s0 + $0xe8] sm:$0xff]  ;;  %v697_v14 = vshrl.u32 %v696_v13, 7 }
  0x17   :  { %3113 = vmatmul.mubr.msk.f32.gmra.mxu0 %vm116_vm0, %v40_v15  ;;  %3161 = vmatmul.mubr.msk.f32.gmra.mxu1 %vm116_vm0, %v72_v16  ;;  %v97_v2 = vld [vmem:[%s4731_s0 + $0x1e0] sm:$0xff]  ;;  %v98_v4 = vld [vmem:[%s4731_s0 + $0x1e8] sm:$0xff]  ;;  %v67_v5 = vld [vmem:[%s4731_s0 + $0xf0] sm:$0xff] }
  0x18   :  { %3115 = vmatprep.mubr.msk.f32.mxu0 %vm116_vm0, %v41_v17  ;;  %3163 = vmatprep.mubr.msk.f32.mxu1 %vm116_vm0, %v73_v18  ;;  %v99_v6 = vld [vmem:[%s4731_s0 + $0x1f0] sm:$0xff]  ;;  %v68_v7 = vld [vmem:[%s4731_s0 + $0xf8] sm:$0xff]  ;;  %v3844_v9 = vld [vmem:[%s4732_s4] sm:$0xff]  ;;  %v698_v16 = vsub.s32 0, %v697_v14 }
  0x19   :  { %v100_v8 = vld [vmem:[%s4731_s0 + $0x1f8] sm:$0xff]  ;;  %v3849_v10 = vld [vmem:[%s4732_s4 + $0x8] sm:$0xff]  ;;  %v3854_v11 = vld [vmem:[%s4733_s5] ss:$0 sm:$0xff] }
  0x1a   :  { %v3859_v12 = vld [vmem:[%s4734_s6] ss:$0 sm:$0xff] }
  0x1b   :  { %3116 = vmatmul.mubr.msk.f32.gmra.mxu0 %vm116_vm0, %v42_v19  ;;  %3164 = vmatmul.mubr.msk.f32.gmra.mxu1 %vm116_vm0, %v74_v20  ;;  %v694_v15 = vld [vmem:[%s4735_s3] sm:$0x1] }
  0x1c   :  { %3118 = vmatprep.mubr.msk.f32.mxu0 %vm116_vm0, %v43_v21  ;;  %3166 = vmatprep.mubr.msk.f32.mxu1 %vm116_vm0, %v75_v22  ;;  %v829_v17 = vsub.f32 1.0, %v694_v15  ;;  %v3867_v18 = vld [vmem:[%s4736_s2] ss:$0 sm:$0xff]  ;;  %v3869_v19 = vrot.slane %v694_v15, %v698_v16  ;;  %s4197_s2 = smov 0  }
  0x1e   :  { %v3871_v20 = vrot.slane %v829_v17, %v698_v16 }
  0x1f   :  { %3119 = vmatmul.mubr.msk.f32.gmra.mxu0 %vm116_vm0, %v44_v23  ;;  %3167 = vmatmul.mubr.msk.f32.gmra.mxu1 %vm116_vm0, %v76_v24 }
  0x20   :  { %3121 = vmatprep.mubr.msk.f32.mxu0 %vm116_vm0, %v45_v25  ;;  %3169 = vmatprep.mubr.msk.f32.mxu1 %vm116_vm0, %v77_v26 }
  0x23   :  { %3122 = vmatmul.mubr.msk.f32.gmra.mxu0 %vm116_vm0, %v46_v27  ;;  %3170 = vmatmul.mubr.msk.f32.gmra.mxu1 %vm116_vm0, %v78_v28 }
  0x24   :  { %3124 = vmatprep.mubr.msk.f32.mxu0 %vm116_vm0, %v47_v29  ;;  %3172 = vmatprep.mubr.msk.f32.mxu1 %vm116_vm0, %v79_v30 }
  0x27   :  { %3125 = vmatmul.mubr.msk.f32.gmra.mxu0 %vm116_vm0, %v48_v31  ;;  %3173 = vmatmul.mubr.msk.f32.gmra.mxu1 %vm116_vm0, %v80_v32 }
  0x28   :  { %3127 = vmatprep.mubr.msk.f32.mxu0 %vm116_vm0, %v49_v33  ;;  %3175 = vmatprep.mubr.msk.f32.mxu1 %vm116_vm0, %v81_v34 }
  0x2b   :  { %3128 = vmatmul.mubr.msk.f32.gmra.mxu0 %vm116_vm0, %v50_v35  ;;  %3176 = vmatmul.mubr.msk.f32.gmra.mxu1 %vm116_vm0, %v82_v36 }
  0x2c   :  { %3130 = vmatprep.mubr.msk.f32.mxu0 %vm116_vm0, %v51_v37  ;;  %3178 = vmatprep.mubr.msk.f32.mxu1 %vm116_vm0, %v83_v38 }
  0x2f   :  { %3131 = vmatmul.mubr.msk.f32.gmra.mxu0 %vm116_vm0, %v52_v39  ;;  %3179 = vmatmul.mubr.msk.f32.gmra.mxu1 %vm116_vm0, %v84_v40 }
  0x30   :  { %3133 = vmatprep.mubr.msk.f32.mxu0 %vm116_vm0, %v53_v41  ;;  %3181 = vmatprep.mubr.msk.f32.mxu1 %vm116_vm0, %v85_v42 }
  0x33   :  { %3134 = vmatmul.mubr.msk.f32.gmra.mxu0 %vm116_vm0, %v54_v43  ;;  %3182 = vmatmul.mubr.msk.f32.gmra.mxu1 %vm116_vm0, %v86_v44 }
  0x34   :  { %3136 = vmatprep.mubr.msk.f32.mxu0 %vm116_vm0, %v55_v45  ;;  %3184 = vmatprep.mubr.msk.f32.mxu1 %vm116_vm0, %v87_v46 }
  0x37   :  { %3137 = vmatmul.mubr.msk.f32.gmra.mxu0 %vm116_vm0, %v56_v47  ;;  %3185 = vmatmul.mubr.msk.f32.gmra.mxu1 %vm116_vm0, %v88_v48 }
  0x38   :  { %3139 = vmatprep.mubr.msk.f32.mxu0 %vm116_vm0, %v57_v49  ;;  %3187 = vmatprep.mubr.msk.f32.mxu1 %vm116_vm0, %v89_v50 }
  0x3b   :  { %3140 = vmatmul.mubr.msk.f32.gmra.mxu0 %vm116_vm0, %v58_v51  ;;  %3188 = vmatmul.mubr.msk.f32.gmra.mxu1 %vm116_vm0, %v90_v52 }
  0x3c   :  { %3142 = vmatprep.mubr.msk.f32.mxu0 %vm116_vm0, %v59_v53  ;;  %3190 = vmatprep.mubr.msk.f32.mxu1 %vm116_vm0, %v91_v54 }
  0x3f   :  { %3143 = vmatmul.mubr.msk.f32.gmra.mxu0 %vm116_vm0, %v60_v55  ;;  %3191 = vmatmul.mubr.msk.f32.gmra.mxu1 %vm116_vm0, %v92_v56 }
  0x40   :  { %3145 = vmatprep.mubr.msk.f32.mxu0 %vm116_vm0, %v61_v57  ;;  %3193 = vmatprep.mubr.msk.f32.mxu1 %vm116_vm0, %v93_v58 }
  0x43   :  { %3146 = vmatmul.mubr.msk.f32.gmra.mxu0 %vm116_vm0, %v62_v59  ;;  %3194 = vmatmul.mubr.msk.f32.gmra.mxu1 %vm116_vm0, %v94_v60 }
  0x44   :  { %3148 = vmatprep.mubr.msk.f32.mxu0 %vm116_vm0, %v63_v61  ;;  %3196 = vmatprep.mubr.msk.f32.mxu1 %vm116_vm0, %v95_v62 }
  0x47   :  { %3149 = vmatmul.mubr.msk.f32.gmra.mxu0 %vm116_vm0, %v64_v63  ;;  %3197 = vmatmul.mubr.msk.f32.gmra.mxu1 %vm116_vm0, %v96_v0 }
  0x48   :  { %3151 = vmatprep.mubr.msk.f32.mxu0 %vm116_vm0, %v65_v1  ;;  %3199 = vmatprep.mubr.msk.f32.mxu1 %vm116_vm0, %v97_v2 }
  0x4b   :  { %3152 = vmatmul.mubr.msk.f32.gmra.mxu0 %vm116_vm0, %v66_v3  ;;  %3200 = vmatmul.mubr.msk.f32.gmra.mxu1 %vm116_vm0, %v98_v4 }
  0x4c   :  { %3154 = vmatprep.mubr.msk.f32.mxu0 %vm116_vm0, %v67_v5  ;;  %3202 = vmatprep.mubr.msk.f32.mxu1 %vm116_vm0, %v99_v6 }
  0x4f   :  { %3155 = vmatmul.mubr.msk.f32.gmra.mxu0 %vm116_vm0, %v68_v7  ;;  %3203 = vmatmul.mubr.msk.f32.gmra.mxu1 %vm116_vm0, %v100_v8 }
  0xd3   :  { %v3111_v21 = vpop.f32.mrf.mxu0  ;;  %v3159_v22 = vpop.f32.mrf.mxu1 }
  0xd4   :  { %v381_v23 = vadd.f32 %v3111_v21, %v3867_v18  ;;  %v541_v24 = vadd.f32 %v3159_v22, %v3867_v18 }
  0xd5   :  { %v375_v25 = vpop.f32.mrf.mxu0  ;;  %v535_v26 = vpop.f32.mrf.mxu1 }
  0xd6   :  { %v702_v27 = vmul.f32 %v3869_v19, %v381_v23  ;;  %v837_v28 = vmul.f32 %v3871_v20, %v381_v23  ;;  %v734_v29 = vmul.f32 %v3869_v19, %v541_v24  ;;  %v869_v30 = vmul.f32 %v3871_v20, %v541_v24 }
  0xd7   :  { %v376_v31 = vadd.f32 %v3867_v18, %v375_v25  ;;  %v536_v32 = vadd.f32 %v3867_v18, %v535_v26  ;;  %v3114_v33 = vpop.f32.mrf.mxu0  ;;  %v3162_v34 = vpop.f32.mrf.mxu1 }
  0xd8   :  { %766 = vst.msk [vmem:[#allocation2 + $0x8] sm:$0xff] %vm116_vm0, %v702_v27  ;;  %901 = vst.msk [vmem:[#allocation3 + $0x8] sm:$0xff] %vm116_vm0, %v837_v28  ;;  %v391_v35 = vadd.f32 %v3114_v33, %v3867_v18  ;;  %v551_v36 = vadd.f32 %v3162_v34, %v3867_v18 }
  0xd9   :  { %798 = vst.msk [vmem:[#allocation2 + $0x108] sm:$0xff] %vm116_vm0, %v734_v29  ;;  %933 = vst.msk [vmem:[#allocation3 + $0x108] sm:$0xff] %vm116_vm0, %v869_v30  ;;  %v701_v37 = vmul.f32 %v3869_v19, %v376_v31  ;;  %v836_v38 = vmul.f32 %v3871_v20, %v376_v31  ;;  %v733_v39 = vmul.f32 %v3869_v19, %v536_v32  ;;  %v385_v41 = vpop.f32.mrf.mxu0  ;;  %v545_v42 = vpop.f32.mrf.mxu1 }
  0xda   :  { %v868_v40 = vmul.f32 %v3871_v20, %v536_v32  ;;  %v704_v43 = vmul.f32 %v3869_v19, %v391_v35  ;;  %v839_v44 = vmul.f32 %v3871_v20, %v391_v35  ;;  %v736_v45 = vmul.f32 %v3869_v19, %v551_v36 }
  0xdb   :  { %v871_v46 = vmul.f32 %v3871_v20, %v551_v36  ;;  %765 = vst.msk [vmem:[#allocation2] sm:$0xff] %vm116_vm0, %v701_v37  ;;  %900 = vst.msk [vmem:[#allocation3] sm:$0xff] %vm116_vm0, %v836_v38  ;;  %v386_v47 = vadd.f32 %v3867_v18, %v385_v41  ;;  %v546_v48 = vadd.f32 %v3867_v18, %v545_v42  ;;  %v3117_v49 = vpop.f32.mrf.mxu0  ;;  %v3165_v50 = vpop.f32.mrf.mxu1 }
  0xdc   :  { %797 = vst.msk [vmem:[#allocation2 + $0x100] sm:$0xff] %vm116_vm0, %v733_v39  ;;  %932 = vst.msk [vmem:[#allocation3 + $0x100] sm:$0xff] %vm116_vm0, %v868_v40  ;;  %v401_v51 = vadd.f32 %v3117_v49, %v3867_v18  ;;  %v561_v52 = vadd.f32 %v3165_v50, %v3867_v18 }
  0xdd   :  { %768 = vst.msk [vmem:[#allocation2 + $0x18] sm:$0xff] %vm116_vm0, %v704_v43  ;;  %903 = vst.msk [vmem:[#allocation3 + $0x18] sm:$0xff] %vm116_vm0, %v839_v44  ;;  %v703_v53 = vmul.f32 %v3869_v19, %v386_v47  ;;  %v838_v54 = vmul.f32 %v3871_v20, %v386_v47  ;;  %v735_v55 = vmul.f32 %v3869_v19, %v546_v48  ;;  %v395_v57 = vpop.f32.mrf.mxu0  ;;  %v555_v58 = vpop.f32.mrf.mxu1 }
  0xde   :  { %800 = vst.msk [vmem:[#allocation2 + $0x118] sm:$0xff] %vm116_vm0, %v736_v45  ;;  %935 = vst.msk [vmem:[#allocation3 + $0x118] sm:$0xff] %vm116_vm0, %v871_v46  ;;  %v870_v56 = vmul.f32 %v3871_v20, %v546_v48  ;;  %v706_v59 = vmul.f32 %v3869_v19, %v401_v51  ;;  %v841_v60 = vmul.f32 %v3871_v20, %v401_v51 }
  0xdf   :  { %v738_v61 = vmul.f32 %v3869_v19, %v561_v52  ;;  %v873_v62 = vmul.f32 %v3871_v20, %v561_v52  ;;  %767 = vst.msk [vmem:[#allocation2 + $0x10] sm:$0xff] %vm116_vm0, %v703_v53  ;;  %902 = vst.msk [vmem:[#allocation3 + $0x10] sm:$0xff] %vm116_vm0, %v838_v54  ;;  %v396_v63 = vadd.f32 %v3867_v18, %v395_v57  ;;  %v3120_v1 = vpop.f32.mrf.mxu0  ;;  %v3168_v2 = vpop.f32.mrf.mxu1 }
  0xe0   :  { %799 = vst.msk [vmem:[#allocation2 + $0x110] sm:$0xff] %vm116_vm0, %v735_v55  ;;  %934 = vst.msk [vmem:[#allocation3 + $0x110] sm:$0xff] %vm116_vm0, %v870_v56  ;;  %v556_v0 = vadd.f32 %v3867_v18, %v555_v58  ;;  %v411_v3 = vadd.f32 %v3120_v1, %v3867_v18  ;;  %v571_v4 = vadd.f32 %v3168_v2, %v3867_v18 }
  0xe1   :  { %770 = vst.msk [vmem:[#allocation2 + $0x28] sm:$0xff] %vm116_vm0, %v706_v59  ;;  %905 = vst.msk [vmem:[#allocation3 + $0x28] sm:$0xff] %vm116_vm0, %v841_v60  ;;  %v705_v5 = vmul.f32 %v3869_v19, %v396_v63  ;;  %v840_v6 = vmul.f32 %v3871_v20, %v396_v63  ;;  %v405_v13 = vpop.f32.mrf.mxu0  ;;  %v565_v14 = vpop.f32.mrf.mxu1 }
  0xe2   :  { %802 = vst.msk [vmem:[#allocation2 + $0x128] sm:$0xff] %vm116_vm0, %v738_v61  ;;  %937 = vst.msk [vmem:[#allocation3 + $0x128] sm:$0xff] %vm116_vm0, %v873_v62  ;;  %v737_v7 = vmul.f32 %v3869_v19, %v556_v0  ;;  %v872_v8 = vmul.f32 %v3871_v20, %v556_v0  ;;  %v708_v15 = vmul.f32 %v3869_v19, %v411_v3 }
  0xe3   :  { %v843_v16 = vmul.f32 %v3871_v20, %v411_v3  ;;  %v740_v17 = vmul.f32 %v3869_v19, %v571_v4  ;;  %v875_v21 = vmul.f32 %v3871_v20, %v571_v4  ;;  %769 = vst.msk [vmem:[#allocation2 + $0x20] sm:$0xff] %vm116_vm0, %v705_v5  ;;  %904 = vst.msk [vmem:[#allocation3 + $0x20] sm:$0xff] %vm116_vm0, %v840_v6  ;;  %v3123_v24 = vpop.f32.mrf.mxu0  ;;  %v3171_v25 = vpop.f32.mrf.mxu1 }
  0xe4   :  { %801 = vst.msk [vmem:[#allocation2 + $0x120] sm:$0xff] %vm116_vm0, %v737_v7  ;;  %936 = vst.msk [vmem:[#allocation3 + $0x120] sm:$0xff] %vm116_vm0, %v872_v8  ;;  %v406_v22 = vadd.f32 %v3867_v18, %v405_v13  ;;  %v566_v23 = vadd.f32 %v3867_v18, %v565_v14  ;;  %v421_v26 = vadd.f32 %v3123_v24, %v3867_v18 }
  0xe5   :  { %772 = vst.msk [vmem:[#allocation2 + $0x38] sm:$0xff] %vm116_vm0, %v708_v15  ;;  %907 = vst.msk [vmem:[#allocation3 + $0x38] sm:$0xff] %vm116_vm0, %v843_v16  ;;  %v581_v27 = vadd.f32 %v3171_v25, %v3867_v18  ;;  %v415_v32 = vpop.f32.mrf.mxu0  ;;  %v575_v33 = vpop.f32.mrf.mxu1 }
  0xe6   :  { %804 = vst.msk [vmem:[#allocation2 + $0x138] sm:$0xff] %vm116_vm0, %v740_v17  ;;  %939 = vst.msk [vmem:[#allocation3 + $0x138] sm:$0xff] %vm116_vm0, %v875_v21  ;;  %v707_v28 = vmul.f32 %v3869_v19, %v406_v22  ;;  %v842_v29 = vmul.f32 %v3871_v20, %v406_v22  ;;  %v739_v30 = vmul.f32 %v3869_v19, %v566_v23 }
  0xe7   :  { %v874_v31 = vmul.f32 %v3871_v20, %v566_v23  ;;  %v710_v34 = vmul.f32 %v3869_v19, %v421_v26  ;;  %v845_v35 = vmul.f32 %v3871_v20, %v421_v26  ;;  %v742_v36 = vmul.f32 %v3869_v19, %v581_v27  ;;  %v3126_v40 = vpop.f32.mrf.mxu0  ;;  %v3174_v41 = vpop.f32.mrf.mxu1 }
  0xe8   :  { %v877_v37 = vmul.f32 %v3871_v20, %v581_v27  ;;  %771 = vst.msk [vmem:[#allocation2 + $0x30] sm:$0xff] %vm116_vm0, %v707_v28  ;;  %906 = vst.msk [vmem:[#allocation3 + $0x30] sm:$0xff] %vm116_vm0, %v842_v29  ;;  %v416_v38 = vadd.f32 %v3867_v18, %v415_v32  ;;  %v576_v39 = vadd.f32 %v3867_v18, %v575_v33 }
  0xe9   :  { %803 = vst.msk [vmem:[#allocation2 + $0x130] sm:$0xff] %vm116_vm0, %v739_v30  ;;  %938 = vst.msk [vmem:[#allocation3 + $0x130] sm:$0xff] %vm116_vm0, %v874_v31  ;;  %v431_v42 = vadd.f32 %v3126_v40, %v3867_v18  ;;  %v591_v43 = vadd.f32 %v3174_v41, %v3867_v18  ;;  %v425_v48 = vpop.f32.mrf.mxu0  ;;  %v585_v49 = vpop.f32.mrf.mxu1 }
  0xea   :  { %774 = vst.msk [vmem:[#allocation2 + $0x48] sm:$0xff] %vm116_vm0, %v710_v34  ;;  %909 = vst.msk [vmem:[#allocation3 + $0x48] sm:$0xff] %vm116_vm0, %v845_v35  ;;  %v709_v44 = vmul.f32 %v3869_v19, %v416_v38  ;;  %v844_v45 = vmul.f32 %v3871_v20, %v416_v38  ;;  %v741_v46 = vmul.f32 %v3869_v19, %v576_v39 }
  0xeb   :  { %806 = vst.msk [vmem:[#allocation2 + $0x148] sm:$0xff] %vm116_vm0, %v742_v36  ;;  %941 = vst.msk [vmem:[#allocation3 + $0x148] sm:$0xff] %vm116_vm0, %v877_v37  ;;  %v876_v47 = vmul.f32 %v3871_v20, %v576_v39  ;;  %v712_v50 = vmul.f32 %v3869_v19, %v431_v42  ;;  %v847_v51 = vmul.f32 %v3871_v20, %v431_v42  ;;  %v3129_v56 = vpop.f32.mrf.mxu0  ;;  %v3177_v57 = vpop.f32.mrf.mxu1 }
  0xec   :  { %v744_v52 = vmul.f32 %v3869_v19, %v591_v43  ;;  %v879_v53 = vmul.f32 %v3871_v20, %v591_v43  ;;  %773 = vst.msk [vmem:[#allocation2 + $0x40] sm:$0xff] %vm116_vm0, %v709_v44  ;;  %908 = vst.msk [vmem:[#allocation3 + $0x40] sm:$0xff] %vm116_vm0, %v844_v45  ;;  %v426_v54 = vadd.f32 %v3867_v18, %v425_v48 }
  0xed   :  { %805 = vst.msk [vmem:[#allocation2 + $0x140] sm:$0xff] %vm116_vm0, %v741_v46  ;;  %940 = vst.msk [vmem:[#allocation3 + $0x140] sm:$0xff] %vm116_vm0, %v876_v47  ;;  %v586_v55 = vadd.f32 %v3867_v18, %v585_v49  ;;  %v441_v58 = vadd.f32 %v3129_v56, %v3867_v18  ;;  %v601_v59 = vadd.f32 %v3177_v57, %v3867_v18  ;;  %v435_v0 = vpop.f32.mrf.mxu0  ;;  %v595_v1 = vpop.f32.mrf.mxu1 }
  0xee   :  { %776 = vst.msk [vmem:[#allocation2 + $0x58] sm:$0xff] %vm116_vm0, %v712_v50  ;;  %911 = vst.msk [vmem:[#allocation3 + $0x58] sm:$0xff] %vm116_vm0, %v847_v51  ;;  %v711_v60 = vmul.f32 %v3869_v19, %v426_v54  ;;  %v846_v61 = vmul.f32 %v3871_v20, %v426_v54  ;;  %v436_v6 = vadd.f32 %v3867_v18, %v435_v0 }
  0xef   :  { %808 = vst.msk [vmem:[#allocation2 + $0x158] sm:$0xff] %vm116_vm0, %v744_v52  ;;  %943 = vst.msk [vmem:[#allocation3 + $0x158] sm:$0xff] %vm116_vm0, %v879_v53  ;;  %v743_v62 = vmul.f32 %v3869_v19, %v586_v55  ;;  %v878_v63 = vmul.f32 %v3871_v20, %v586_v55  ;;  %v714_v2 = vmul.f32 %v3869_v19, %v441_v58  ;;  %v3132_v8 = vpop.f32.mrf.mxu0  ;;  %v3180_v13 = vpop.f32.mrf.mxu1 }
  0xf0   :  { %v849_v3 = vmul.f32 %v3871_v20, %v441_v58  ;;  %v746_v4 = vmul.f32 %v3869_v19, %v601_v59  ;;  %v881_v5 = vmul.f32 %v3871_v20, %v601_v59  ;;  %775 = vst.msk [vmem:[#allocation2 + $0x50] sm:$0xff] %vm116_vm0, %v711_v60  ;;  %910 = vst.msk [vmem:[#allocation3 + $0x50] sm:$0xff] %vm116_vm0, %v846_v61 }
  0xf1   :  { %807 = vst.msk [vmem:[#allocation2 + $0x150] sm:$0xff] %vm116_vm0, %v743_v62  ;;  %942 = vst.msk [vmem:[#allocation3 + $0x150] sm:$0xff] %vm116_vm0, %v878_v63  ;;  %v596_v7 = vadd.f32 %v3867_v18, %v595_v1  ;;  %v451_v14 = vadd.f32 %v3132_v8, %v3867_v18  ;;  %v611_v15 = vadd.f32 %v3180_v13, %v3867_v18  ;;  %v445_v23 = vpop.f32.mrf.mxu0  ;;  %v605_v24 = vpop.f32.mrf.mxu1 }
  0xf2   :  { %778 = vst.msk [vmem:[#allocation2 + $0x68] sm:$0xff] %vm116_vm0, %v714_v2  ;;  %913 = vst.msk [vmem:[#allocation3 + $0x68] sm:$0xff] %vm116_vm0, %v849_v3  ;;  %v713_v16 = vmul.f32 %v3869_v19, %v436_v6  ;;  %v848_v17 = vmul.f32 %v3871_v20, %v436_v6  ;;  %v446_v29 = vadd.f32 %v3867_v18, %v445_v23 }
  0xf3   :  { %810 = vst.msk [vmem:[#allocation2 + $0x168] sm:$0xff] %vm116_vm0, %v746_v4  ;;  %945 = vst.msk [vmem:[#allocation3 + $0x168] sm:$0xff] %vm116_vm0, %v881_v5  ;;  %v745_v21 = vmul.f32 %v3869_v19, %v596_v7  ;;  %v880_v22 = vmul.f32 %v3871_v20, %v596_v7  ;;  %v716_v25 = vmul.f32 %v3869_v19, %v451_v14  ;;  %v3135_v31 = vpop.f32.mrf.mxu0  ;;  %v3183_v32 = vpop.f32.mrf.mxu1 }
  0xf4   :  { %v851_v26 = vmul.f32 %v3871_v20, %v451_v14  ;;  %v748_v27 = vmul.f32 %v3869_v19, %v611_v15  ;;  %v883_v28 = vmul.f32 %v3871_v20, %v611_v15  ;;  %777 = vst.msk [vmem:[#allocation2 + $0x60] sm:$0xff] %vm116_vm0, %v713_v16  ;;  %912 = vst.msk [vmem:[#allocation3 + $0x60] sm:$0xff] %vm116_vm0, %v848_v17 }
  0xf5   :  { %809 = vst.msk [vmem:[#allocation2 + $0x160] sm:$0xff] %vm116_vm0, %v745_v21  ;;  %944 = vst.msk [vmem:[#allocation3 + $0x160] sm:$0xff] %vm116_vm0, %v880_v22  ;;  %v606_v30 = vadd.f32 %v3867_v18, %v605_v24  ;;  %v461_v33 = vadd.f32 %v3135_v31, %v3867_v18  ;;  %v621_v34 = vadd.f32 %v3183_v32, %v3867_v18  ;;  %v455_v39 = vpop.f32.mrf.mxu0  ;;  %v615_v40 = vpop.f32.mrf.mxu1 }
  0xf6   :  { %780 = vst.msk [vmem:[#allocation2 + $0x78] sm:$0xff] %vm116_vm0, %v716_v25  ;;  %915 = vst.msk [vmem:[#allocation3 + $0x78] sm:$0xff] %vm116_vm0, %v851_v26  ;;  %v715_v35 = vmul.f32 %v3869_v19, %v446_v29  ;;  %v850_v36 = vmul.f32 %v3871_v20, %v446_v29  ;;  %v456_v45 = vadd.f32 %v3867_v18, %v455_v39 }
  0xf7   :  { %812 = vst.msk [vmem:[#allocation2 + $0x178] sm:$0xff] %vm116_vm0, %v748_v27  ;;  %947 = vst.msk [vmem:[#allocation3 + $0x178] sm:$0xff] %vm116_vm0, %v883_v28  ;;  %v747_v37 = vmul.f32 %v3869_v19, %v606_v30  ;;  %v882_v38 = vmul.f32 %v3871_v20, %v606_v30  ;;  %v718_v41 = vmul.f32 %v3869_v19, %v461_v33  ;;  %v3138_v47 = vpop.f32.mrf.mxu0  ;;  %v3186_v48 = vpop.f32.mrf.mxu1 }
  0xf8   :  { %v853_v42 = vmul.f32 %v3871_v20, %v461_v33  ;;  %v750_v43 = vmul.f32 %v3869_v19, %v621_v34  ;;  %v885_v44 = vmul.f32 %v3871_v20, %v621_v34  ;;  %779 = vst.msk [vmem:[#allocation2 + $0x70] sm:$0xff] %vm116_vm0, %v715_v35  ;;  %914 = vst.msk [vmem:[#allocation3 + $0x70] sm:$0xff] %vm116_vm0, %v850_v36 }
  0xf9   :  { %811 = vst.msk [vmem:[#allocation2 + $0x170] sm:$0xff] %vm116_vm0, %v747_v37  ;;  %946 = vst.msk [vmem:[#allocation3 + $0x170] sm:$0xff] %vm116_vm0, %v882_v38  ;;  %v616_v46 = vadd.f32 %v3867_v18, %v615_v40  ;;  %v471_v49 = vadd.f32 %v3138_v47, %v3867_v18  ;;  %v631_v50 = vadd.f32 %v3186_v48, %v3867_v18  ;;  %v465_v55 = vpop.f32.mrf.mxu0  ;;  %v625_v56 = vpop.f32.mrf.mxu1 }
  0xfa   :  { %782 = vst.msk [vmem:[#allocation2 + $0x88] sm:$0xff] %vm116_vm0, %v718_v41  ;;  %917 = vst.msk [vmem:[#allocation3 + $0x88] sm:$0xff] %vm116_vm0, %v853_v42  ;;  %v717_v51 = vmul.f32 %v3869_v19, %v456_v45  ;;  %v852_v52 = vmul.f32 %v3871_v20, %v456_v45  ;;  %v466_v61 = vadd.f32 %v3867_v18, %v465_v55 }
  0xfb   :  { %814 = vst.msk [vmem:[#allocation2 + $0x188] sm:$0xff] %vm116_vm0, %v750_v43  ;;  %949 = vst.msk [vmem:[#allocation3 + $0x188] sm:$0xff] %vm116_vm0, %v885_v44  ;;  %v749_v53 = vmul.f32 %v3869_v19, %v616_v46  ;;  %v884_v54 = vmul.f32 %v3871_v20, %v616_v46  ;;  %v720_v57 = vmul.f32 %v3869_v19, %v471_v49  ;;  %v3141_v63 = vpop.f32.mrf.mxu0  ;;  %v3189_v0 = vpop.f32.mrf.mxu1 }
  0xfc   :  { %v855_v58 = vmul.f32 %v3871_v20, %v471_v49  ;;  %v752_v59 = vmul.f32 %v3869_v19, %v631_v50  ;;  %v887_v60 = vmul.f32 %v3871_v20, %v631_v50  ;;  %781 = vst.msk [vmem:[#allocation2 + $0x80] sm:$0xff] %vm116_vm0, %v717_v51  ;;  %916 = vst.msk [vmem:[#allocation3 + $0x80] sm:$0xff] %vm116_vm0, %v852_v52 }
  0xfd   :  { %813 = vst.msk [vmem:[#allocation2 + $0x180] sm:$0xff] %vm116_vm0, %v749_v53  ;;  %948 = vst.msk [vmem:[#allocation3 + $0x180] sm:$0xff] %vm116_vm0, %v884_v54  ;;  %v626_v62 = vadd.f32 %v3867_v18, %v625_v56  ;;  %v481_v1 = vadd.f32 %v3141_v63, %v3867_v18  ;;  %v641_v2 = vadd.f32 %v3189_v0, %v3867_v18  ;;  %v475_v7 = vpop.f32.mrf.mxu0  ;;  %v635_v8 = vpop.f32.mrf.mxu1 }
  0xfe   :  { %784 = vst.msk [vmem:[#allocation2 + $0x98] sm:$0xff] %vm116_vm0, %v720_v57  ;;  %919 = vst.msk [vmem:[#allocation3 + $0x98] sm:$0xff] %vm116_vm0, %v855_v58  ;;  %v719_v3 = vmul.f32 %v3869_v19, %v466_v61  ;;  %v854_v4 = vmul.f32 %v3871_v20, %v466_v61  ;;  %v476_v17 = vadd.f32 %v3867_v18, %v475_v7 }
  0xff   :  { %816 = vst.msk [vmem:[#allocation2 + $0x198] sm:$0xff] %vm116_vm0, %v752_v59  ;;  %951 = vst.msk [vmem:[#allocation3 + $0x198] sm:$0xff] %vm116_vm0, %v887_v60  ;;  %v751_v5 = vmul.f32 %v3869_v19, %v626_v62  ;;  %v886_v6 = vmul.f32 %v3871_v20, %v626_v62  ;;  %v722_v13 = vmul.f32 %v3869_v19, %v481_v1  ;;  %v3144_v22 = vpop.f32.mrf.mxu0  ;;  %v3192_v23 = vpop.f32.mrf.mxu1 }
 0x100   :  { %v857_v14 = vmul.f32 %v3871_v20, %v481_v1  ;;  %v754_v15 = vmul.f32 %v3869_v19, %v641_v2  ;;  %v889_v16 = vmul.f32 %v3871_v20, %v641_v2  ;;  %783 = vst.msk [vmem:[#allocation2 + $0x90] sm:$0xff] %vm116_vm0, %v719_v3  ;;  %918 = vst.msk [vmem:[#allocation3 + $0x90] sm:$0xff] %vm116_vm0, %v854_v4 }
 0x101   :  { %815 = vst.msk [vmem:[#allocation2 + $0x190] sm:$0xff] %vm116_vm0, %v751_v5  ;;  %950 = vst.msk [vmem:[#allocation3 + $0x190] sm:$0xff] %vm116_vm0, %v886_v6  ;;  %v636_v21 = vadd.f32 %v3867_v18, %v635_v8  ;;  %v491_v24 = vadd.f32 %v3144_v22, %v3867_v18  ;;  %v651_v25 = vadd.f32 %v3192_v23, %v3867_v18  ;;  %v485_v30 = vpop.f32.mrf.mxu0  ;;  %v645_v31 = vpop.f32.mrf.mxu1 }
 0x102   :  { %786 = vst.msk [vmem:[#allocation2 + $0xa8] sm:$0xff] %vm116_vm0, %v722_v13  ;;  %921 = vst.msk [vmem:[#allocation3 + $0xa8] sm:$0xff] %vm116_vm0, %v857_v14  ;;  %v721_v26 = vmul.f32 %v3869_v19, %v476_v17  ;;  %v856_v27 = vmul.f32 %v3871_v20, %v476_v17  ;;  %v486_v36 = vadd.f32 %v3867_v18, %v485_v30 }
 0x103   :  { %818 = vst.msk [vmem:[#allocation2 + $0x1a8] sm:$0xff] %vm116_vm0, %v754_v15  ;;  %953 = vst.msk [vmem:[#allocation3 + $0x1a8] sm:$0xff] %vm116_vm0, %v889_v16  ;;  %v753_v28 = vmul.f32 %v3869_v19, %v636_v21  ;;  %v888_v29 = vmul.f32 %v3871_v20, %v636_v21  ;;  %v724_v32 = vmul.f32 %v3869_v19, %v491_v24  ;;  %v3147_v38 = vpop.f32.mrf.mxu0  ;;  %v3195_v39 = vpop.f32.mrf.mxu1 }
 0x104   :  { %v859_v33 = vmul.f32 %v3871_v20, %v491_v24  ;;  %v756_v34 = vmul.f32 %v3869_v19, %v651_v25  ;;  %v891_v35 = vmul.f32 %v3871_v20, %v651_v25  ;;  %785 = vst.msk [vmem:[#allocation2 + $0xa0] sm:$0xff] %vm116_vm0, %v721_v26  ;;  %920 = vst.msk [vmem:[#allocation3 + $0xa0] sm:$0xff] %vm116_vm0, %v856_v27 }
 0x105   :  { %817 = vst.msk [vmem:[#allocation2 + $0x1a0] sm:$0xff] %vm116_vm0, %v753_v28  ;;  %952 = vst.msk [vmem:[#allocation3 + $0x1a0] sm:$0xff] %vm116_vm0, %v888_v29  ;;  %v646_v37 = vadd.f32 %v3867_v18, %v645_v31  ;;  %v501_v40 = vadd.f32 %v3147_v38, %v3867_v18  ;;  %v661_v41 = vadd.f32 %v3195_v39, %v3867_v18  ;;  %v495_v46 = vpop.f32.mrf.mxu0  ;;  %v655_v47 = vpop.f32.mrf.mxu1 }
 0x106   :  { %788 = vst.msk [vmem:[#allocation2 + $0xb8] sm:$0xff] %vm116_vm0, %v724_v32  ;;  %923 = vst.msk [vmem:[#allocation3 + $0xb8] sm:$0xff] %vm116_vm0, %v859_v33  ;;  %v723_v42 = vmul.f32 %v3869_v19, %v486_v36  ;;  %v858_v43 = vmul.f32 %v3871_v20, %v486_v36  ;;  %v496_v52 = vadd.f32 %v3867_v18, %v495_v46 }
 0x107   :  { %820 = vst.msk [vmem:[#allocation2 + $0x1b8] sm:$0xff] %vm116_vm0, %v756_v34  ;;  %955 = vst.msk [vmem:[#allocation3 + $0x1b8] sm:$0xff] %vm116_vm0, %v891_v35  ;;  %v755_v44 = vmul.f32 %v3869_v19, %v646_v37  ;;  %v890_v45 = vmul.f32 %v3871_v20, %v646_v37  ;;  %v726_v48 = vmul.f32 %v3869_v19, %v501_v40  ;;  %v3150_v54 = vpop.f32.mrf.mxu0  ;;  %v3198_v55 = vpop.f32.mrf.mxu1 }
 0x108   :  { %v861_v49 = vmul.f32 %v3871_v20, %v501_v40  ;;  %v758_v50 = vmul.f32 %v3869_v19, %v661_v41  ;;  %v893_v51 = vmul.f32 %v3871_v20, %v661_v41  ;;  %787 = vst.msk [vmem:[#allocation2 + $0xb0] sm:$0xff] %vm116_vm0, %v723_v42  ;;  %922 = vst.msk [vmem:[#allocation3 + $0xb0] sm:$0xff] %vm116_vm0, %v858_v43 }
 0x109   :  { %819 = vst.msk [vmem:[#allocation2 + $0x1b0] sm:$0xff] %vm116_vm0, %v755_v44  ;;  %954 = vst.msk [vmem:[#allocation3 + $0x1b0] sm:$0xff] %vm116_vm0, %v890_v45  ;;  %v656_v53 = vadd.f32 %v3867_v18, %v655_v47  ;;  %v511_v56 = vadd.f32 %v3150_v54, %v3867_v18  ;;  %v671_v57 = vadd.f32 %v3198_v55, %v3867_v18  ;;  %v505_v62 = vpop.f32.mrf.mxu0  ;;  %v665_v63 = vpop.f32.mrf.mxu1 }
 0x10a   :  { %790 = vst.msk [vmem:[#allocation2 + $0xc8] sm:$0xff] %vm116_vm0, %v726_v48  ;;  %925 = vst.msk [vmem:[#allocation3 + $0xc8] sm:$0xff] %vm116_vm0, %v861_v49  ;;  %v725_v58 = vmul.f32 %v3869_v19, %v496_v52  ;;  %v860_v59 = vmul.f32 %v3871_v20, %v496_v52  ;;  %v506_v4 = vadd.f32 %v3867_v18, %v505_v62  ;;  %v4195_v49 = vmov 0.0  }
 0x10b   :  { %822 = vst.msk [vmem:[#allocation2 + $0x1c8] sm:$0xff] %vm116_vm0, %v758_v50  ;;  %957 = vst.msk [vmem:[#allocation3 + $0x1c8] sm:$0xff] %vm116_vm0, %v893_v51  ;;  %v757_v60 = vmul.f32 %v3869_v19, %v656_v53  ;;  %v892_v61 = vmul.f32 %v3871_v20, %v656_v53  ;;  %v728_v0 = vmul.f32 %v3869_v19, %v511_v56  ;;  %v3153_v6 = vpop.f32.mrf.mxu0  ;;  %v3201_v7 = vpop.f32.mrf.mxu1 }
 0x10c   :  { %v863_v1 = vmul.f32 %v3871_v20, %v511_v56  ;;  %v760_v2 = vmul.f32 %v3869_v19, %v671_v57  ;;  %v895_v3 = vmul.f32 %v3871_v20, %v671_v57  ;;  %789 = vst.msk [vmem:[#allocation2 + $0xc0] sm:$0xff] %vm116_vm0, %v725_v58  ;;  %924 = vst.msk [vmem:[#allocation3 + $0xc0] sm:$0xff] %vm116_vm0, %v860_v59 }
 0x10d   :  { %821 = vst.msk [vmem:[#allocation2 + $0x1c0] sm:$0xff] %vm116_vm0, %v757_v60  ;;  %956 = vst.msk [vmem:[#allocation3 + $0x1c0] sm:$0xff] %vm116_vm0, %v892_v61  ;;  %v666_v5 = vadd.f32 %v3867_v18, %v665_v63  ;;  %v521_v8 = vadd.f32 %v3153_v6, %v3867_v18  ;;  %v681_v13 = vadd.f32 %v3201_v7, %v3867_v18  ;;  %v515_v21 = vpop.f32.mrf.mxu0  ;;  %v675_v22 = vpop.f32.mrf.mxu1 }
 0x10e   :  { %792 = vst.msk [vmem:[#allocation2 + $0xd8] sm:$0xff] %vm116_vm0, %v728_v0  ;;  %927 = vst.msk [vmem:[#allocation3 + $0xd8] sm:$0xff] %vm116_vm0, %v863_v1  ;;  %v727_v14 = vmul.f32 %v3869_v19, %v506_v4  ;;  %v862_v15 = vmul.f32 %v3871_v20, %v506_v4  ;;  %v516_v27 = vadd.f32 %v3867_v18, %v515_v21 }
 0x10f   :  { %824 = vst.msk [vmem:[#allocation2 + $0x1d8] sm:$0xff] %vm116_vm0, %v760_v2  ;;  %959 = vst.msk [vmem:[#allocation3 + $0x1d8] sm:$0xff] %vm116_vm0, %v895_v3  ;;  %v759_v16 = vmul.f32 %v3869_v19, %v666_v5  ;;  %v894_v17 = vmul.f32 %v3871_v20, %v666_v5  ;;  %v730_v23 = vmul.f32 %v3869_v19, %v521_v8  ;;  %v3156_v29 = vpop.f32.mrf.mxu0  ;;  %v3204_v30 = vpop.f32.mrf.mxu1 }
 0x110   :  { %v865_v24 = vmul.f32 %v3871_v20, %v521_v8  ;;  %v762_v25 = vmul.f32 %v3869_v19, %v681_v13  ;;  %v897_v26 = vmul.f32 %v3871_v20, %v681_v13  ;;  %791 = vst.msk [vmem:[#allocation2 + $0xd0] sm:$0xff] %vm116_vm0, %v727_v14  ;;  %926 = vst.msk [vmem:[#allocation3 + $0xd0] sm:$0xff] %vm116_vm0, %v862_v15 }
 0x111   :  { %823 = vst.msk [vmem:[#allocation2 + $0x1d0] sm:$0xff] %vm116_vm0, %v759_v16  ;;  %958 = vst.msk [vmem:[#allocation3 + $0x1d0] sm:$0xff] %vm116_vm0, %v894_v17  ;;  %v676_v28 = vadd.f32 %v3867_v18, %v675_v22  ;;  %v531_v31 = vadd.f32 %v3156_v29, %v3867_v18  ;;  %v691_v32 = vadd.f32 %v3204_v30, %v3867_v18  ;;  %v525_v37 = vpop.f32.mrf.mxu0  ;;  %v685_v38 = vpop.f32.mrf.mxu1 }
 0x112   :  { %794 = vst.msk [vmem:[#allocation2 + $0xe8] sm:$0xff] %vm116_vm0, %v730_v23  ;;  %929 = vst.msk [vmem:[#allocation3 + $0xe8] sm:$0xff] %vm116_vm0, %v865_v24  ;;  %v729_v33 = vmul.f32 %v3869_v19, %v516_v27  ;;  %v864_v34 = vmul.f32 %v3871_v20, %v516_v27  ;;  %v526_v43 = vadd.f32 %v3867_v18, %v525_v37 }
 0x113   :  { %826 = vst.msk [vmem:[#allocation2 + $0x1e8] sm:$0xff] %vm116_vm0, %v762_v25  ;;  %961 = vst.msk [vmem:[#allocation3 + $0x1e8] sm:$0xff] %vm116_vm0, %v897_v26  ;;  %v761_v35 = vmul.f32 %v3869_v19, %v676_v28  ;;  %v896_v36 = vmul.f32 %v3871_v20, %v676_v28  ;;  %v732_v39 = vmul.f32 %v3869_v19, %v531_v31 }
 0x114   :  { %v867_v40 = vmul.f32 %v3871_v20, %v531_v31  ;;  %v764_v41 = vmul.f32 %v3869_v19, %v691_v32  ;;  %v899_v42 = vmul.f32 %v3871_v20, %v691_v32  ;;  %793 = vst.msk [vmem:[#allocation2 + $0xe0] sm:$0xff] %vm116_vm0, %v729_v33  ;;  %928 = vst.msk [vmem:[#allocation3 + $0xe0] sm:$0xff] %vm116_vm0, %v864_v34 }
 0x115   :  { %825 = vst.msk [vmem:[#allocation2 + $0x1e0] sm:$0xff] %vm116_vm0, %v761_v35  ;;  %960 = vst.msk [vmem:[#allocation3 + $0x1e0] sm:$0xff] %vm116_vm0, %v896_v36  ;;  %v686_v44 = vadd.f32 %v3867_v18, %v685_v38  ;;  %v731_v45 = vmul.f32 %v3869_v19, %v526_v43  ;;  %v866_v46 = vmul.f32 %v3871_v20, %v526_v43  ;;  %v4193_v18 = vmov 0.0  }
 0x116   :  { %796 = vst.msk [vmem:[#allocation2 + $0xf8] sm:$0xff] %vm116_vm0, %v732_v39  ;;  %931 = vst.msk [vmem:[#allocation3 + $0xf8] sm:$0xff] %vm116_vm0, %v867_v40 }
 0x117   :  { %828 = vst.msk [vmem:[#allocation2 + $0x1f8] sm:$0xff] %vm116_vm0, %v764_v41  ;;  %963 = vst.msk [vmem:[#allocation3 + $0x1f8] sm:$0xff] %vm116_vm0, %v899_v42  ;;  %v763_v47 = vmul.f32 %v3869_v19, %v686_v44  ;;  %v898_v48 = vmul.f32 %v3871_v20, %v686_v44 }
 0x118   :  { %795 = vst.msk [vmem:[#allocation2 + $0xf0] sm:$0xff] %vm116_vm0, %v731_v45  ;;  %930 = vst.msk [vmem:[#allocation3 + $0xf0] sm:$0xff] %vm116_vm0, %v866_v46 }
 0x119   :  { %827 = vst.msk [vmem:[#allocation2 + $0x1f0] sm:$0xff] %vm116_vm0, %v763_v47  ;;  %962 = vst.msk [vmem:[#allocation3 + $0x1f0] sm:$0xff] %vm116_vm0, %v898_v48 }
 0x11a LB: > { %v3497_v19 = vmov 0.0   ;;  %vm3498_vm1 = vmmov 0   ;;  %s3499_s3 = smov 80   ;;  %vm988_vm2 = vcmask 130048   ;;  %s2738_s5 = sshll.u32 %s3495_s2, 1  ;;  %vm1100_vm3 = vcmask 123904   ;;  %s3495_s2 = sphi %s4197_s2, %s973_s2   ;;  %v3491_v49 = vphi %v4195_v49, %v1206_v49   ;;  %v3487_v18 = vphi %v4193_v18, %v1200_v18  }
 0x11b   : > { %3205 = vmatprep.subr.mxu0 %v3497_v19  ;;  %3209 = vmatprep.mubr.msk.f32.mxu0 %vm3498_vm1, %v3497_v19  ;;  %s4213_s6 = ssub.s32 255, %s2738_s5  ;;  %s2739_s1 = sshll.u32 %s3495_s2, 2 }
 0x11c   : > { %986 = vrot.lane.b32.xlu0 %v3491_v49, %s3499_s3  ;;  %3206 = vmatpush3.msra.mxu0 %v3849_v10  ;;  %s2740_s16 = sshll.u32 %s4213_s6, 1  ;;  %s4219_s17 = scalar_lea.vmem [#allocation2], %s2739_s1 }
 0x11d   : > { %3207 = vmatprep.subr.mxu0 %v3497_v19  ;;  %3212 = vmatprep.subr.mxu1 %v3497_v19  ;;  %s982_s18 = scalar_lea.vmem [#allocation3], %s2740_s16  ;;  %s3500_s19 = smov 96  }
 0x11e   : > { %3208 = vmatpush3.msra.mxu0 %v3844_v9  ;;  %3213 = vmatpush3.msra.mxu1 %v3849_v10  ;;  %s3501_s20 = smov 16   ;;  %s3502_s9 = smov 32  }
 0x11f   : > { %3214 = vmatprep.subr.mxu1 %v3497_v19  ;;  %3216 = vmatprep.mubr.msk.f32.mxu1 %vm3498_vm1, %v3497_v19  ;;  %s4233_s21 = scalar_lea.vmem [#allocation4], %s2739_s1  ;;  %s1102_s22 = scalar_lea.vmem [#allocation5], %s2740_s16 }
 0x120   : > { %3215 = vmatpush3.msra.mxu1 %v3844_v9  ;;  %v980_v50 = vld [vmem:[%s4219_s17] sm:$0x3]  ;;  %s4243_s23 = ssub.s32 254, %s2738_s5  ;;  %v2746_v5 = vld [vmem:[%s4219_s17 + $0x2] sm:$0x3]  ;;  %s973_s2 = sadd.s32 1, %s3495_s2  }
 0x121   : > { %v983_v51 = vld [vmem:[%s982_s18] sm:$0x3]  ;;  %s2747_s24 = sshll.u32 %s4243_s23, 1  ;;  %p970_p0 = scmp.ge.s32.totalorder %s973_s2, 128  }
 0x122   : > { %v984_v52 = vadd.f32 %v983_v51, %v980_v50  ;;  %s1110_s25 = scalar_lea.vmem [#allocation3], %s2747_s24  ;;  %s1213_s26 = scalar_lea.vmem [#allocation5], %s2747_s24  ;;  %v1346_v29 = vld [vmem:[%s4728_s8 + $0x8] sm:$0xff] (%p970_p0)  ;;  %v1345_v31 = vld [vmem:[%s4728_s8] sm:$0xff] (%p970_p0)  ;;  %vm2573_vm4 = vcmask (%p970_p0), 7168  }
 0x123   : > { %v1111_v6 = vld [vmem:[%s1110_s25] sm:$0x3]  ;;  %v1280_v30 = vld [vmem:[%s4727_s7 + $0x8] sm:$0xff] (%p970_p0)  ;;  %3219 = vmatprep.subr.mxu0 (%p970_p0), %v1346_v29 }
 0x124   : > { %v1112_v7 = vadd.f32 %v2746_v5, %v1111_v6  ;;  %3319 = vmatprep.subr.mxu1 (%p970_p0), %v1280_v30  ;;  %v1279_v32 = vld [vmem:[%s4727_s7] sm:$0xff] (%p970_p0) }
 0x18e   : > { %v987_v20 = vpop.permute.xlu0 %986 }
 0x18f   : > { %3210 = vmatmul.mubr.msk.f32.vlgmr.msra.gmra.mxu0 %vm988_vm2, %v987_v20 }
 0x190   :  { %3220 = vmatpush3.msra.mxu0 (%p970_p0), %v1346_v29 }
 0x191   :  { %3221 = vmatprep.subr.mxu0 (%p970_p0), %v1345_v31 }
 0x192   :  { %3222 = vmatpush3.msra.mxu0 (%p970_p0), %v1345_v31 }
 0x24f   : > { %v1057_v53 = vpop.f32.mrf.mxu0 }
 0x250   : > { %v1061_v54 = vadd.f32 %v1057_v53, %v984_v52 }
 0x251   : > { %v3211_v55 = vpop.f32.mrf.mxu0 }
 0x252   : > { %v1068_v56 = vmul.f32 %v3854_v11, %v1061_v54 }
 0x254   : > { %3465 = vtanh.f32 %v1068_v56 }
 0x261   : > { %v3466_v57 = vpop.eup %3465 }
 0x262   : > { %v1070_v58 = vmul.f32 %v3466_v57, %v3854_v11 }
 0x264   : > { %v1077_v59 = vadd.f32 %v3859_v12, %v1070_v58 }
 0x266   : > { %1080 = vrot.lane.b32.xlu0 %v1077_v59, %s3500_s19  ;;  %v1078_v62 = vmul.f32 %v3487_v18, %v1077_v59 }
 0x2d8   : > { %v1081_v60 = vpop.permute.xlu0 %1080 }
 0x2d9   : > { %v1083_v61 = vmul.f32 %v1081_v60, %v1077_v59 }
 0x2db   : > { %1085 = vrot.lane.b32.xlu1 %v1083_v61, %s3501_s20 }
 0x34d   : > { %v1086_v63 = vpop.permute.xlu1 %1085 }
 0x34e   : > { %v1088_v0 = vadd.f32 %v1086_v63, %v1078_v62 }
 0x350   : > { %3467 = vtanh.f32 %v1088_v0 }
 0x35d   : > { %v3468_v1 = vpop.eup %3467 }
 0x35e   : > { %1091 = vrot.lane.b32.xlu1 %v3468_v1, %s3502_s9 }
 0x3d0   : > { %v1092_v2 = vpop.permute.xlu1 %1091 }
 0x3d1   : > { %v1094_v3 = vmul.f32 %v1092_v2, %v1077_v59 }
 0x3d3   : > { %1096 = vrot.lane.b32.xlu0 %v1094_v3, %s3499_s3 }
 0x445   : > { %v1097_v4 = vpop.permute.xlu0 %1096 }
 0x446   : > { %1101 = vst.msk [vmem:[%s4233_s21] sm:$0x3] %vm1100_vm3, %v1097_v4  ;;  %1103 = vst.msk [vmem:[%s1102_s22] sm:$0x3] %vm1100_vm3, %v1097_v4  ;;  %3217 = vmatmul.mubr.msk.f32.vlgmr.msra.gmra.mxu1 %vm988_vm2, %v1097_v4 }
 0x447   :  { %3320 = vmatpush3.msra.mxu1 (%p970_p0), %v1280_v30 }
 0x448   :  { %3321 = vmatprep.subr.mxu1 (%p970_p0), %v1279_v32 }
 0x449   :  { %3322 = vmatpush3.msra.mxu1 (%p970_p0), %v1279_v32 }
 0x506   : > { %v1181_v8 = vpop.f32.mrf.mxu1 }
 0x507   : > { %v1185_v13 = vadd.f32 %v1181_v8, %v1112_v7 }
 0x508   : > { %v3218_v14 = vpop.f32.mrf.mxu1 }
 0x509   : > { %v1186_v15 = vmul.f32 %v3854_v11, %v1185_v13 }
 0x50b   : > { %3469 = vtanh.f32 %v1186_v15 }
 0x518   : > { %v3470_v16 = vpop.eup %3469 }
 0x519   : > { %v1188_v17 = vmul.f32 %v3470_v16, %v3854_v11 }
 0x51b   : > { %v1189_v21 = vadd.f32 %v3859_v12, %v1188_v17 }
 0x51d   : > { %1192 = vrot.lane.b32.xlu1 %v1189_v21, %s3500_s19  ;;  %v1190_v24 = vmul.f32 %v1189_v21, %v1088_v0 }
 0x58f   : > { %v1193_v22 = vpop.permute.xlu1 %1192 }
 0x590   : > { %v1195_v23 = vmul.f32 %v1193_v22, %v1189_v21 }
 0x592   : > { %1197 = vrot.lane.b32.xlu0 %v1195_v23, %s3501_s20 }
 0x604   : > { %v1198_v25 = vpop.permute.xlu0 %1197 }
 0x605   : > { %v1200_v18 = vadd.f32 %v1198_v25, %v1190_v24  }
 0x607   : > { %3471 = vtanh.f32 %v1200_v18 }
 0x614   : > { %v3472_v26 = vpop.eup %3471 }
 0x615   : > { %1203 = vrot.lane.b32.xlu1 %v3472_v26, %s3502_s9 }
 0x687   : > { %v1204_v27 = vpop.permute.xlu1 %1203 }
 0x688   : > { %v1206_v49 = vmul.f32 %v1204_v27, %v1189_v21  }
 0x68a   : > { %1208 = vrot.lane.b32.xlu0 %v1206_v49, %s3499_s3 }
 0x6f9   :  { %972 = sbr.rel (!%p970_p0) target bundleno = 282 (0x11a), region = 75 }
 0x6fc   : > { %v1209_v28 = vpop.permute.xlu0 %1208 }
 0x6fd   : > { %2751 = vst.msk [vmem:[%s4233_s21 + $0x2] sm:$0x3] %vm1100_vm3, %v1209_v28  ;;  %1214 = vst.msk [vmem:[%s1213_s26] sm:$0x3] %vm1100_vm3, %v1209_v28 }
 0x704   :  { %v1281_v33 = vld [vmem:[#allocation5] sm:$0xff]  ;;  %v1282_v10 = vld [vmem:[#allocation5 + $0x8] sm:$0xff]  ;;  %v1283_v12 = vld [vmem:[#allocation5 + $0x10] sm:$0xff] }
 0x705   :  { %v1215_v9 = vld [vmem:[#allocation4] sm:$0xff]  ;;  %v1216_v11 = vld [vmem:[#allocation4 + $0x8] sm:$0xff]  ;;  %3223 = vmatprep.mubr.msk.f32.mxu0 %vm988_vm2, %v1281_v33  ;;  %v1217_v34 = vld [vmem:[#allocation4 + $0x10] sm:$0xff] }
 0x706   :  { %3323 = vmatprep.mubr.msk.f32.mxu1 %vm988_vm2, %v1215_v9  ;;  %3224 = vmatmul.mubr.msk.f32.vlgmr.msra.gmra.mxu0 %vm988_vm2, %v1282_v10  ;;  %v1284_v35 = vld [vmem:[#allocation5 + $0x18] sm:$0xff]  ;;  %v1285_v37 = vld [vmem:[#allocation5 + $0x20] sm:$0xff]  ;;  %v1286_v39 = vld [vmem:[#allocation5 + $0x28] sm:$0xff] }
 0x707   :  { %3324 = vmatmul.mubr.msk.f32.vlgmr.msra.gmra.mxu1 %vm988_vm2, %v1216_v11  ;;  %3226 = vmatprep.mubr.msk.f32.mxu0 %vm988_vm2, %v1283_v12  ;;  %v1218_v36 = vld [vmem:[#allocation4 + $0x18] sm:$0xff]  ;;  %v1219_v38 = vld [vmem:[#allocation4 + $0x20] sm:$0xff]  ;;  %v1220_v40 = vld [vmem:[#allocation4 + $0x28] sm:$0xff] }
 0x708   :  { %3326 = vmatprep.mubr.msk.f32.mxu1 %vm988_vm2, %v1217_v34  ;;  %v1287_v41 = vld [vmem:[#allocation5 + $0x30] sm:$0xff]  ;;  %v1288_v43 = vld [vmem:[#allocation5 + $0x38] sm:$0xff]  ;;  %v1289_v45 = vld [vmem:[#allocation5 + $0x40] sm:$0xff] }
 0x709   :  { %v1221_v42 = vld [vmem:[#allocation4 + $0x30] sm:$0xff]  ;;  %v1222_v44 = vld [vmem:[#allocation4 + $0x38] sm:$0xff]  ;;  %v1223_v46 = vld [vmem:[#allocation4 + $0x40] sm:$0xff] }
 0x70a   :  { %3227 = vmatmul.mubr.msk.f32.gmra.mxu0 %vm988_vm2, %v1284_v35  ;;  %v1290_v47 = vld [vmem:[#allocation5 + $0x48] sm:$0xff]  ;;  %v1291_v18 = vld [vmem:[#allocation5 + $0x50] sm:$0xff]  ;;  %v1292_v19 = vld [vmem:[#allocation5 + $0x58] sm:$0xff] }
 0x70b   :  { %3327 = vmatmul.mubr.msk.f32.gmra.mxu1 %vm988_vm2, %v1218_v36  ;;  %3229 = vmatprep.mubr.msk.f32.mxu0 %vm988_vm2, %v1285_v37  ;;  %v1224_v48 = vld [vmem:[#allocation4 + $0x48] sm:$0xff]  ;;  %v1225_v49 = vld [vmem:[#allocation4 + $0x50] sm:$0xff]  ;;  %v1226_v20 = vld [vmem:[#allocation4 + $0x58] sm:$0xff] }
 0x70c   :  { %3329 = vmatprep.mubr.msk.f32.mxu1 %vm988_vm2, %v1219_v38  ;;  %v1293_v50 = vld [vmem:[#allocation5 + $0x60] sm:$0xff]  ;;  %v1294_v52 = vld [vmem:[#allocation5 + $0x68] sm:$0xff]  ;;  %v1295_v54 = vld [vmem:[#allocation5 + $0x70] sm:$0xff] }
 0x70d   :  { %v1227_v51 = vld [vmem:[#allocation4 + $0x60] sm:$0xff]  ;;  %v1228_v53 = vld [vmem:[#allocation4 + $0x68] sm:$0xff]  ;;  %v1229_v55 = vld [vmem:[#allocation4 + $0x70] sm:$0xff] }
 0x70e   :  { %3230 = vmatmul.mubr.msk.f32.gmra.mxu0 %vm988_vm2, %v1286_v39  ;;  %v1296_v56 = vld [vmem:[#allocation5 + $0x78] sm:$0xff]  ;;  %v1297_v58 = vld [vmem:[#allocation5 + $0x80] sm:$0xff]  ;;  %v1298_v60 = vld [vmem:[#allocation5 + $0x88] sm:$0xff] }
 0x70f   :  { %3330 = vmatmul.mubr.msk.f32.gmra.mxu1 %vm988_vm2, %v1220_v40  ;;  %3232 = vmatprep.mubr.msk.f32.mxu0 %vm988_vm2, %v1287_v41  ;;  %v1230_v57 = vld [vmem:[#allocation4 + $0x78] sm:$0xff]  ;;  %v1231_v59 = vld [vmem:[#allocation4 + $0x80] sm:$0xff]  ;;  %v1232_v61 = vld [vmem:[#allocation4 + $0x88] sm:$0xff] }
 0x710   :  { %3332 = vmatprep.mubr.msk.f32.mxu1 %vm988_vm2, %v1221_v42  ;;  %v1299_v62 = vld [vmem:[#allocation5 + $0x90] sm:$0xff]  ;;  %v1300_v0 = vld [vmem:[#allocation5 + $0x98] sm:$0xff]  ;;  %v1301_v2 = vld [vmem:[#allocation5 + $0xa0] sm:$0xff] }
 0x711   :  { %v1233_v63 = vld [vmem:[#allocation4 + $0x90] sm:$0xff]  ;;  %v1234_v1 = vld [vmem:[#allocation4 + $0x98] sm:$0xff]  ;;  %v1235_v3 = vld [vmem:[#allocation4 + $0xa0] sm:$0xff] }
 0x712   :  { %3233 = vmatmul.mubr.msk.f32.gmra.mxu0 %vm988_vm2, %v1288_v43  ;;  %v1302_v4 = vld [vmem:[#allocation5 + $0xa8] sm:$0xff]  ;;  %v1303_v6 = vld [vmem:[#allocation5 + $0xb0] sm:$0xff]  ;;  %v1304_v8 = vld [vmem:[#allocation5 + $0xb8] sm:$0xff] }
 0x713   :  { %3333 = vmatmul.mubr.msk.f32.gmra.mxu1 %vm988_vm2, %v1222_v44  ;;  %3235 = vmatprep.mubr.msk.f32.mxu0 %vm988_vm2, %v1289_v45  ;;  %v1236_v5 = vld [vmem:[#allocation4 + $0xa8] sm:$0xff]  ;;  %v1237_v7 = vld [vmem:[#allocation4 + $0xb0] sm:$0xff]  ;;  %v1238_v13 = vld [vmem:[#allocation4 + $0xb8] sm:$0xff] }
 0x714   :  { %3335 = vmatprep.mubr.msk.f32.mxu1 %vm988_vm2, %v1223_v46  ;;  %v1305_v14 = vld [vmem:[#allocation5 + $0xc0] sm:$0xff]  ;;  %v1306_v16 = vld [vmem:[#allocation5 + $0xc8] sm:$0xff]  ;;  %v1307_v21 = vld [vmem:[#allocation5 + $0xd0] sm:$0xff] }
 0x715   :  { %v1239_v15 = vld [vmem:[#allocation4 + $0xc0] sm:$0xff]  ;;  %v1240_v17 = vld [vmem:[#allocation4 + $0xc8] sm:$0xff]  ;;  %v1241_v22 = vld [vmem:[#allocation4 + $0xd0] sm:$0xff] }
 0x716   :  { %3236 = vmatmul.mubr.msk.f32.gmra.mxu0 %vm988_vm2, %v1290_v47  ;;  %v1308_v23 = vld [vmem:[#allocation5 + $0xd8] sm:$0xff]  ;;  %v1309_v25 = vld [vmem:[#allocation5 + $0xe0] sm:$0xff]  ;;  %v1310_v27 = vld [vmem:[#allocation5 + $0xe8] sm:$0xff] }
 0x717   :  { %3336 = vmatmul.mubr.msk.f32.gmra.mxu1 %vm988_vm2, %v1224_v48  ;;  %3238 = vmatprep.mubr.msk.f32.mxu0 %vm988_vm2, %v1291_v18  ;;  %v1242_v24 = vld [vmem:[#allocation4 + $0xd8] sm:$0xff]  ;;  %v1243_v26 = vld [vmem:[#allocation4 + $0xe0] sm:$0xff]  ;;  %v1244_v28 = vld [vmem:[#allocation4 + $0xe8] sm:$0xff] }
 0x718   :  { %3338 = vmatprep.mubr.msk.f32.mxu1 %vm988_vm2, %v1225_v49  ;;  %v1311_v29 = vld [vmem:[#allocation5 + $0xf0] sm:$0xff]  ;;  %v1312_v31 = vld [vmem:[#allocation5 + $0xf8] sm:$0xff]  ;;  %v1313_v33 = vld [vmem:[#allocation5 + $0x100] sm:$0xff] }
 0x719   :  { %v1245_v30 = vld [vmem:[#allocation4 + $0xf0] sm:$0xff]  ;;  %v1246_v32 = vld [vmem:[#allocation4 + $0xf8] sm:$0xff]  ;;  %v1247_v9 = vld [vmem:[#allocation4 + $0x100] sm:$0xff] }
 0x71a   :  { %3239 = vmatmul.mubr.msk.f32.gmra.mxu0 %vm988_vm2, %v1292_v19  ;;  %v1314_v10 = vld [vmem:[#allocation5 + $0x108] sm:$0xff]  ;;  %v1315_v12 = vld [vmem:[#allocation5 + $0x110] sm:$0xff]  ;;  %v1316_v35 = vld [vmem:[#allocation5 + $0x118] sm:$0xff] }
 0x71b   :  { %3339 = vmatmul.mubr.msk.f32.gmra.mxu1 %vm988_vm2, %v1226_v20  ;;  %3241 = vmatprep.mubr.msk.f32.mxu0 %vm988_vm2, %v1293_v50  ;;  %v1248_v11 = vld [vmem:[#allocation4 + $0x108] sm:$0xff]  ;;  %v1249_v34 = vld [vmem:[#allocation4 + $0x110] sm:$0xff]  ;;  %v1250_v36 = vld [vmem:[#allocation4 + $0x118] sm:$0xff] }
 0x71c   :  { %3341 = vmatprep.mubr.msk.f32.mxu1 %vm988_vm2, %v1227_v51  ;;  %v1317_v37 = vld [vmem:[#allocation5 + $0x120] sm:$0xff]  ;;  %v1318_v39 = vld [vmem:[#allocation5 + $0x128] sm:$0xff]  ;;  %v1319_v41 = vld [vmem:[#allocation5 + $0x130] sm:$0xff] }
 0x71d   :  { %v1251_v38 = vld [vmem:[#allocation4 + $0x120] sm:$0xff]  ;;  %v1252_v40 = vld [vmem:[#allocation4 + $0x128] sm:$0xff]  ;;  %v1253_v42 = vld [vmem:[#allocation4 + $0x130] sm:$0xff] }
 0x71e   :  { %3242 = vmatmul.mubr.msk.f32.gmra.mxu0 %vm988_vm2, %v1294_v52  ;;  %v1320_v43 = vld [vmem:[#allocation5 + $0x138] sm:$0xff]  ;;  %v1321_v45 = vld [vmem:[#allocation5 + $0x140] sm:$0xff]  ;;  %v1322_v47 = vld [vmem:[#allocation5 + $0x148] sm:$0xff] }
 0x71f   :  { %3342 = vmatmul.mubr.msk.f32.gmra.mxu1 %vm988_vm2, %v1228_v53  ;;  %3244 = vmatprep.mubr.msk.f32.mxu0 %vm988_vm2, %v1295_v54  ;;  %v1254_v44 = vld [vmem:[#allocation4 + $0x138] sm:$0xff]  ;;  %v1255_v46 = vld [vmem:[#allocation4 + $0x140] sm:$0xff]  ;;  %v1256_v48 = vld [vmem:[#allocation4 + $0x148] sm:$0xff] }
 0x720   :  { %3344 = vmatprep.mubr.msk.f32.mxu1 %vm988_vm2, %v1229_v55  ;;  %v1323_v18 = vld [vmem:[#allocation5 + $0x150] sm:$0xff]  ;;  %v1324_v19 = vld [vmem:[#allocation5 + $0x158] sm:$0xff]  ;;  %v1325_v50 = vld [vmem:[#allocation5 + $0x160] sm:$0xff] }
 0x721   :  { %v1257_v49 = vld [vmem:[#allocation4 + $0x150] sm:$0xff]  ;;  %v1258_v20 = vld [vmem:[#allocation4 + $0x158] sm:$0xff]  ;;  %v1259_v51 = vld [vmem:[#allocation4 + $0x160] sm:$0xff] }
 0x722   :  { %3245 = vmatmul.mubr.msk.f32.gmra.mxu0 %vm988_vm2, %v1296_v56  ;;  %v1326_v52 = vld [vmem:[#allocation5 + $0x168] sm:$0xff]  ;;  %v1327_v54 = vld [vmem:[#allocation5 + $0x170] sm:$0xff]  ;;  %v1328_v56 = vld [vmem:[#allocation5 + $0x178] sm:$0xff] }
 0x723   :  { %3345 = vmatmul.mubr.msk.f32.gmra.mxu1 %vm988_vm2, %v1230_v57  ;;  %3247 = vmatprep.mubr.msk.f32.mxu0 %vm988_vm2, %v1297_v58  ;;  %v1260_v53 = vld [vmem:[#allocation4 + $0x168] sm:$0xff]  ;;  %v1261_v55 = vld [vmem:[#allocation4 + $0x170] sm:$0xff]  ;;  %v1262_v57 = vld [vmem:[#allocation4 + $0x178] sm:$0xff] }
 0x724   :  { %3347 = vmatprep.mubr.msk.f32.mxu1 %vm988_vm2, %v1231_v59  ;;  %v1329_v58 = vld [vmem:[#allocation5 + $0x180] sm:$0xff] }
 0x725   :  { %v1263_v59 = vld [vmem:[#allocation4 + $0x180] sm:$0xff] }
 0x726   :  { %3248 = vmatmul.mubr.msk.f32.gmra.mxu0 %vm988_vm2, %v1298_v60  ;;  %v1330_v60 = vld [vmem:[#allocation5 + $0x188] sm:$0xff] }
 0x727   :  { %3348 = vmatmul.mubr.msk.f32.gmra.mxu1 %vm988_vm2, %v1232_v61  ;;  %3250 = vmatprep.mubr.msk.f32.mxu0 %vm988_vm2, %v1299_v62  ;;  %v1264_v61 = vld [vmem:[#allocation4 + $0x188] sm:$0xff]  ;;  %v1331_v62 = vld [vmem:[#allocation5 + $0x190] sm:$0xff] }
 0x728   :  { %3350 = vmatprep.mubr.msk.f32.mxu1 %vm988_vm2, %v1233_v63  ;;  %v1265_v63 = vld [vmem:[#allocation4 + $0x190] sm:$0xff] }
 0x72a   :  { %3251 = vmatmul.mubr.msk.f32.gmra.mxu0 %vm988_vm2, %v1300_v0  ;;  %v1332_v0 = vld [vmem:[#allocation5 + $0x198] sm:$0xff] }
 0x72b   :  { %3351 = vmatmul.mubr.msk.f32.gmra.mxu1 %vm988_vm2, %v1234_v1  ;;  %3253 = vmatprep.mubr.msk.f32.mxu0 %vm988_vm2, %v1301_v2  ;;  %v1266_v1 = vld [vmem:[#allocation4 + $0x198] sm:$0xff]  ;;  %v1333_v2 = vld [vmem:[#allocation5 + $0x1a0] sm:$0xff] }
 0x72c   :  { %3353 = vmatprep.mubr.msk.f32.mxu1 %vm988_vm2, %v1235_v3  ;;  %v1267_v3 = vld [vmem:[#allocation4 + $0x1a0] sm:$0xff] }
 0x72e   :  { %3254 = vmatmul.mubr.msk.f32.gmra.mxu0 %vm988_vm2, %v1302_v4  ;;  %v1334_v4 = vld [vmem:[#allocation5 + $0x1a8] sm:$0xff] }
 0x72f   :  { %3354 = vmatmul.mubr.msk.f32.gmra.mxu1 %vm988_vm2, %v1236_v5  ;;  %3256 = vmatprep.mubr.msk.f32.mxu0 %vm988_vm2, %v1303_v6  ;;  %v1268_v5 = vld [vmem:[#allocation4 + $0x1a8] sm:$0xff]  ;;  %v1335_v6 = vld [vmem:[#allocation5 + $0x1b0] sm:$0xff] }
 0x730   :  { %3356 = vmatprep.mubr.msk.f32.mxu1 %vm988_vm2, %v1237_v7  ;;  %v1269_v7 = vld [vmem:[#allocation4 + $0x1b0] sm:$0xff] }
 0x732   :  { %3257 = vmatmul.mubr.msk.f32.gmra.mxu0 %vm988_vm2, %v1304_v8  ;;  %v1336_v8 = vld [vmem:[#allocation5 + $0x1b8] sm:$0xff] }
 0x733   :  { %3357 = vmatmul.mubr.msk.f32.gmra.mxu1 %vm988_vm2, %v1238_v13  ;;  %3259 = vmatprep.mubr.msk.f32.mxu0 %vm988_vm2, %v1305_v14  ;;  %v1270_v13 = vld [vmem:[#allocation4 + $0x1b8] sm:$0xff]  ;;  %v1337_v14 = vld [vmem:[#allocation5 + $0x1c0] sm:$0xff] }
 0x734   :  { %3359 = vmatprep.mubr.msk.f32.mxu1 %vm988_vm2, %v1239_v15  ;;  %v1271_v15 = vld [vmem:[#allocation4 + $0x1c0] sm:$0xff] }
 0x736   :  { %3260 = vmatmul.mubr.msk.f32.gmra.mxu0 %vm988_vm2, %v1306_v16  ;;  %v1338_v16 = vld [vmem:[#allocation5 + $0x1c8] sm:$0xff] }
 0x737   :  { %3360 = vmatmul.mubr.msk.f32.gmra.mxu1 %vm988_vm2, %v1240_v17  ;;  %3262 = vmatprep.mubr.msk.f32.mxu0 %vm988_vm2, %v1307_v21  ;;  %v1272_v17 = vld [vmem:[#allocation4 + $0x1c8] sm:$0xff]  ;;  %v1339_v21 = vld [vmem:[#allocation5 + $0x1d0] sm:$0xff] }
 0x738   :  { %3362 = vmatprep.mubr.msk.f32.mxu1 %vm988_vm2, %v1241_v22  ;;  %v1273_v22 = vld [vmem:[#allocation4 + $0x1d0] sm:$0xff] }
 0x73a   :  { %3263 = vmatmul.mubr.msk.f32.gmra.mxu0 %vm988_vm2, %v1308_v23  ;;  %v1340_v23 = vld [vmem:[#allocation5 + $0x1d8] sm:$0xff] }
 0x73b   :  { %3363 = vmatmul.mubr.msk.f32.gmra.mxu1 %vm988_vm2, %v1242_v24  ;;  %3265 = vmatprep.mubr.msk.f32.mxu0 %vm988_vm2, %v1309_v25  ;;  %v1274_v24 = vld [vmem:[#allocation4 + $0x1d8] sm:$0xff]  ;;  %v1341_v25 = vld [vmem:[#allocation5 + $0x1e0] sm:$0xff] }
 0x73c   :  { %3365 = vmatprep.mubr.msk.f32.mxu1 %vm988_vm2, %v1243_v26  ;;  %v1275_v26 = vld [vmem:[#allocation4 + $0x1e0] sm:$0xff] }
 0x73e   :  { %3266 = vmatmul.mubr.msk.f32.gmra.mxu0 %vm988_vm2, %v1310_v27  ;;  %v1342_v27 = vld [vmem:[#allocation5 + $0x1e8] sm:$0xff] }
 0x73f   :  { %3366 = vmatmul.mubr.msk.f32.gmra.mxu1 %vm988_vm2, %v1244_v28  ;;  %3268 = vmatprep.mubr.msk.f32.mxu0 %vm988_vm2, %v1311_v29  ;;  %v1276_v28 = vld [vmem:[#allocation4 + $0x1e8] sm:$0xff]  ;;  %v1343_v29 = vld [vmem:[#allocation5 + $0x1f0] sm:$0xff] }
 0x740   :  { %3368 = vmatprep.mubr.msk.f32.mxu1 %vm988_vm2, %v1245_v30  ;;  %v1277_v30 = vld [vmem:[#allocation4 + $0x1f0] sm:$0xff] }
 0x742   :  { %3269 = vmatmul.mubr.msk.f32.gmra.mxu0 %vm988_vm2, %v1312_v31  ;;  %v1344_v31 = vld [vmem:[#allocation5 + $0x1f8] sm:$0xff] }
 0x743   :  { %3369 = vmatmul.mubr.msk.f32.gmra.mxu1 %vm988_vm2, %v1246_v32  ;;  %3271 = vmatprep.mubr.msk.f32.mxu0 %vm988_vm2, %v1313_v33  ;;  %v1278_v32 = vld [vmem:[#allocation4 + $0x1f8] sm:$0xff] }
 0x744   :  { %3371 = vmatprep.mubr.msk.f32.mxu1 %vm988_vm2, %v1247_v9 }
 0x746   :  { %3272 = vmatmul.mubr.msk.f32.gmra.mxu0 %vm988_vm2, %v1314_v10  ;;  %v4404_v10 = vld [vmem:[#allocation6] ss:$0 sm:$0xff] }
 0x747   :  { %3372 = vmatmul.mubr.msk.f32.gmra.mxu1 %vm988_vm2, %v1248_v11  ;;  %3274 = vmatprep.mubr.msk.f32.mxu0 %vm988_vm2, %v1315_v12 }
 0x748   :  { %3374 = vmatprep.mubr.msk.f32.mxu1 %vm988_vm2, %v1249_v34 }
 0x74a   :  { %3275 = vmatmul.mubr.msk.f32.gmra.mxu0 %vm988_vm2, %v1316_v35 }
 0x74b   :  { %3375 = vmatmul.mubr.msk.f32.gmra.mxu1 %vm988_vm2, %v1250_v36  ;;  %3277 = vmatprep.mubr.msk.f32.mxu0 %vm988_vm2, %v1317_v37 }
 0x74c   :  { %3377 = vmatprep.mubr.msk.f32.mxu1 %vm988_vm2, %v1251_v38 }
 0x74e   :  { %3278 = vmatmul.mubr.msk.f32.gmra.mxu0 %vm988_vm2, %v1318_v39 }
 0x74f   :  { %3378 = vmatmul.mubr.msk.f32.gmra.mxu1 %vm988_vm2, %v1252_v40  ;;  %3280 = vmatprep.mubr.msk.f32.mxu0 %vm988_vm2, %v1319_v41 }
 0x750   :  { %3380 = vmatprep.mubr.msk.f32.mxu1 %vm988_vm2, %v1253_v42 }
 0x752   :  { %3281 = vmatmul.mubr.msk.f32.gmra.mxu0 %vm988_vm2, %v1320_v43 }
 0x753   :  { %3381 = vmatmul.mubr.msk.f32.gmra.mxu1 %vm988_vm2, %v1254_v44  ;;  %3283 = vmatprep.mubr.msk.f32.mxu0 %vm988_vm2, %v1321_v45 }
 0x754   :  { %3383 = vmatprep.mubr.msk.f32.mxu1 %vm988_vm2, %v1255_v46 }
 0x756   :  { %3284 = vmatmul.mubr.msk.f32.gmra.mxu0 %vm988_vm2, %v1322_v47 }
 0x757   :  { %3384 = vmatmul.mubr.msk.f32.gmra.mxu1 %vm988_vm2, %v1256_v48  ;;  %3286 = vmatprep.mubr.msk.f32.mxu0 %vm988_vm2, %v1323_v18 }
 0x758   :  { %3386 = vmatprep.mubr.msk.f32.mxu1 %vm988_vm2, %v1257_v49 }
 0x75a   :  { %3287 = vmatmul.mubr.msk.f32.gmra.mxu0 %vm988_vm2, %v1324_v19 }
 0x75b   :  { %3387 = vmatmul.mubr.msk.f32.gmra.mxu1 %vm988_vm2, %v1258_v20  ;;  %3289 = vmatprep.mubr.msk.f32.mxu0 %vm988_vm2, %v1325_v50 }
 0x75c   :  { %3389 = vmatprep.mubr.msk.f32.mxu1 %vm988_vm2, %v1259_v51 }
 0x75e   :  { %3290 = vmatmul.mubr.msk.f32.gmra.mxu0 %vm988_vm2, %v1326_v52 }
 0x75f   :  { %3390 = vmatmul.mubr.msk.f32.gmra.mxu1 %vm988_vm2, %v1260_v53  ;;  %3292 = vmatprep.mubr.msk.f32.mxu0 %vm988_vm2, %v1327_v54 }
 0x760   :  { %3392 = vmatprep.mubr.msk.f32.mxu1 %vm988_vm2, %v1261_v55 }
 0x762   :  { %3293 = vmatmul.mubr.msk.f32.gmra.mxu0 %vm988_vm2, %v1328_v56 }
 0x763   :  { %3393 = vmatmul.mubr.msk.f32.gmra.mxu1 %vm988_vm2, %v1262_v57  ;;  %3295 = vmatprep.mubr.msk.f32.mxu0 %vm988_vm2, %v1329_v58 }
 0x764   :  { %3395 = vmatprep.mubr.msk.f32.mxu1 %vm988_vm2, %v1263_v59 }
 0x766   :  { %3296 = vmatmul.mubr.msk.f32.gmra.mxu0 %vm988_vm2, %v1330_v60 }
 0x767   :  { %3396 = vmatmul.mubr.msk.f32.gmra.mxu1 %vm988_vm2, %v1264_v61  ;;  %3298 = vmatprep.mubr.msk.f32.mxu0 %vm988_vm2, %v1331_v62 }
 0x768   :  { %3398 = vmatprep.mubr.msk.f32.mxu1 %vm988_vm2, %v1265_v63 }
 0x76a   :  { %3299 = vmatmul.mubr.msk.f32.gmra.mxu0 %vm988_vm2, %v1332_v0 }
 0x76b   :  { %3399 = vmatmul.mubr.msk.f32.gmra.mxu1 %vm988_vm2, %v1266_v1  ;;  %3301 = vmatprep.mubr.msk.f32.mxu0 %vm988_vm2, %v1333_v2 }
 0x76c   :  { %3401 = vmatprep.mubr.msk.f32.mxu1 %vm988_vm2, %v1267_v3 }
 0x76e   :  { %3302 = vmatmul.mubr.msk.f32.gmra.mxu0 %vm988_vm2, %v1334_v4 }
 0x76f   :  { %3402 = vmatmul.mubr.msk.f32.gmra.mxu1 %vm988_vm2, %v1268_v5  ;;  %3304 = vmatprep.mubr.msk.f32.mxu0 %vm988_vm2, %v1335_v6 }
 0x770   :  { %3404 = vmatprep.mubr.msk.f32.mxu1 %vm988_vm2, %v1269_v7 }
 0x772   :  { %3305 = vmatmul.mubr.msk.f32.gmra.mxu0 %vm988_vm2, %v1336_v8 }
 0x773   :  { %3405 = vmatmul.mubr.msk.f32.gmra.mxu1 %vm988_vm2, %v1270_v13  ;;  %3307 = vmatprep.mubr.msk.f32.mxu0 %vm988_vm2, %v1337_v14 }
 0x774   :  { %3407 = vmatprep.mubr.msk.f32.mxu1 %vm988_vm2, %v1271_v15 }
 0x776   :  { %3308 = vmatmul.mubr.msk.f32.gmra.mxu0 %vm988_vm2, %v1338_v16 }
 0x777   :  { %3408 = vmatmul.mubr.msk.f32.gmra.mxu1 %vm988_vm2, %v1272_v17  ;;  %3310 = vmatprep.mubr.msk.f32.mxu0 %vm988_vm2, %v1339_v21 }
 0x778   :  { %3410 = vmatprep.mubr.msk.f32.mxu1 %vm988_vm2, %v1273_v22 }
 0x77a   :  { %3311 = vmatmul.mubr.msk.f32.gmra.mxu0 %vm988_vm2, %v1340_v23 }
 0x77b   :  { %3411 = vmatmul.mubr.msk.f32.gmra.mxu1 %vm988_vm2, %v1274_v24  ;;  %3313 = vmatprep.mubr.msk.f32.mxu0 %vm988_vm2, %v1341_v25 }
 0x77c   :  { %3413 = vmatprep.mubr.msk.f32.mxu1 %vm988_vm2, %v1275_v26 }
 0x77e   :  { %3314 = vmatmul.mubr.msk.f32.gmra.mxu0 %vm988_vm2, %v1342_v27 }
 0x77f   :  { %3414 = vmatmul.mubr.msk.f32.gmra.mxu1 %vm988_vm2, %v1276_v28  ;;  %3316 = vmatprep.mubr.msk.f32.mxu0 %vm988_vm2, %v1343_v29 }
 0x780   :  { %3416 = vmatprep.mubr.msk.f32.mxu1 %vm988_vm2, %v1277_v30 }
 0x782   :  { %3317 = vmatmul.mubr.msk.f32.gmra.mxu0 %vm988_vm2, %v1344_v31 }
 0x783   :  { %3417 = vmatmul.mubr.msk.f32.gmra.mxu1 %vm988_vm2, %v1278_v32 }
 0x7c6   :  { %v3225_v33 = vpop.f32.mrf.mxu0 }
 0x7c7   :  { %v3325_v9 = vpop.f32.mrf.mxu1 }
 0x7c8   :  { %v2189_v11 = vadd.f32 %v3325_v9, %v3225_v33  ;;  %v1606_v12 = vpop.f32.mrf.mxu0 }
 0x7c9   :  { %v2183_v34 = vpop.f32.mrf.mxu1 }
 0x7ca   :  { %v2510_v35 = vadd.f32 %v4404_v10, %v2189_v11  ;;  %v2184_v36 = vadd.f32 %v2183_v34, %v1606_v12  ;;  %v3228_v37 = vpop.f32.mrf.mxu0 }
 0x7cb   :  { %v3328_v38 = vpop.f32.mrf.mxu1 }
 0x7cc   :  { %2575 = vst.msk [vmem:[%s4730_s10 + $0x8] sm:$0xff] %vm2573_vm4, %v2510_v35  ;;  %v2509_v39 = vadd.f32 %v4404_v10, %v2184_v36  ;;  %v2199_v40 = vadd.f32 %v3328_v38, %v3228_v37  ;;  %v1616_v41 = vpop.f32.mrf.mxu0 }
 0x7cd   :  { %v2193_v42 = vpop.f32.mrf.mxu1 }
 0x7ce   :  { %2574 = vst.msk [vmem:[%s4730_s10] sm:$0xff] %vm2573_vm4, %v2509_v39  ;;  %v2512_v43 = vadd.f32 %v4404_v10, %v2199_v40  ;;  %v2194_v44 = vadd.f32 %v2193_v42, %v1616_v41  ;;  %v3231_v45 = vpop.f32.mrf.mxu0 }
 0x7cf   :  { %v3331_v46 = vpop.f32.mrf.mxu1 }
 0x7d0   :  { %2577 = vst.msk [vmem:[%s4730_s10 + $0x18] sm:$0xff] %vm2573_vm4, %v2512_v43  ;;  %v2511_v47 = vadd.f32 %v4404_v10, %v2194_v44  ;;  %v2209_v48 = vadd.f32 %v3331_v46, %v3231_v45  ;;  %v1626_v18 = vpop.f32.mrf.mxu0 }
 0x7d1   :  { %v2203_v49 = vpop.f32.mrf.mxu1 }
 0x7d2   :  { %2576 = vst.msk [vmem:[%s4730_s10 + $0x10] sm:$0xff] %vm2573_vm4, %v2511_v47  ;;  %v2514_v19 = vadd.f32 %v4404_v10, %v2209_v48  ;;  %v2204_v20 = vadd.f32 %v2203_v49, %v1626_v18  ;;  %v3234_v50 = vpop.f32.mrf.mxu0 }
 0x7d3   :  { %v3334_v51 = vpop.f32.mrf.mxu1 }
 0x7d4   :  { %2579 = vst.msk [vmem:[%s4730_s10 + $0x28] sm:$0xff] %vm2573_vm4, %v2514_v19  ;;  %v2513_v52 = vadd.f32 %v4404_v10, %v2204_v20  ;;  %v2219_v53 = vadd.f32 %v3334_v51, %v3234_v50  ;;  %v1636_v54 = vpop.f32.mrf.mxu0 }
 0x7d5   :  { %v2213_v55 = vpop.f32.mrf.mxu1 }
 0x7d6   :  { %2578 = vst.msk [vmem:[%s4730_s10 + $0x20] sm:$0xff] %vm2573_vm4, %v2513_v52  ;;  %v2516_v56 = vadd.f32 %v4404_v10, %v2219_v53  ;;  %v2214_v57 = vadd.f32 %v2213_v55, %v1636_v54  ;;  %v3237_v58 = vpop.f32.mrf.mxu0 }
 0x7d7   :  { %v3337_v59 = vpop.f32.mrf.mxu1 }
 0x7d8   :  { %2581 = vst.msk [vmem:[%s4730_s10 + $0x38] sm:$0xff] %vm2573_vm4, %v2516_v56  ;;  %v2515_v60 = vadd.f32 %v4404_v10, %v2214_v57  ;;  %v2229_v61 = vadd.f32 %v3337_v59, %v3237_v58  ;;  %v1646_v62 = vpop.f32.mrf.mxu0 }
 0x7d9   :  { %v2223_v63 = vpop.f32.mrf.mxu1 }
 0x7da   :  { %2580 = vst.msk [vmem:[%s4730_s10 + $0x30] sm:$0xff] %vm2573_vm4, %v2515_v60  ;;  %v2518_v0 = vadd.f32 %v4404_v10, %v2229_v61  ;;  %v2224_v1 = vadd.f32 %v2223_v63, %v1646_v62  ;;  %v3240_v2 = vpop.f32.mrf.mxu0 }
 0x7db   :  { %v3340_v3 = vpop.f32.mrf.mxu1 }
 0x7dc   :  { %2583 = vst.msk [vmem:[%s4730_s10 + $0x48] sm:$0xff] %vm2573_vm4, %v2518_v0  ;;  %v2517_v4 = vadd.f32 %v4404_v10, %v2224_v1  ;;  %v2239_v5 = vadd.f32 %v3340_v3, %v3240_v2  ;;  %v1656_v6 = vpop.f32.mrf.mxu0 }
 0x7dd   :  { %v2233_v7 = vpop.f32.mrf.mxu1 }
 0x7de   :  { %2582 = vst.msk [vmem:[%s4730_s10 + $0x40] sm:$0xff] %vm2573_vm4, %v2517_v4  ;;  %v2520_v8 = vadd.f32 %v4404_v10, %v2239_v5  ;;  %v2234_v13 = vadd.f32 %v2233_v7, %v1656_v6  ;;  %v3243_v14 = vpop.f32.mrf.mxu0 }
 0x7df   :  { %v3343_v15 = vpop.f32.mrf.mxu1 }
 0x7e0   :  { %2585 = vst.msk [vmem:[%s4730_s10 + $0x58] sm:$0xff] %vm2573_vm4, %v2520_v8  ;;  %v2519_v16 = vadd.f32 %v4404_v10, %v2234_v13  ;;  %v2249_v17 = vadd.f32 %v3343_v15, %v3243_v14  ;;  %v1666_v21 = vpop.f32.mrf.mxu0 }
 0x7e1   :  { %v2243_v22 = vpop.f32.mrf.mxu1 }
 0x7e2   :  { %2584 = vst.msk [vmem:[%s4730_s10 + $0x50] sm:$0xff] %vm2573_vm4, %v2519_v16  ;;  %v2522_v23 = vadd.f32 %v4404_v10, %v2249_v17  ;;  %v2244_v24 = vadd.f32 %v2243_v22, %v1666_v21  ;;  %v3246_v25 = vpop.f32.mrf.mxu0 }
 0x7e3   :  { %v3346_v26 = vpop.f32.mrf.mxu1 }
 0x7e4   :  { %2587 = vst.msk [vmem:[%s4730_s10 + $0x68] sm:$0xff] %vm2573_vm4, %v2522_v23  ;;  %v2521_v27 = vadd.f32 %v4404_v10, %v2244_v24  ;;  %v2259_v28 = vadd.f32 %v3346_v26, %v3246_v25  ;;  %v1676_v29 = vpop.f32.mrf.mxu0 }
 0x7e5   :  { %v2253_v30 = vpop.f32.mrf.mxu1 }
 0x7e6   :  { %2586 = vst.msk [vmem:[%s4730_s10 + $0x60] sm:$0xff] %vm2573_vm4, %v2521_v27  ;;  %v2524_v31 = vadd.f32 %v4404_v10, %v2259_v28  ;;  %v2254_v32 = vadd.f32 %v2253_v30, %v1676_v29  ;;  %v3249_v33 = vpop.f32.mrf.mxu0 }
 0x7e7   :  { %v3349_v9 = vpop.f32.mrf.mxu1 }
 0x7e8   :  { %2589 = vst.msk [vmem:[%s4730_s10 + $0x78] sm:$0xff] %vm2573_vm4, %v2524_v31  ;;  %v2523_v11 = vadd.f32 %v4404_v10, %v2254_v32  ;;  %v2269_v12 = vadd.f32 %v3349_v9, %v3249_v33  ;;  %v1686_v34 = vpop.f32.mrf.mxu0 }
 0x7e9   :  { %v2263_v35 = vpop.f32.mrf.mxu1 }
 0x7ea   :  { %2588 = vst.msk [vmem:[%s4730_s10 + $0x70] sm:$0xff] %vm2573_vm4, %v2523_v11  ;;  %v2526_v36 = vadd.f32 %v4404_v10, %v2269_v12  ;;  %v2264_v37 = vadd.f32 %v2263_v35, %v1686_v34  ;;  %v3252_v38 = vpop.f32.mrf.mxu0 }
 0x7eb   :  { %v3352_v39 = vpop.f32.mrf.mxu1 }
 0x7ec   :  { %2591 = vst.msk [vmem:[%s4730_s10 + $0x88] sm:$0xff] %vm2573_vm4, %v2526_v36  ;;  %v2525_v40 = vadd.f32 %v4404_v10, %v2264_v37  ;;  %v2279_v41 = vadd.f32 %v3352_v39, %v3252_v38  ;;  %v1696_v42 = vpop.f32.mrf.mxu0 }
 0x7ed   :  { %v2273_v43 = vpop.f32.mrf.mxu1 }
 0x7ee   :  { %2590 = vst.msk [vmem:[%s4730_s10 + $0x80] sm:$0xff] %vm2573_vm4, %v2525_v40  ;;  %v2528_v44 = vadd.f32 %v4404_v10, %v2279_v41  ;;  %v2274_v45 = vadd.f32 %v2273_v43, %v1696_v42  ;;  %v3255_v46 = vpop.f32.mrf.mxu0 }
 0x7ef   :  { %v3355_v47 = vpop.f32.mrf.mxu1 }
 0x7f0   :  { %2593 = vst.msk [vmem:[%s4730_s10 + $0x98] sm:$0xff] %vm2573_vm4, %v2528_v44  ;;  %v2527_v48 = vadd.f32 %v4404_v10, %v2274_v45  ;;  %v2289_v18 = vadd.f32 %v3355_v47, %v3255_v46  ;;  %v1706_v49 = vpop.f32.mrf.mxu0 }
 0x7f1   :  { %v2283_v19 = vpop.f32.mrf.mxu1 }
 0x7f2   :  { %2592 = vst.msk [vmem:[%s4730_s10 + $0x90] sm:$0xff] %vm2573_vm4, %v2527_v48  ;;  %v2530_v20 = vadd.f32 %v4404_v10, %v2289_v18  ;;  %v2284_v50 = vadd.f32 %v2283_v19, %v1706_v49  ;;  %v3258_v51 = vpop.f32.mrf.mxu0 }
 0x7f3   :  { %v3358_v52 = vpop.f32.mrf.mxu1 }
 0x7f4   :  { %2595 = vst.msk [vmem:[%s4730_s10 + $0xa8] sm:$0xff] %vm2573_vm4, %v2530_v20  ;;  %v2529_v53 = vadd.f32 %v4404_v10, %v2284_v50  ;;  %v2299_v54 = vadd.f32 %v3358_v52, %v3258_v51  ;;  %v1716_v55 = vpop.f32.mrf.mxu0 }
 0x7f5   :  { %v2293_v56 = vpop.f32.mrf.mxu1 }
 0x7f6   :  { %2594 = vst.msk [vmem:[%s4730_s10 + $0xa0] sm:$0xff] %vm2573_vm4, %v2529_v53  ;;  %v2532_v57 = vadd.f32 %v4404_v10, %v2299_v54  ;;  %v2294_v58 = vadd.f32 %v2293_v56, %v1716_v55  ;;  %v3261_v59 = vpop.f32.mrf.mxu0 }
 0x7f7   :  { %v3361_v60 = vpop.f32.mrf.mxu1 }
 0x7f8   :  { %2597 = vst.msk [vmem:[%s4730_s10 + $0xb8] sm:$0xff] %vm2573_vm4, %v2532_v57  ;;  %v2531_v61 = vadd.f32 %v4404_v10, %v2294_v58  ;;  %v2309_v62 = vadd.f32 %v3361_v60, %v3261_v59  ;;  %v1726_v63 = vpop.f32.mrf.mxu0 }
 0x7f9   :  { %v2303_v0 = vpop.f32.mrf.mxu1 }
 0x7fa   :  { %2596 = vst.msk [vmem:[%s4730_s10 + $0xb0] sm:$0xff] %vm2573_vm4, %v2531_v61  ;;  %v2534_v1 = vadd.f32 %v4404_v10, %v2309_v62  ;;  %v2304_v2 = vadd.f32 %v2303_v0, %v1726_v63  ;;  %v3264_v3 = vpop.f32.mrf.mxu0 }
 0x7fb   :  { %v3364_v4 = vpop.f32.mrf.mxu1 }
 0x7fc   :  { %2599 = vst.msk [vmem:[%s4730_s10 + $0xc8] sm:$0xff] %vm2573_vm4, %v2534_v1  ;;  %v2533_v5 = vadd.f32 %v4404_v10, %v2304_v2  ;;  %v2319_v6 = vadd.f32 %v3364_v4, %v3264_v3  ;;  %v1736_v7 = vpop.f32.mrf.mxu0 }
 0x7fd   :  { %v2313_v8 = vpop.f32.mrf.mxu1 }
 0x7fe   :  { %2598 = vst.msk [vmem:[%s4730_s10 + $0xc0] sm:$0xff] %vm2573_vm4, %v2533_v5  ;;  %v2536_v13 = vadd.f32 %v4404_v10, %v2319_v6  ;;  %v2314_v14 = vadd.f32 %v2313_v8, %v1736_v7  ;;  %v3267_v15 = vpop.f32.mrf.mxu0 }
 0x7ff   :  { %v3367_v16 = vpop.f32.mrf.mxu1 }
 0x800   :  { %2601 = vst.msk [vmem:[%s4730_s10 + $0xd8] sm:$0xff] %vm2573_vm4, %v2536_v13  ;;  %v2535_v17 = vadd.f32 %v4404_v10, %v2314_v14  ;;  %v2329_v21 = vadd.f32 %v3367_v16, %v3267_v15  ;;  %v1746_v22 = vpop.f32.mrf.mxu0 }
 0x801   :  { %v2323_v23 = vpop.f32.mrf.mxu1 }
 0x802   :  { %2600 = vst.msk [vmem:[%s4730_s10 + $0xd0] sm:$0xff] %vm2573_vm4, %v2535_v17  ;;  %v2538_v24 = vadd.f32 %v4404_v10, %v2329_v21  ;;  %v2324_v25 = vadd.f32 %v2323_v23, %v1746_v22  ;;  %v3270_v26 = vpop.f32.mrf.mxu0 }
 0x803   :  { %v3370_v27 = vpop.f32.mrf.mxu1 }
 0x804   :  { %2603 = vst.msk [vmem:[%s4730_s10 + $0xe8] sm:$0xff] %vm2573_vm4, %v2538_v24  ;;  %v2537_v28 = vadd.f32 %v4404_v10, %v2324_v25  ;;  %v2339_v29 = vadd.f32 %v3370_v27, %v3270_v26  ;;  %v1756_v30 = vpop.f32.mrf.mxu0 }
 0x805   :  { %v2333_v31 = vpop.f32.mrf.mxu1 }
 0x806   :  { %2602 = vst.msk [vmem:[%s4730_s10 + $0xe0] sm:$0xff] %vm2573_vm4, %v2537_v28  ;;  %v2540_v32 = vadd.f32 %v4404_v10, %v2339_v29  ;;  %v2334_v33 = vadd.f32 %v2333_v31, %v1756_v30  ;;  %v3273_v9 = vpop.f32.mrf.mxu0 }
 0x807   :  { %v3373_v11 = vpop.f32.mrf.mxu1 }
 0x808   :  { %2605 = vst.msk [vmem:[%s4730_s10 + $0xf8] sm:$0xff] %vm2573_vm4, %v2540_v32  ;;  %v2539_v12 = vadd.f32 %v4404_v10, %v2334_v33  ;;  %v2349_v34 = vadd.f32 %v3373_v11, %v3273_v9  ;;  %v1766_v35 = vpop.f32.mrf.mxu0 }
 0x809   :  { %v2343_v36 = vpop.f32.mrf.mxu1 }
 0x80a   :  { %2604 = vst.msk [vmem:[%s4730_s10 + $0xf0] sm:$0xff] %vm2573_vm4, %v2539_v12  ;;  %v2542_v37 = vadd.f32 %v4404_v10, %v2349_v34  ;;  %v2344_v38 = vadd.f32 %v2343_v36, %v1766_v35  ;;  %v3276_v39 = vpop.f32.mrf.mxu0 }
 0x80b   :  { %v3376_v40 = vpop.f32.mrf.mxu1 }
 0x80c   :  { %2607 = vst.msk [vmem:[%s4730_s10 + $0x108] sm:$0xff] %vm2573_vm4, %v2542_v37  ;;  %v2541_v41 = vadd.f32 %v4404_v10, %v2344_v38  ;;  %v2359_v42 = vadd.f32 %v3376_v40, %v3276_v39  ;;  %v1776_v43 = vpop.f32.mrf.mxu0 }
 0x80d   :  { %v2353_v44 = vpop.f32.mrf.mxu1 }
 0x80e   :  { %2606 = vst.msk [vmem:[%s4730_s10 + $0x100] sm:$0xff] %vm2573_vm4, %v2541_v41  ;;  %v2544_v45 = vadd.f32 %v4404_v10, %v2359_v42  ;;  %v2354_v46 = vadd.f32 %v2353_v44, %v1776_v43  ;;  %v3279_v47 = vpop.f32.mrf.mxu0 }
 0x80f   :  { %v3379_v48 = vpop.f32.mrf.mxu1 }
 0x810   :  { %2609 = vst.msk [vmem:[%s4730_s10 + $0x118] sm:$0xff] %vm2573_vm4, %v2544_v45  ;;  %v2543_v18 = vadd.f32 %v4404_v10, %v2354_v46  ;;  %v2369_v49 = vadd.f32 %v3379_v48, %v3279_v47  ;;  %v1786_v19 = vpop.f32.mrf.mxu0 }
 0x811   :  { %v2363_v20 = vpop.f32.mrf.mxu1 }
 0x812   :  { %2608 = vst.msk [vmem:[%s4730_s10 + $0x110] sm:$0xff] %vm2573_vm4, %v2543_v18  ;;  %v2546_v50 = vadd.f32 %v4404_v10, %v2369_v49  ;;  %v2364_v51 = vadd.f32 %v2363_v20, %v1786_v19  ;;  %v3282_v52 = vpop.f32.mrf.mxu0 }
 0x813   :  { %v3382_v53 = vpop.f32.mrf.mxu1 }
 0x814   :  { %2611 = vst.msk [vmem:[%s4730_s10 + $0x128] sm:$0xff] %vm2573_vm4, %v2546_v50  ;;  %v2545_v54 = vadd.f32 %v4404_v10, %v2364_v51  ;;  %v2379_v55 = vadd.f32 %v3382_v53, %v3282_v52  ;;  %v1796_v56 = vpop.f32.mrf.mxu0 }
 0x815   :  { %v2373_v57 = vpop.f32.mrf.mxu1 }
 0x816   :  { %2610 = vst.msk [vmem:[%s4730_s10 + $0x120] sm:$0xff] %vm2573_vm4, %v2545_v54  ;;  %v2548_v58 = vadd.f32 %v4404_v10, %v2379_v55  ;;  %v2374_v59 = vadd.f32 %v2373_v57, %v1796_v56  ;;  %v3285_v60 = vpop.f32.mrf.mxu0 }
 0x817   :  { %v3385_v61 = vpop.f32.mrf.mxu1 }
 0x818   :  { %2613 = vst.msk [vmem:[%s4730_s10 + $0x138] sm:$0xff] %vm2573_vm4, %v2548_v58  ;;  %v2547_v62 = vadd.f32 %v4404_v10, %v2374_v59  ;;  %v2389_v63 = vadd.f32 %v3385_v61, %v3285_v60  ;;  %v1806_v0 = vpop.f32.mrf.mxu0 }
 0x819   :  { %v2383_v1 = vpop.f32.mrf.mxu1 }
 0x81a   :  { %2612 = vst.msk [vmem:[%s4730_s10 + $0x130] sm:$0xff] %vm2573_vm4, %v2547_v62  ;;  %v2550_v2 = vadd.f32 %v4404_v10, %v2389_v63  ;;  %v2384_v3 = vadd.f32 %v2383_v1, %v1806_v0  ;;  %v3288_v4 = vpop.f32.mrf.mxu0 }
 0x81b   :  { %v3388_v5 = vpop.f32.mrf.mxu1 }
 0x81c   :  { %2615 = vst.msk [vmem:[%s4730_s10 + $0x148] sm:$0xff] %vm2573_vm4, %v2550_v2  ;;  %v2549_v6 = vadd.f32 %v4404_v10, %v2384_v3  ;;  %v2399_v7 = vadd.f32 %v3388_v5, %v3288_v4  ;;  %v1816_v8 = vpop.f32.mrf.mxu0 }
 0x81d   :  { %v2393_v13 = vpop.f32.mrf.mxu1 }
 0x81e   :  { %2614 = vst.msk [vmem:[%s4730_s10 + $0x140] sm:$0xff] %vm2573_vm4, %v2549_v6  ;;  %v2552_v14 = vadd.f32 %v4404_v10, %v2399_v7  ;;  %v2394_v15 = vadd.f32 %v2393_v13, %v1816_v8  ;;  %v3291_v16 = vpop.f32.mrf.mxu0 }
 0x81f   :  { %v3391_v17 = vpop.f32.mrf.mxu1 }
 0x820   :  { %2617 = vst.msk [vmem:[%s4730_s10 + $0x158] sm:$0xff] %vm2573_vm4, %v2552_v14  ;;  %v2551_v21 = vadd.f32 %v4404_v10, %v2394_v15  ;;  %v2409_v22 = vadd.f32 %v3391_v17, %v3291_v16  ;;  %v1826_v23 = vpop.f32.mrf.mxu0 }
 0x821   :  { %v2403_v24 = vpop.f32.mrf.mxu1 }
 0x822   :  { %2616 = vst.msk [vmem:[%s4730_s10 + $0x150] sm:$0xff] %vm2573_vm4, %v2551_v21  ;;  %v2554_v25 = vadd.f32 %v4404_v10, %v2409_v22  ;;  %v2404_v26 = vadd.f32 %v2403_v24, %v1826_v23  ;;  %v3294_v27 = vpop.f32.mrf.mxu0 }
 0x823   :  { %v3394_v28 = vpop.f32.mrf.mxu1 }
 0x824   :  { %2619 = vst.msk [vmem:[%s4730_s10 + $0x168] sm:$0xff] %vm2573_vm4, %v2554_v25  ;;  %v2553_v29 = vadd.f32 %v4404_v10, %v2404_v26  ;;  %v2419_v30 = vadd.f32 %v3394_v28, %v3294_v27  ;;  %v1836_v31 = vpop.f32.mrf.mxu0 }
 0x825   :  { %v2413_v32 = vpop.f32.mrf.mxu1 }
 0x826   :  { %2618 = vst.msk [vmem:[%s4730_s10 + $0x160] sm:$0xff] %vm2573_vm4, %v2553_v29  ;;  %v2556_v33 = vadd.f32 %v4404_v10, %v2419_v30  ;;  %v2414_v9 = vadd.f32 %v2413_v32, %v1836_v31  ;;  %v3297_v11 = vpop.f32.mrf.mxu0 }
 0x827   :  { %v3397_v12 = vpop.f32.mrf.mxu1 }
 0x828   :  { %2621 = vst.msk [vmem:[%s4730_s10 + $0x178] sm:$0xff] %vm2573_vm4, %v2556_v33  ;;  %v2555_v34 = vadd.f32 %v4404_v10, %v2414_v9  ;;  %v2429_v35 = vadd.f32 %v3397_v12, %v3297_v11  ;;  %v1846_v36 = vpop.f32.mrf.mxu0 }
 0x829   :  { %v2423_v37 = vpop.f32.mrf.mxu1 }
 0x82a   :  { %2620 = vst.msk [vmem:[%s4730_s10 + $0x170] sm:$0xff] %vm2573_vm4, %v2555_v34  ;;  %v2558_v38 = vadd.f32 %v4404_v10, %v2429_v35  ;;  %v2424_v39 = vadd.f32 %v2423_v37, %v1846_v36  ;;  %v3300_v40 = vpop.f32.mrf.mxu0 }
 0x82b   :  { %v3400_v41 = vpop.f32.mrf.mxu1 }
 0x82c   :  { %2623 = vst.msk [vmem:[%s4730_s10 + $0x188] sm:$0xff] %vm2573_vm4, %v2558_v38  ;;  %v2557_v42 = vadd.f32 %v4404_v10, %v2424_v39  ;;  %v2439_v43 = vadd.f32 %v3400_v41, %v3300_v40  ;;  %v1856_v44 = vpop.f32.mrf.mxu0 }
 0x82d   :  { %v2433_v45 = vpop.f32.mrf.mxu1 }
 0x82e   :  { %2622 = vst.msk [vmem:[%s4730_s10 + $0x180] sm:$0xff] %vm2573_vm4, %v2557_v42  ;;  %v2560_v46 = vadd.f32 %v4404_v10, %v2439_v43  ;;  %v2434_v47 = vadd.f32 %v2433_v45, %v1856_v44  ;;  %v3303_v48 = vpop.f32.mrf.mxu0 }
 0x82f   :  { %v3403_v18 = vpop.f32.mrf.mxu1 }
 0x830   :  { %2625 = vst.msk [vmem:[%s4730_s10 + $0x198] sm:$0xff] %vm2573_vm4, %v2560_v46  ;;  %v2559_v49 = vadd.f32 %v4404_v10, %v2434_v47  ;;  %v2449_v19 = vadd.f32 %v3403_v18, %v3303_v48  ;;  %v1866_v20 = vpop.f32.mrf.mxu0 }
 0x831   :  { %v2443_v50 = vpop.f32.mrf.mxu1 }
 0x832   :  { %2624 = vst.msk [vmem:[%s4730_s10 + $0x190] sm:$0xff] %vm2573_vm4, %v2559_v49  ;;  %v2562_v51 = vadd.f32 %v4404_v10, %v2449_v19  ;;  %v2444_v52 = vadd.f32 %v2443_v50, %v1866_v20  ;;  %v3306_v53 = vpop.f32.mrf.mxu0 }
 0x833   :  { %v3406_v54 = vpop.f32.mrf.mxu1 }
 0x834   :  { %2627 = vst.msk [vmem:[%s4730_s10 + $0x1a8] sm:$0xff] %vm2573_vm4, %v2562_v51  ;;  %v2561_v55 = vadd.f32 %v4404_v10, %v2444_v52  ;;  %v2459_v56 = vadd.f32 %v3406_v54, %v3306_v53  ;;  %v1876_v57 = vpop.f32.mrf.mxu0 }
 0x835   :  { %v2453_v58 = vpop.f32.mrf.mxu1 }
 0x836   :  { %2626 = vst.msk [vmem:[%s4730_s10 + $0x1a0] sm:$0xff] %vm2573_vm4, %v2561_v55  ;;  %v2564_v59 = vadd.f32 %v4404_v10, %v2459_v56  ;;  %v2454_v60 = vadd.f32 %v2453_v58, %v1876_v57  ;;  %v3309_v61 = vpop.f32.mrf.mxu0 }
 0x837   :  { %v3409_v62 = vpop.f32.mrf.mxu1 }
 0x838   :  { %2629 = vst.msk [vmem:[%s4730_s10 + $0x1b8] sm:$0xff] %vm2573_vm4, %v2564_v59  ;;  %v2563_v63 = vadd.f32 %v4404_v10, %v2454_v60  ;;  %v2469_v0 = vadd.f32 %v3409_v62, %v3309_v61  ;;  %v1886_v1 = vpop.f32.mrf.mxu0 }
 0x839   :  { %v2463_v2 = vpop.f32.mrf.mxu1 }
 0x83a   :  { %2628 = vst.msk [vmem:[%s4730_s10 + $0x1b0] sm:$0xff] %vm2573_vm4, %v2563_v63  ;;  %v2566_v3 = vadd.f32 %v4404_v10, %v2469_v0  ;;  %v2464_v4 = vadd.f32 %v2463_v2, %v1886_v1  ;;  %v3312_v5 = vpop.f32.mrf.mxu0 }
 0x83b   :  { %v3412_v6 = vpop.f32.mrf.mxu1 }
 0x83c   :  { %2631 = vst.msk [vmem:[%s4730_s10 + $0x1c8] sm:$0xff] %vm2573_vm4, %v2566_v3  ;;  %v2565_v7 = vadd.f32 %v4404_v10, %v2464_v4  ;;  %v2479_v8 = vadd.f32 %v3412_v6, %v3312_v5  ;;  %v1896_v13 = vpop.f32.mrf.mxu0 }
 0x83d   :  { %v2473_v14 = vpop.f32.mrf.mxu1 }
 0x83e   :  { %2630 = vst.msk [vmem:[%s4730_s10 + $0x1c0] sm:$0xff] %vm2573_vm4, %v2565_v7  ;;  %v2568_v15 = vadd.f32 %v4404_v10, %v2479_v8  ;;  %v2474_v16 = vadd.f32 %v2473_v14, %v1896_v13  ;;  %v3315_v17 = vpop.f32.mrf.mxu0 }
 0x83f   :  { %v3415_v21 = vpop.f32.mrf.mxu1 }
 0x840   :  { %2633 = vst.msk [vmem:[%s4730_s10 + $0x1d8] sm:$0xff] %vm2573_vm4, %v2568_v15  ;;  %v2567_v22 = vadd.f32 %v4404_v10, %v2474_v16  ;;  %v2489_v23 = vadd.f32 %v3415_v21, %v3315_v17  ;;  %v1906_v24 = vpop.f32.mrf.mxu0 }
 0x841   :  { %v2483_v25 = vpop.f32.mrf.mxu1 }
 0x842   :  { %2632 = vst.msk [vmem:[%s4730_s10 + $0x1d0] sm:$0xff] %vm2573_vm4, %v2567_v22  ;;  %v2570_v26 = vadd.f32 %v4404_v10, %v2489_v23  ;;  %v2484_v27 = vadd.f32 %v2483_v25, %v1906_v24  ;;  %v3318_v28 = vpop.f32.mrf.mxu0 }
 0x843   :  { %v3418_v29 = vpop.f32.mrf.mxu1 }
 0x844   :  { %2635 = vst.msk [vmem:[%s4730_s10 + $0x1e8] sm:$0xff] %vm2573_vm4, %v2570_v26  ;;  %v2569_v30 = vadd.f32 %v4404_v10, %v2484_v27  ;;  %v2499_v31 = vadd.f32 %v3418_v29, %v3318_v28  ;;  %v1916_v32 = vpop.f32.mrf.mxu0 }
 0x845   :  { %v2493_v33 = vpop.f32.mrf.mxu1 }
 0x846   :  { %2634 = vst.msk [vmem:[%s4730_s10 + $0x1e0] sm:$0xff] %vm2573_vm4, %v2569_v30  ;;  %v2572_v9 = vadd.f32 %v4404_v10, %v2499_v31  ;;  %v2494_v11 = vadd.f32 %v2493_v33, %v1916_v32 }
 0x848   :  { %2637 = vst.msk [vmem:[%s4730_s10 + $0x1f8] sm:$0xff] %vm2573_vm4, %v2572_v9  ;;  %v2571_v12 = vadd.f32 %v4404_v10, %v2494_v11 }
 0x84a   :  { %2636 = vst.msk [vmem:[%s4730_s10 + $0x1f0] sm:$0xff] %vm2573_vm4, %v2571_v12 }

// kernel: forward.2
= control target key start
LH: loop header
LB: loop body
LE: loop exit
PB: predicated region body
PF: predicated region fallthrough
CT: control target
= control target key end

     0   :  { %vm263_vm0 = vcmask 261120   ;;  %vm413_vm1 = vcmask 523264   ;;  %s5022_s1 = inlined_call_operand.vmem [shape: f32[256,192], index: 1, kind: input, shape index: {}]   ;;  %s5023_s0 = inlined_call_operand.vmem [shape: f32[32,256], index: 0, kind: input, shape index: {}]   ;;  %s5024_s4 = inlined_call_operand.vmem [shape: f32[192,192], index: 4, kind: input, shape index: {}]   ;;  %s5025_s2 = inlined_call_operand.vmem [shape: f32[1,192], index: 2, kind: input, shape index: {}]   ;;  %s5026_s3 = inlined_call_operand.vmem [shape: f32[32,32], index: 3, kind: input, shape index: {}]   ;;  %s5027_s7 = inlined_call_operand.vmem [shape: f32[192,512], index: 7, kind: input, shape index: {}]   ;;  %s5028_s11 = inlined_call_operand.vmem [shape: f32[32,1], index: 11, kind: input, shape index: {}]   ;;  %s5029_s12 = inlined_call_operand.vmem [shape: f32[32,1], index: 12, kind: input, shape index: {}]   ;;  %s5030_s14 = inlined_call_operand.vmem [shape: f32[256,32], index: 14, kind: input, shape index: {}]   ;;  %s5031_s15 = inlined_call_operand.vmem [shape: f32[256,32], index: 15, kind: input, shape index: {}]   ;;  %s5032_s19 = inlined_call_operand.vmem [shape: f32[16,1], index: 19, kind: input, shape index: {}]   ;;  %s5033_s20 = inlined_call_operand.vmem [shape: f32[16,1], index: 20, kind: input, shape index: {}]   ;;  %s5034_s5 = inlined_call_operand.vmem [shape: f32[32,192], index: 5, kind: input, shape index: {}]   ;;  %s5035_s6 = inlined_call_operand.vmem [shape: f32[32,192], index: 6, kind: input, shape index: {}]   ;;  %s5036_s13 = inlined_call_operand.vmem [shape: f32[256,32], index: 13, kind: input, shape index: {}]   ;;  %s5037_s8 = inlined_call_operand.vmem [shape: f32[1,512], index: 8, kind: input, shape index: {}]   ;;  %s5038_s9 = inlined_call_operand.vmem [shape: f32[1,512], index: 9, kind: input, shape index: {}]   ;;  %s5039_s10 = inlined_call_operand.vmem [shape: f32[1,512], index: 10, kind: input, shape index: {}]   ;;  %s5040_s21 = inlined_call_operand.vmem [shape: f32[32,128], index: 21, kind: input, shape index: {}]   ;;  %s5041_s22 = inlined_call_operand.vmem [shape: f32[32,128], index: 22, kind: input, shape index: {}]   ;;  %s5042_s23 = inlined_call_operand.vmem [shape: f32[32,128], index: 23, kind: input, shape index: {}]   ;;  %s5043_s16 = inlined_call_operand.vmem [shape: f32[1,32], index: 16, kind: input, shape index: {}]   ;;  %s5044_s17 = inlined_call_operand.vmem [shape: f32[1,32], index: 17, kind: input, shape index: {}]   ;;  %s5045_s18 = inlined_call_operand.vmem [shape: f32[1,32], index: 18, kind: input, shape index: {}]   ;;  %s5046_s25 = inlined_call_operand.vmem [shape: f32[32,512], index: 25, kind: input, shape index: {}]   ;;  %s5047_s24 = inlined_call_operand.vmem [shape: f32[1,128], index: 24, kind: input, shape index: {}]   ;;  %s5048_s26 = inlined_call_operand.vmem [shape: f32[1,512], index: 26, kind: input, shape index: {}]   ;;  %s5049_s27 = inlined_call_operand.vmem [shape: f32[16,2048], index: 27, kind: output, shape index: {}]  }
   0x1   :  { %5063 = sst [smem:[#allocation3_spill]] %s5022_s1 }
   0x2   :  { %5064 = sst [smem:[#allocation4_spill]] %s5023_s0 }
   0x3   :  { %5065 = sst [smem:[#allocation5_spill]] %s5024_s4 }
   0x4   :  { %5066 = sst [smem:[#allocation6_spill]] %s5025_s2 }
   0x5   :  { %5067 = sst [smem:[#allocation7_spill]] %s5026_s3 }
   0x6   :  { %5068 = sst [smem:[#allocation8_spill]] %s5027_s7 }
   0x7   :  { %5069 = sst [smem:[#allocation9_spill]] %s5028_s11 }
   0x8   :  { %5070 = sst [smem:[#allocation10_spill]] %s5029_s12 }
   0x9   :  { %5071 = sst [smem:[#allocation11_spill]] %s5030_s14 }
   0xa   :  { %5072 = sst [smem:[#allocation12_spill]] %s5031_s15 }
   0xb   :  { %5073 = sst [smem:[#allocation13_spill]] %s5032_s19 }
   0xc   :  { %5074 = sst [smem:[#allocation14_spill]] %s5033_s20 }
   0xd   :  { %s5075_s14 = sld [smem:[#allocation3_spill]] }
   0xe   :  { %s5076_s29 = sld [smem:[#allocation4_spill]] }
   0xf   :  { %s5077_s3 = sld [smem:[#allocation5_spill]] }
  0x10   :  { %s5079_s28 = sld [smem:[#allocation7_spill]] }
  0x11   :  { %s5081_s19 = sld [smem:[#allocation8_spill]] }
  0x12   :  { %s5083_s11 = sld [smem:[#allocation10_spill]] }
  0x13   :  { %v125_v0 = vld [vmem:[%s5075_s14 + $0xf8] sm:$0xff]  ;;  %v124_v1 = vld [vmem:[%s5075_s14 + $0xf0] sm:$0xff]  ;;  %v123_v2 = vld [vmem:[%s5075_s14 + $0xe8] sm:$0xff]  ;;  %s5084_s4 = sld [smem:[#allocation11_spill]] }
  0x14   :  { %170 = vmatprep.subr.mxu0 %v125_v0  ;;  %v122_v3 = vld [vmem:[%s5075_s14 + $0xe0] sm:$0xff]  ;;  %v121_v4 = vld [vmem:[%s5075_s14 + $0xd8] sm:$0xff]  ;;  %v120_v5 = vld [vmem:[%s5075_s14 + $0xd0] sm:$0xff]  ;;  %s5085_s0 = sld [smem:[#allocation12_spill]] }
  0x15   :  { %171 = vmatpush1.msra.mxu0 %v124_v1  ;;  %v119_v6 = vld [vmem:[%s5075_s14 + $0xc8] sm:$0xff]  ;;  %v118_v7 = vld [vmem:[%s5075_s14 + $0xc0] sm:$0xff]  ;;  %v117_v8 = vld [vmem:[%s5075_s14 + $0xb8] sm:$0xff]  ;;  %s5086_s15 = sld [smem:[#allocation13_spill]] }
  0x16   :  { %172 = vmatprep.subr.mxu0 %v123_v2  ;;  %v116_v9 = vld [vmem:[%s5075_s14 + $0xb0] sm:$0xff]  ;;  %v115_v10 = vld [vmem:[%s5075_s14 + $0xa8] sm:$0xff]  ;;  %v114_v11 = vld [vmem:[%s5075_s14 + $0xa0] sm:$0xff]  ;;  %s5087_s1 = sld [smem:[#allocation14_spill]] }
  0x17   :  { %173 = vmatpush1.msra.mxu0 %v122_v3  ;;  %v113_v12 = vld [vmem:[%s5075_s14 + $0x98] sm:$0xff]  ;;  %v112_v13 = vld [vmem:[%s5075_s14 + $0x90] sm:$0xff]  ;;  %v111_v14 = vld [vmem:[%s5075_s14 + $0x88] sm:$0xff] }
  0x18   :  { %174 = vmatprep.subr.mxu0 %v121_v4  ;;  %v110_v15 = vld [vmem:[%s5075_s14 + $0x80] sm:$0xff]  ;;  %v109_v16 = vld [vmem:[%s5075_s14 + $0x78] sm:$0xff]  ;;  %v108_v17 = vld [vmem:[%s5075_s14 + $0x70] sm:$0xff] }
  0x19   :  { %175 = vmatpush1.msra.mxu0 %v120_v5  ;;  %v107_v18 = vld [vmem:[%s5075_s14 + $0x68] sm:$0xff]  ;;  %v106_v19 = vld [vmem:[%s5075_s14 + $0x60] sm:$0xff]  ;;  %v105_v20 = vld [vmem:[%s5075_s14 + $0x58] sm:$0xff] }
  0x1a   :  { %176 = vmatprep.subr.mxu0 %v119_v6  ;;  %v104_v21 = vld [vmem:[%s5075_s14 + $0x50] sm:$0xff]  ;;  %v103_v22 = vld [vmem:[%s5075_s14 + $0x48] sm:$0xff]  ;;  %v102_v23 = vld [vmem:[%s5075_s14 + $0x40] sm:$0xff] }
  0x1b   :  { %177 = vmatpush1.msra.mxu0 %v118_v7  ;;  %v87_v24 = vld [vmem:[%s5076_s29 + $0x8] sm:$0xff]  ;;  %v101_v25 = vld [vmem:[%s5075_s14 + $0x38] sm:$0xff]  ;;  %v100_v26 = vld [vmem:[%s5075_s14 + $0x30] sm:$0xff] }
  0x1c   :  { %178 = vmatprep.subr.mxu0 %v117_v8  ;;  %234 = vmatprep.mubr.f32.mxu0 %v87_v24  ;;  %v99_v27 = vld [vmem:[%s5075_s14 + $0x28] sm:$0xff]  ;;  %v98_v28 = vld [vmem:[%s5075_s14 + $0x20] sm:$0xff]  ;;  %v97_v29 = vld [vmem:[%s5075_s14 + $0x18] sm:$0xff]  ;;  %v5061_v8 = vmov 0.0  }
  0x1d   :  { %179 = vmatpush1.msra.mxu0 %v116_v9  ;;  %v96_v30 = vld [vmem:[%s5075_s14 + $0x10] sm:$0xff]  ;;  %v95_v31 = vld [vmem:[%s5075_s14 + $0x8] sm:$0xff]  ;;  %v94_v32 = vld [vmem:[%s5075_s14] sm:$0xff]  ;;  %340 = vmatprep.mubr.f32.mxu1 %v5061_v8 }
  0x1e   :  { %180 = vmatprep.subr.mxu0 %v115_v10  ;;  %v157_v33 = vld [vmem:[%s5075_s14 + $0x1f8] sm:$0xff]  ;;  %v156_v34 = vld [vmem:[%s5075_s14 + $0x1f0] sm:$0xff]  ;;  %v155_v35 = vld [vmem:[%s5075_s14 + $0x1e8] sm:$0xff] }
  0x1f   :  { %181 = vmatpush1.msra.mxu0 %v114_v11  ;;  %v154_v36 = vld [vmem:[%s5075_s14 + $0x1e0] sm:$0xff]  ;;  %v153_v37 = vld [vmem:[%s5075_s14 + $0x1d8] sm:$0xff]  ;;  %v152_v38 = vld [vmem:[%s5075_s14 + $0x1d0] sm:$0xff] }
  0x20   :  { %182 = vmatprep.subr.mxu0 %v113_v12  ;;  %v151_v39 = vld [vmem:[%s5075_s14 + $0x1c8] sm:$0xff]  ;;  %v150_v40 = vld [vmem:[%s5075_s14 + $0x1c0] sm:$0xff]  ;;  %v149_v41 = vld [vmem:[%s5075_s14 + $0x1b8] sm:$0xff] }
  0x21   :  { %183 = vmatpush1.msra.mxu0 %v112_v13  ;;  %v148_v42 = vld [vmem:[%s5075_s14 + $0x1b0] sm:$0xff]  ;;  %v147_v43 = vld [vmem:[%s5075_s14 + $0x1a8] sm:$0xff]  ;;  %v146_v44 = vld [vmem:[%s5075_s14 + $0x1a0] sm:$0xff] }
  0x22   :  { %184 = vmatprep.subr.mxu0 %v111_v14  ;;  %v145_v45 = vld [vmem:[%s5075_s14 + $0x198] sm:$0xff]  ;;  %v144_v46 = vld [vmem:[%s5075_s14 + $0x190] sm:$0xff]  ;;  %v143_v47 = vld [vmem:[%s5075_s14 + $0x188] sm:$0xff] }
  0x23   :  { %185 = vmatpush1.msra.mxu0 %v110_v15  ;;  %v142_v48 = vld [vmem:[%s5075_s14 + $0x180] sm:$0xff]  ;;  %v141_v49 = vld [vmem:[%s5075_s14 + $0x178] sm:$0xff]  ;;  %v140_v50 = vld [vmem:[%s5075_s14 + $0x170] sm:$0xff] }
  0x24   :  { %186 = vmatprep.subr.mxu0 %v109_v16  ;;  %v139_v51 = vld [vmem:[%s5075_s14 + $0x168] sm:$0xff]  ;;  %v138_v52 = vld [vmem:[%s5075_s14 + $0x160] sm:$0xff]  ;;  %v137_v53 = vld [vmem:[%s5075_s14 + $0x158] sm:$0xff] }
  0x25   :  { %187 = vmatpush1.msra.mxu0 %v108_v17  ;;  %v136_v54 = vld [vmem:[%s5075_s14 + $0x150] sm:$0xff]  ;;  %v135_v55 = vld [vmem:[%s5075_s14 + $0x148] sm:$0xff]  ;;  %v134_v56 = vld [vmem:[%s5075_s14 + $0x140] sm:$0xff] }
  0x26   :  { %188 = vmatprep.subr.mxu0 %v107_v18  ;;  %v133_v57 = vld [vmem:[%s5075_s14 + $0x138] sm:$0xff]  ;;  %v132_v58 = vld [vmem:[%s5075_s14 + $0x130] sm:$0xff]  ;;  %v131_v59 = vld [vmem:[%s5075_s14 + $0x128] sm:$0xff] }
  0x27   :  { %189 = vmatpush1.msra.mxu0 %v106_v19  ;;  %v130_v60 = vld [vmem:[%s5075_s14 + $0x120] sm:$0xff]  ;;  %v129_v61 = vld [vmem:[%s5075_s14 + $0x118] sm:$0xff]  ;;  %v128_v62 = vld [vmem:[%s5075_s14 + $0x110] sm:$0xff] }
  0x28   :  { %190 = vmatprep.subr.mxu0 %v105_v20  ;;  %v127_v63 = vld [vmem:[%s5075_s14 + $0x108] sm:$0xff]  ;;  %v126_v0 = vld [vmem:[%s5075_s14 + $0x100] sm:$0xff]  ;;  %v89_v2 = vld [vmem:[%s5076_s29 + $0x18] sm:$0xff]  ;;  %s5082_s14 = sld [smem:[#allocation9_spill]] }
  0x29   :  { %191 = vmatpush1.msra.mxu0 %v104_v21  ;;  %v86_v1 = vld [vmem:[%s5076_s29] sm:$0xff]  ;;  %v88_v3 = vld [vmem:[%s5076_s29 + $0x10] sm:$0xff]  ;;  %v91_v4 = vld [vmem:[%s5076_s29 + $0x28] sm:$0xff] }
  0x2a   :  { %192 = vmatprep.subr.mxu0 %v103_v22  ;;  %v90_v5 = vld [vmem:[%s5076_s29 + $0x20] sm:$0xff]  ;;  %v93_v6 = vld [vmem:[%s5076_s29 + $0x38] sm:$0xff]  ;;  %v92_v7 = vld [vmem:[%s5076_s29 + $0x30] sm:$0xff]  ;;  %s5078_s29 = sld [smem:[#allocation6_spill]] }
  0x2b   :  { %193 = vmatpush1.msra.mxu0 %v102_v23  ;;  %v3327_v9 = vld [vmem:[%s5077_s3 + $0xf8] sm:$0xff]  ;;  %v3332_v10 = vld [vmem:[%s5077_s3 + $0xf0] sm:$0xff]  ;;  %v3338_v11 = vld [vmem:[%s5077_s3 + $0xe8] sm:$0xff] }
  0x2c   :  { %194 = vmatprep.subr.mxu0 %v101_v25  ;;  %v3344_v12 = vld [vmem:[%s5077_s3 + $0xe0] sm:$0xff]  ;;  %v3350_v13 = vld [vmem:[%s5077_s3 + $0xd8] sm:$0xff]  ;;  %v3356_v14 = vld [vmem:[%s5077_s3 + $0xd0] sm:$0xff] }
  0x2d   :  { %195 = vmatpush1.msra.mxu0 %v100_v26  ;;  %v3362_v15 = vld [vmem:[%s5077_s3 + $0xc8] sm:$0xff]  ;;  %v3368_v16 = vld [vmem:[%s5077_s3 + $0xc0] sm:$0xff]  ;;  %v3374_v17 = vld [vmem:[%s5077_s3 + $0xb8] sm:$0xff] }
  0x2e   :  { %196 = vmatprep.subr.mxu0 %v99_v27  ;;  %v3380_v18 = vld [vmem:[%s5077_s3 + $0xb0] sm:$0xff]  ;;  %v3386_v19 = vld [vmem:[%s5077_s3 + $0xa8] sm:$0xff]  ;;  %v3392_v20 = vld [vmem:[%s5077_s3 + $0xa0] sm:$0xff] }
  0x2f   :  { %197 = vmatpush1.msra.mxu0 %v98_v28  ;;  %v3398_v21 = vld [vmem:[%s5077_s3 + $0x98] sm:$0xff]  ;;  %v3404_v22 = vld [vmem:[%s5077_s3 + $0x90] sm:$0xff]  ;;  %v3410_v23 = vld [vmem:[%s5077_s3 + $0x88] sm:$0xff] }
  0x30   :  { %198 = vmatprep.subr.mxu0 %v97_v29  ;;  %v3416_v24 = vld [vmem:[%s5077_s3 + $0x80] sm:$0xff]  ;;  %v3422_v25 = vld [vmem:[%s5077_s3 + $0x78] sm:$0xff]  ;;  %v3428_v26 = vld [vmem:[%s5077_s3 + $0x70] sm:$0xff] }
  0x31   :  { %199 = vmatpush1.msra.mxu0 %v96_v30  ;;  %v3434_v27 = vld [vmem:[%s5077_s3 + $0x68] sm:$0xff]  ;;  %v3440_v28 = vld [vmem:[%s5077_s3 + $0x60] sm:$0xff]  ;;  %v3446_v29 = vld [vmem:[%s5077_s3 + $0x58] sm:$0xff] }
  0x32   :  { %200 = vmatprep.subr.mxu0 %v95_v31  ;;  %v3452_v30 = vld [vmem:[%s5077_s3 + $0x50] sm:$0xff]  ;;  %v3458_v31 = vld [vmem:[%s5077_s3 + $0x48] sm:$0xff] }
  0x33   :  { %201 = vmatpush1.msra.mxu0 %v94_v32  ;;  %v3464_v32 = vld [vmem:[%s5077_s3 + $0x40] sm:$0xff] }
  0x34   :  { %202 = vmatprep.subr.mxu0 %v157_v33  ;;  %v3470_v33 = vld [vmem:[%s5077_s3 + $0x38] sm:$0xff] }
  0x35   :  { %203 = vmatpush2.msra.mxu0 %v156_v34  ;;  %v3476_v34 = vld [vmem:[%s5077_s3 + $0x30] sm:$0xff] }
  0x36   :  { %204 = vmatprep.subr.mxu0 %v155_v35  ;;  %v3482_v35 = vld [vmem:[%s5077_s3 + $0x28] sm:$0xff] }
  0x37   :  { %205 = vmatpush2.msra.mxu0 %v154_v36  ;;  %v3488_v36 = vld [vmem:[%s5077_s3 + $0x20] sm:$0xff] }
  0x38   :  { %206 = vmatprep.subr.mxu0 %v153_v37  ;;  %v3494_v37 = vld [vmem:[%s5077_s3 + $0x18] sm:$0xff] }
  0x39   :  { %207 = vmatpush2.msra.mxu0 %v152_v38  ;;  %v3500_v38 = vld [vmem:[%s5077_s3 + $0x10] sm:$0xff] }
  0x3a   :  { %208 = vmatprep.subr.mxu0 %v151_v39  ;;  %v3506_v39 = vld [vmem:[%s5077_s3 + $0x8] sm:$0xff] }
  0x3b   :  { %209 = vmatpush2.msra.mxu0 %v150_v40  ;;  %v3512_v40 = vld [vmem:[%s5077_s3] sm:$0xff] }
  0x3c   :  { %210 = vmatprep.subr.mxu0 %v149_v41  ;;  %v3518_v41 = vld [vmem:[%s5077_s3 + $0x178] sm:$0xff] }
  0x3d   :  { %211 = vmatpush2.msra.mxu0 %v148_v42  ;;  %v3524_v42 = vld [vmem:[%s5077_s3 + $0x170] sm:$0xff] }
  0x3e   :  { %212 = vmatprep.subr.mxu0 %v147_v43  ;;  %v3530_v43 = vld [vmem:[%s5077_s3 + $0x168] sm:$0xff] }
  0x3f   :  { %213 = vmatpush2.msra.mxu0 %v146_v44  ;;  %v3536_v44 = vld [vmem:[%s5077_s3 + $0x160] sm:$0xff] }
  0x40   :  { %214 = vmatprep.subr.mxu0 %v145_v45  ;;  %v3542_v45 = vld [vmem:[%s5077_s3 + $0x158] sm:$0xff] }
  0x41   :  { %215 = vmatpush2.msra.mxu0 %v144_v46  ;;  %v3548_v46 = vld [vmem:[%s5077_s3 + $0x150] sm:$0xff] }
  0x42   :  { %216 = vmatprep.subr.mxu0 %v143_v47  ;;  %v3554_v47 = vld [vmem:[%s5077_s3 + $0x148] sm:$0xff] }
  0x43   :  { %217 = vmatpush2.msra.mxu0 %v142_v48  ;;  %v3560_v48 = vld [vmem:[%s5077_s3 + $0x140] sm:$0xff] }
  0x44   :  { %218 = vmatprep.subr.mxu0 %v141_v49  ;;  %v3566_v49 = vld [vmem:[%s5077_s3 + $0x138] sm:$0xff] }
  0x45   :  { %219 = vmatpush2.msra.mxu0 %v140_v50  ;;  %v3572_v50 = vld [vmem:[%s5077_s3 + $0x130] sm:$0xff] }
  0x46   :  { %220 = vmatprep.subr.mxu0 %v139_v51  ;;  %v3578_v51 = vld [vmem:[%s5077_s3 + $0x128] sm:$0xff] }
  0x47   :  { %221 = vmatpush2.msra.mxu0 %v138_v52  ;;  %v3584_v52 = vld [vmem:[%s5077_s3 + $0x120] sm:$0xff] }
  0x48   :  { %222 = vmatprep.subr.mxu0 %v137_v53 }
  0x49   :  { %223 = vmatpush2.msra.mxu0 %v136_v54  ;;  %v160_v54 = vlaneseq }
  0x4a   :  { %224 = vmatprep.subr.mxu0 %v135_v55 }
  0x4b   :  { %225 = vmatpush2.msra.mxu0 %v134_v56 }
  0x4c   :  { %226 = vmatprep.subr.mxu0 %v133_v57  ;;  %v3588_v57 = vshrl.u32 %v160_v54, 7 }
  0x4d   :  { %227 = vmatpush2.msra.mxu0 %v132_v58 }
  0x4e   :  { %228 = vmatprep.subr.mxu0 %v131_v59  ;;  %vm1236_vm2 = vcmp.lt.s32.totalorder %v3588_v57, 7  ;;  %vm1187_vm3 = vcmp.lt.s32.totalorder %v3588_v57, 1 }
  0x4f   :  { %229 = vmatpush2.msra.mxu0 %v130_v60  ;;  %v3591_v60 = vsub.s32 1, %v3588_v57 }
  0x50   :  { %230 = vmatprep.subr.mxu0 %v129_v61  ;;  %v3594_v61 = vsub.s32 0, %v3588_v57 }
  0x51   :  { %231 = vmatpush2.msra.mxu0 %v128_v62 }
  0x52   :  { %232 = vmatprep.subr.mxu0 %v127_v63  ;;  %v158_v63 = vld [vmem:[%s5078_s29] sm:$0x3] }
  0x53   :  { %233 = vmatpush2.msra.mxu0 %v126_v0 }
  0x54   :  { %235 = vmatmul.mubr.f32.vlgmr.msra.gmra.mxu0 %v86_v1  ;;  %632 = vmatprep.subr.mxu0 %v3327_v9  ;;  %v167_v1 = vrot.slane %v158_v63, %v3591_v60 }
  0x55   :  { %240 = vmatprep.mubr.f32.mxu0 %v89_v2  ;;  %633 = vmatpush1.msra.mxu0 %v3332_v10  ;;  %v163_v2 = vrot.slane %v158_v63, %v3594_v61 }
  0x56   :  { %634 = vmatprep.subr.mxu0 %v3338_v11 }
  0x57   :  { %635 = vmatpush1.msra.mxu0 %v3344_v12 }
  0x58   :  { %241 = vmatmul.mubr.f32.gmra.mxu0 %v88_v3  ;;  %636 = vmatprep.subr.mxu0 %v3350_v13 }
  0x59   :  { %246 = vmatprep.mubr.f32.mxu0 %v91_v4  ;;  %637 = vmatpush1.msra.mxu0 %v3356_v14 }
  0x5a   :  { %638 = vmatprep.subr.mxu0 %v3362_v15 }
  0x5b   :  { %639 = vmatpush1.msra.mxu0 %v3368_v16 }
  0x5c   :  { %247 = vmatmul.mubr.f32.gmra.mxu0 %v90_v5  ;;  %640 = vmatprep.subr.mxu0 %v3374_v17 }
  0x5d   :  { %252 = vmatprep.mubr.f32.mxu0 %v93_v6  ;;  %641 = vmatpush1.msra.mxu0 %v3380_v18 }
  0x5e   :  { %642 = vmatprep.subr.mxu0 %v3386_v19 }
  0x5f   :  { %643 = vmatpush1.msra.mxu0 %v3392_v20 }
  0x60   :  { %253 = vmatmul.mubr.f32.gmra.mxu0 %v92_v7  ;;  %644 = vmatprep.subr.mxu0 %v3398_v21 }
  0x61   :  { %645 = vmatpush1.msra.mxu0 %v3404_v22 }
  0x62   :  { %646 = vmatprep.subr.mxu0 %v3410_v23 }
  0x63   :  { %647 = vmatpush1.msra.mxu0 %v3416_v24 }
  0x64   :  { %648 = vmatprep.subr.mxu0 %v3422_v25 }
  0x65   :  { %649 = vmatpush1.msra.mxu0 %v3428_v26 }
  0x66   :  { %650 = vmatprep.subr.mxu0 %v3434_v27 }
  0x67   :  { %651 = vmatpush1.msra.mxu0 %v3440_v28 }
  0x68   :  { %652 = vmatprep.subr.mxu0 %v3446_v29 }
  0x69   :  { %653 = vmatpush1.msra.mxu0 %v3452_v30 }
  0x6a   :  { %654 = vmatprep.subr.mxu0 %v3458_v31 }
  0x6b   :  { %655 = vmatpush1.msra.mxu0 %v3464_v32 }
  0x6c   :  { %656 = vmatprep.subr.mxu0 %v3470_v33 }
  0x6d   :  { %657 = vmatpush1.msra.mxu0 %v3476_v34 }
  0x6e   :  { %658 = vmatprep.subr.mxu0 %v3482_v35 }
  0x6f   :  { %659 = vmatpush1.msra.mxu0 %v3488_v36 }
  0x70   :  { %660 = vmatprep.subr.mxu0 %v3494_v37 }
  0x71   :  { %661 = vmatpush1.msra.mxu0 %v3500_v38 }
  0x72   :  { %662 = vmatprep.subr.mxu0 %v3506_v39 }
  0x73   :  { %663 = vmatpush1.msra.mxu0 %v3512_v40 }
  0x74   :  { %680 = vmatprep.subr.mxu0 %v3518_v41 }
  0x75   :  { %681 = vmatpush2.msra.mxu0 %v3524_v42 }
  0x76   :  { %682 = vmatprep.subr.mxu0 %v3530_v43 }
  0x77   :  { %683 = vmatpush2.msra.mxu0 %v3536_v44 }
  0x78   :  { %684 = vmatprep.subr.mxu0 %v3542_v45 }
  0x79   :  { %685 = vmatpush2.msra.mxu0 %v3548_v46 }
  0x7a   :  { %686 = vmatprep.subr.mxu0 %v3554_v47 }
  0x7b   :  { %687 = vmatpush2.msra.mxu0 %v3560_v48 }
  0x7c   :  { %688 = vmatprep.subr.mxu0 %v3566_v49 }
  0x7d   :  { %689 = vmatpush2.msra.mxu0 %v3572_v50 }
  0x7e   :  { %690 = vmatprep.subr.mxu0 %v3578_v51 }
  0x7f   :  { %691 = vmatpush2.msra.mxu0 %v3584_v52 }
 0x114   :  { %v236_v53 = vpop.f32.mrf.mxu0 }
 0x116   :  { %v238_v55 = vpop.f32.mrf.mxu0 }
 0x117   :  { %v3617_v63 = vadd.f32 %v238_v55, %v167_v1  ;;  %v5080_v55 = vmov 0.0  }
 0x118   :  { %v242_v56 = vpop.f32.mrf.mxu0 }
 0x119   :  { %v3614_v8 = vadd.f32 %v242_v56, %v163_v2  ;;  %v818_v56 = vld [vmem:[%s5081_s19 + $0x188] sm:$0xff] }
 0x11a   :  { %v244_v58 = vpop.f32.mrf.mxu0 }
 0x11b   :  { %v3611_v54 = vadd.f32 %v244_v58, %v167_v1  ;;  %v817_v58 = vld [vmem:[%s5081_s19 + $0x180] sm:$0xff] }
 0x11c   :  { %v248_v59 = vpop.f32.mrf.mxu0 }
 0x11d   :  { %v3608_v7 = vadd.f32 %v248_v59, %v163_v2  ;;  %v3626_v59 = vld [vmem:[%s5079_s28] sm:$0xff] }
 0x11e   :  { %v250_v62 = vpop.f32.mrf.mxu0 }
 0x11f   :  { %v3605_v6 = vadd.f32 %v250_v62, %v167_v1  ;;  %v3620_v62 = vadd.f32 %v236_v53, %v163_v2  ;;  %v3637_v53 = vld [vmem:[%s5079_s28 + $0x8] sm:$0xff] }
 0x120   :  { %v254_v0 = vpop.f32.mrf.mxu0 }
 0x121   :  { %v3603_v5 = vadd.f32 %v254_v0, %v163_v2  ;;  %v814_v0 = vld [vmem:[%s5081_s19 + $0x168] sm:$0xff] }
 0x122   :  { %v256_v3 = vpop.f32.mrf.mxu0  ;;  %v810_v2 = vld [vmem:[%s5081_s19 + $0x148] sm:$0xff] }
 0x123   :  { %v3601_v4 = vadd.f32 %v256_v3, %v167_v1  ;;  %v813_v1 = vld [vmem:[%s5081_s19 + $0x160] sm:$0xff] }
 0x124   :  { %v809_v3 = vld [vmem:[%s5081_s19 + $0x140] sm:$0xff] }
 0x125   :  { %300 = vmatprep.subr.mxu1 %v3601_v4 }
 0x126   :  { %301 = vmatpush1.msra.mxu1 %v3603_v5 }
 0x127   :  { %302 = vmatprep.subr.mxu1 %v3605_v6 }
 0x128   :  { %303 = vmatpush1.msra.mxu1 %v3608_v7 }
 0x129   :  { %304 = vmatprep.subr.mxu1 %v3611_v54 }
 0x12a   :  { %305 = vmatpush1.msra.mxu1 %v3614_v8 }
 0x12b   :  { %306 = vmatprep.subr.mxu1 %v3617_v63 }
 0x12c   :  { %307 = vmatpush1.msra.mxu1 %v3620_v62 }
 0x12d   :  { %2706 = vmatmul.mubr.msk.f32.vlgmr.msra.gmra.mxu1 %vm263_vm0, %v3626_v59  ;;  %426 = vmatprep.subr.mxu1 %v3327_v9  ;;  %v3649_v9 = vld [vmem:[%s5079_s28 + $0x10] sm:$0xff] }
 0x12e   :  { %346 = vmatprep.mubr.f32.mxu1 %v5080_v55  ;;  %427 = vmatpush1.msra.mxu1 %v3332_v10  ;;  %v3661_v10 = vld [vmem:[%s5079_s28 + $0x18] sm:$0xff] }
 0x12f   :  { %428 = vmatprep.subr.mxu1 %v3338_v11  ;;  %v400_v11 = vld [vmem:[%s5077_s3 + $0x118] sm:$0xff] }
 0x130   :  { %429 = vmatpush1.msra.mxu1 %v3344_v12  ;;  %v399_v12 = vld [vmem:[%s5077_s3 + $0x110] sm:$0xff]  ;;  %692 = vmatprep.subr.mxu0 %v400_v11 }
 0x131   :  { %2707 = vmatmul.mubr.msk.f32.gmra.mxu1 %vm263_vm0, %v3637_v53  ;;  %430 = vmatprep.subr.mxu1 %v3350_v13  ;;  %v398_v13 = vld [vmem:[%s5077_s3 + $0x108] sm:$0xff] }
 0x132   :  { %352 = vmatprep.mubr.f32.mxu1 %v5080_v55  ;;  %431 = vmatpush1.msra.mxu1 %v3356_v14  ;;  %v397_v14 = vld [vmem:[%s5077_s3 + $0x100] sm:$0xff]  ;;  %s2964_s3 = smov 96  }
 0x133   :  { %432 = vmatprep.subr.mxu1 %v3362_v15  ;;  %693 = vmatpush2.msra.mxu0 %v399_v12 }
 0x134   :  { %433 = vmatpush1.msra.mxu1 %v3368_v16  ;;  %694 = vmatprep.subr.mxu0 %v398_v13 }
 0x135   :  { %2708 = vmatmul.mubr.msk.f32.gmra.mxu1 %vm263_vm0, %v3649_v9  ;;  %434 = vmatprep.subr.mxu1 %v3374_v17 }
 0x136   :  { %358 = vmatprep.mubr.f32.mxu1 %v5080_v55  ;;  %435 = vmatpush1.msra.mxu1 %v3380_v18 }
 0x137   :  { %436 = vmatprep.subr.mxu1 %v3386_v19  ;;  %695 = vmatpush2.msra.mxu0 %v397_v14 }
 0x138   :  { %437 = vmatpush1.msra.mxu1 %v3392_v20 }
 0x139   :  { %2709 = vmatmul.mubr.msk.f32.gmra.mxu1 %vm263_vm0, %v3661_v10  ;;  %438 = vmatprep.subr.mxu1 %v3398_v21 }
 0x13a   :  { %439 = vmatpush1.msra.mxu1 %v3404_v22 }
 0x13b   :  { %440 = vmatprep.subr.mxu1 %v3410_v23 }
 0x13c   :  { %441 = vmatpush1.msra.mxu1 %v3416_v24 }
 0x13d   :  { %442 = vmatprep.subr.mxu1 %v3422_v25 }
 0x13e   :  { %443 = vmatpush1.msra.mxu1 %v3428_v26 }
 0x13f   :  { %444 = vmatprep.subr.mxu1 %v3434_v27 }
 0x140   :  { %445 = vmatpush1.msra.mxu1 %v3440_v28 }
 0x141   :  { %446 = vmatprep.subr.mxu1 %v3446_v29 }
 0x142   :  { %447 = vmatpush1.msra.mxu1 %v3452_v30 }
 0x143   :  { %448 = vmatprep.subr.mxu1 %v3458_v31 }
 0x144   :  { %449 = vmatpush1.msra.mxu1 %v3464_v32 }
 0x145   :  { %450 = vmatprep.subr.mxu1 %v3470_v33 }
 0x146   :  { %451 = vmatpush1.msra.mxu1 %v3476_v34 }
 0x147   :  { %452 = vmatprep.subr.mxu1 %v3482_v35 }
 0x148   :  { %453 = vmatpush1.msra.mxu1 %v3488_v36 }
 0x149   :  { %454 = vmatprep.subr.mxu1 %v3494_v37 }
 0x14a   :  { %455 = vmatpush1.msra.mxu1 %v3500_v38 }
 0x14b   :  { %456 = vmatprep.subr.mxu1 %v3506_v39 }
 0x14c   :  { %457 = vmatpush1.msra.mxu1 %v3512_v40 }
 0x14d   :  { %474 = vmatprep.subr.mxu1 %v3518_v41 }
 0x14e   :  { %475 = vmatpush2.msra.mxu1 %v3524_v42 }
 0x14f   :  { %476 = vmatprep.subr.mxu1 %v3530_v43 }
 0x150   :  { %477 = vmatpush2.msra.mxu1 %v3536_v44 }
 0x151   :  { %478 = vmatprep.subr.mxu1 %v3542_v45 }
 0x152   :  { %479 = vmatpush2.msra.mxu1 %v3548_v46  ;;  %v830_v46 = vld [vmem:[%s5081_s19 + $0x1e8] sm:$0xff] }
 0x153   :  { %480 = vmatprep.subr.mxu1 %v3554_v47  ;;  %v832_v47 = vld [vmem:[%s5081_s19 + $0x1f8] sm:$0xff] }
 0x154   :  { %481 = vmatpush2.msra.mxu1 %v3560_v48  ;;  %v829_v48 = vld [vmem:[%s5081_s19 + $0x1e0] sm:$0xff]  ;;  %988 = vmatprep.subr.mxu0 %v832_v47  ;;  %v788_v47 = vld [vmem:[%s5081_s19 + $0x98] sm:$0xff] }
 0x155   :  { %482 = vmatprep.subr.mxu1 %v3566_v49  ;;  %v826_v49 = vld [vmem:[%s5081_s19 + $0x1c8] sm:$0xff] }
 0x156   :  { %483 = vmatpush2.msra.mxu1 %v3572_v50  ;;  %v825_v50 = vld [vmem:[%s5081_s19 + $0x1c0] sm:$0xff] }
 0x157   :  { %484 = vmatprep.subr.mxu1 %v3578_v51  ;;  %v822_v51 = vld [vmem:[%s5081_s19 + $0x1a8] sm:$0xff] }
 0x158   :  { %485 = vmatpush2.msra.mxu1 %v3584_v52  ;;  %v821_v52 = vld [vmem:[%s5081_s19 + $0x1a0] sm:$0xff] }
 0x159   :  { %486 = vmatprep.subr.mxu1 %v400_v11 }
 0x15a   :  { %487 = vmatpush2.msra.mxu1 %v399_v12  ;;  %v831_v12 = vld [vmem:[%s5081_s19 + $0x1f0] sm:$0xff] }
 0x15b   :  { %488 = vmatprep.subr.mxu1 %v398_v13  ;;  %v828_v13 = vld [vmem:[%s5081_s19 + $0x1d8] sm:$0xff] }
 0x15c   :  { %489 = vmatpush2.msra.mxu1 %v397_v14 }
 0x1ed   :  { %v342_v15 = vpop.f32.mrf.mxu1 }
 0x1ef   :  { %v344_v16 = vpop.f32.mrf.mxu1 }
 0x1f0   :  { %2710 = vmatprep.mubr.msk.f32.mxu1 %vm413_vm1, %v344_v16  ;;  %v824_v16 = vld [vmem:[%s5081_s19 + $0x1b8] sm:$0xff] }
 0x1f1   :  { %v348_v17 = vpop.f32.mrf.mxu1  ;;  %491 = vmatmul.mubr.f32.vlgmr.msra.gmra.mxu1 %v342_v15  ;;  %v827_v15 = vld [vmem:[%s5081_s19 + $0x1d0] sm:$0xff] }
 0x1f3   :  { %v350_v18 = vpop.f32.mrf.mxu1 }
 0x1f4   :  { %2711 = vmatprep.mubr.msk.f32.mxu1 %vm413_vm1, %v350_v18  ;;  %v823_v18 = vld [vmem:[%s5081_s19 + $0x1b0] sm:$0xff] }
 0x1f5   :  { %v354_v19 = vpop.f32.mrf.mxu1  ;;  %497 = vmatmul.mubr.f32.gmra.mxu1 %v348_v17 }
 0x1f7   :  { %v356_v20 = vpop.f32.mrf.mxu1 }
 0x1f8   :  { %2712 = vmatprep.mubr.msk.f32.mxu1 %vm413_vm1, %v356_v20 }
 0x1f9   :  { %v360_v21 = vpop.f32.mrf.mxu1  ;;  %503 = vmatmul.mubr.f32.gmra.mxu1 %v354_v19  ;;  %v820_v19 = vld [vmem:[%s5081_s19 + $0x198] sm:$0xff] }
 0x1fb   :  { %v362_v22 = vpop.f32.mrf.mxu1 }
 0x1fc   :  { %2713 = vmatprep.mubr.msk.f32.mxu1 %vm413_vm1, %v362_v22  ;;  %v816_v22 = vld [vmem:[%s5081_s19 + $0x178] sm:$0xff] }
 0x1fd   :  { %509 = vmatmul.mubr.f32.gmra.mxu1 %v360_v21  ;;  %v819_v21 = vld [vmem:[%s5081_s19 + $0x190] sm:$0xff] }
 0x1fe   :  { %595 = vmatprep.mubr.f32.mxu1 %v5080_v55 }
 0x2b1   :  { %v492_v23 = vpop.f32.mrf.mxu1 }
 0x2b2   :  { %v3745_v41 = vsub.f32 %v3620_v62, %v492_v23  ;;  %v794_v62 = vld [vmem:[%s5081_s19 + $0xc8] sm:$0xff] }
 0x2b3   :  { %v494_v24 = vpop.f32.mrf.mxu1 }
 0x2b4   :  { %v3740_v39 = vsub.f32 %v3617_v63, %v494_v24  ;;  %v523_v45 = vmul.f32 %v3745_v41, %v3745_v41  ;;  %v797_v63 = vld [vmem:[%s5081_s19 + $0xe0] sm:$0xff]  ;;  %v815_v24 = vld [vmem:[%s5081_s19 + $0x170] sm:$0xff] }
 0x2b5   :  { %v498_v25 = vpop.f32.mrf.mxu1 }
 0x2b6   :  { %v3735_v37 = vsub.f32 %v3614_v8, %v498_v25  ;;  %v524_v44 = vmul.f32 %v3740_v39, %v3740_v39  ;;  %v812_v25 = vld [vmem:[%s5081_s19 + $0x158] sm:$0xff] }
 0x2b7   :  { %v500_v26 = vpop.f32.mrf.mxu1 }
 0x2b8   :  { %v3730_v35 = vsub.f32 %v3611_v54, %v500_v26  ;;  %v525_v43 = vmul.f32 %v3735_v37, %v3735_v37  ;;  %v798_v54 = vld [vmem:[%s5081_s19 + $0xe8] sm:$0xff] }
 0x2b9   :  { %v504_v27 = vpop.f32.mrf.mxu1 }
 0x2ba   :  { %v3727_v34 = vsub.f32 %v3608_v7, %v504_v27  ;;  %v526_v8 = vmul.f32 %v3730_v35, %v3730_v35  ;;  %v801_v7 = vld [vmem:[%s5081_s19 + $0x100] sm:$0xff]  ;;  %v811_v27 = vld [vmem:[%s5081_s19 + $0x150] sm:$0xff] }
 0x2bb   :  { %v506_v28 = vpop.f32.mrf.mxu1 }
 0x2bc   :  { %v3721_v32 = vsub.f32 %v3605_v6, %v506_v28  ;;  %v527_v42 = vmul.f32 %v3727_v34, %v3727_v34  ;;  %v802_v6 = vld [vmem:[%s5081_s19 + $0x108] sm:$0xff]  ;;  %v808_v28 = vld [vmem:[%s5081_s19 + $0x138] sm:$0xff] }
 0x2bd   :  { %v510_v29 = vpop.f32.mrf.mxu1 }
 0x2be   :  { %v3718_v30 = vsub.f32 %v3603_v5, %v510_v29  ;;  %v528_v40 = vmul.f32 %v3721_v32, %v3721_v32  ;;  %v805_v5 = vld [vmem:[%s5081_s19 + $0x120] sm:$0xff] }
 0x2bf   :  { %v512_v31 = vpop.f32.mrf.mxu1 }
 0x2c0   :  { %v3724_v33 = vsub.f32 %v3601_v4, %v512_v31  ;;  %v529_v38 = vmul.f32 %v3718_v30, %v3718_v30  ;;  %v806_v4 = vld [vmem:[%s5081_s19 + $0x128] sm:$0xff]  ;;  %v807_v31 = vld [vmem:[%s5081_s19 + $0x130] sm:$0xff] }
 0x2c2   :  { %v530_v36 = vmul.f32 %v3724_v33, %v3724_v33 }
 0x2c4   :  { %555 = vmatprep.subr.mxu1 %v530_v36  ;;  %v804_v36 = vld [vmem:[%s5081_s19 + $0x118] sm:$0xff] }
 0x2c5   :  { %556 = vmatpush1.msra.mxu1 %v529_v38  ;;  %v803_v38 = vld [vmem:[%s5081_s19 + $0x110] sm:$0xff] }
 0x2c6   :  { %557 = vmatprep.subr.mxu1 %v528_v40  ;;  %v800_v40 = vld [vmem:[%s5081_s19 + $0xf8] sm:$0xff] }
 0x2c7   :  { %558 = vmatpush1.msra.mxu1 %v527_v42  ;;  %v799_v42 = vld [vmem:[%s5081_s19 + $0xf0] sm:$0xff] }
 0x2c8   :  { %559 = vmatprep.subr.mxu1 %v526_v8  ;;  %v796_v8 = vld [vmem:[%s5081_s19 + $0xd8] sm:$0xff] }
 0x2c9   :  { %560 = vmatpush1.msra.mxu1 %v525_v43  ;;  %v795_v43 = vld [vmem:[%s5081_s19 + $0xd0] sm:$0xff] }
 0x2ca   :  { %561 = vmatprep.subr.mxu1 %v524_v44  ;;  %v792_v44 = vld [vmem:[%s5081_s19 + $0xb8] sm:$0xff] }
 0x2cb   :  { %562 = vmatpush1.msra.mxu1 %v523_v45  ;;  %v791_v45 = vld [vmem:[%s5081_s19 + $0xb0] sm:$0xff] }
 0x2cc   :  { %2714 = vmatmul.mubr.msk.f32.vlgmr.msra.gmra.mxu1 %vm263_vm0, %v3626_v59  ;;  %899 = vmatprep.subr.mxu1 %v830_v46  ;;  %v793_v59 = vld [vmem:[%s5081_s19 + $0xc0] sm:$0xff]  ;;  %v786_v46 = vld [vmem:[%s5081_s19 + $0x88] sm:$0xff] }
 0x2cd   :  { %601 = vmatprep.mubr.f32.mxu1 %v5080_v55  ;;  %900 = vmatpush1.msra.mxu1 %v829_v48  ;;  %v785_v48 = vld [vmem:[%s5081_s19 + $0x80] sm:$0xff] }
 0x2ce   :  { %901 = vmatprep.subr.mxu1 %v826_v49  ;;  %v787_v49 = vld [vmem:[%s5081_s19 + $0x90] sm:$0xff] }
 0x2cf   :  { %902 = vmatpush1.msra.mxu1 %v825_v50  ;;  %v782_v50 = vld [vmem:[%s5081_s19 + $0x68] sm:$0xff] }
 0x2d0   :  { %2715 = vmatmul.mubr.msk.f32.gmra.mxu1 %vm263_vm0, %v3637_v53  ;;  %903 = vmatprep.subr.mxu1 %v822_v51  ;;  %v790_v53 = vld [vmem:[%s5081_s19 + $0xa8] sm:$0xff]  ;;  %v784_v51 = vld [vmem:[%s5081_s19 + $0x78] sm:$0xff] }
 0x2d1   :  { %607 = vmatprep.mubr.f32.mxu1 %v5080_v55  ;;  %904 = vmatpush1.msra.mxu1 %v821_v52  ;;  %v781_v52 = vld [vmem:[%s5081_s19 + $0x60] sm:$0xff] }
 0x2d2   :  { %905 = vmatprep.subr.mxu1 %v818_v56  ;;  %v783_v56 = vld [vmem:[%s5081_s19 + $0x70] sm:$0xff] }
 0x2d3   :  { %906 = vmatpush1.msra.mxu1 %v817_v58  ;;  %v778_v58 = vld [vmem:[%s5081_s19 + $0x48] sm:$0xff] }
 0x2d4   :  { %2716 = vmatmul.mubr.msk.f32.gmra.mxu1 %vm263_vm0, %v3649_v9  ;;  %907 = vmatprep.subr.mxu1 %v814_v0  ;;  %v789_v9 = vld [vmem:[%s5081_s19 + $0xa0] sm:$0xff]  ;;  %v780_v0 = vld [vmem:[%s5081_s19 + $0x58] sm:$0xff] }
 0x2d5   :  { %613 = vmatprep.mubr.f32.mxu1 %v5080_v55  ;;  %908 = vmatpush1.msra.mxu1 %v813_v1  ;;  %v777_v1 = vld [vmem:[%s5081_s19 + $0x40] sm:$0xff] }
 0x2d6   :  { %909 = vmatprep.subr.mxu1 %v810_v2  ;;  %v779_v2 = vld [vmem:[%s5081_s19 + $0x50] sm:$0xff] }
 0x2d7   :  { %910 = vmatpush1.msra.mxu1 %v809_v3  ;;  %v774_v3 = vld [vmem:[%s5081_s19 + $0x28] sm:$0xff] }
 0x2d8   :  { %2717 = vmatmul.mubr.msk.f32.gmra.mxu1 %vm263_vm0, %v3661_v10  ;;  %911 = vmatprep.subr.mxu1 %v806_v4  ;;  %v776_v4 = vld [vmem:[%s5081_s19 + $0x38] sm:$0xff] }
 0x2d9   :  { %912 = vmatpush1.msra.mxu1 %v805_v5  ;;  %v773_v5 = vld [vmem:[%s5081_s19 + $0x20] sm:$0xff] }
 0x2da   :  { %913 = vmatprep.subr.mxu1 %v802_v6  ;;  %v775_v6 = vld [vmem:[%s5081_s19 + $0x30] sm:$0xff] }
 0x2db   :  { %914 = vmatpush1.msra.mxu1 %v801_v7  ;;  %v770_v7 = vld [vmem:[%s5081_s19 + $0x8] sm:$0xff] }
 0x2dc   :  { %915 = vmatprep.subr.mxu1 %v798_v54  ;;  %v772_v54 = vld [vmem:[%s5081_s19 + $0x18] sm:$0xff] }
 0x2dd   :  { %916 = vmatpush1.msra.mxu1 %v797_v63  ;;  %v769_v63 = vld [vmem:[%s5081_s19] sm:$0xff] }
 0x2de   :  { %917 = vmatprep.subr.mxu1 %v794_v62  ;;  %v771_v62 = vld [vmem:[%s5081_s19 + $0x10] sm:$0xff] }
 0x2df   :  { %918 = vmatpush1.msra.mxu1 %v793_v59  ;;  %v862_v59 = vld [vmem:[%s5081_s19 + $0x2e8] sm:$0xff] }
 0x2e0   :  { %919 = vmatprep.subr.mxu1 %v790_v53  ;;  %v864_v53 = vld [vmem:[%s5081_s19 + $0x2f8] sm:$0xff] }
 0x2e1   :  { %920 = vmatpush1.msra.mxu1 %v789_v9  ;;  %v861_v9 = vld [vmem:[%s5081_s19 + $0x2e0] sm:$0xff] }
 0x2e2   :  { %921 = vmatprep.subr.mxu1 %v786_v46  ;;  %v2963_v46 = vmov 0  }
 0x2e3   :  { %922 = vmatpush1.msra.mxu1 %v785_v48  ;;  %2945 = vset.pattern.permute.xlu1 %v2963_v46  ;;  %v1196_v48 = vld [vmem:[%s5082_s14] sm:$0xff] }
 0x2e4   :  { %923 = vmatprep.subr.mxu1 %v782_v50  ;;  %2944 = vset.pattern.permute.xlu0 %v2963_v46  ;;  %v1245_v50 = vld [vmem:[%s5083_s11] sm:$0xff] }
 0x2e5   :  { %924 = vmatpush1.msra.mxu1 %v781_v52  ;;  %1202 = vperm.xlu0 %2944, %v1196_v48   ;;  %v1247_v52 = vld [vmem:[%s5083_s11 + $0x10] sm:$0xff] }
 0x2e6   :  { %925 = vmatprep.subr.mxu1 %v778_v58  ;;  %v1542_v58 = vld [vmem:[%s5085_s0 + $0xf8] sm:$0xff]  ;;  %v1339_v48 = vld [vmem:[%s5084_s4 + $0xf0] sm:$0xff] }
 0x2e7   :  { %926 = vmatpush1.msra.mxu1 %v777_v1  ;;  %v1199_v1 = vld [vmem:[%s5082_s14 + $0x18] sm:$0xff] }
 0x2e8   :  { %927 = vmatprep.subr.mxu1 %v774_v3  ;;  %v1687_v3 = vld [vmem:[%s5086_s15 + $0x8] sm:$0xff] }
 0x2e9   :  { %928 = vmatpush1.msra.mxu1 %v773_v5  ;;  %1251 = vperm.xlu0 %2944, %v1245_v50   ;;  %v1705_v5 = vld [vmem:[%s5087_s1 + $0x8] sm:$0xff] }
 0x2ea   :  { %929 = vmatprep.subr.mxu1 %v770_v7 }
 0x2eb   :  { %930 = vmatpush1.msra.mxu1 %v769_v63 }
 0x2ec   :  { %947 = vmatprep.subr.mxu1 %v862_v59 }
 0x2ed   :  { %948 = vmatpush2.msra.mxu1 %v861_v9 }
 0x38c   :  { %v597_v10 = vpop.f32.mrf.mxu1 }
 0x38e   :  { %v599_v11 = vpop.f32.mrf.mxu1 }
 0x38f   :  { %2718 = vmatprep.mubr.msk.f32.mxu0 %vm413_vm1, %v599_v11  ;;  %v858_v11 = vld [vmem:[%s5081_s19 + $0x2c8] sm:$0xff] }
 0x390   :  { %v603_v14 = vpop.f32.mrf.mxu1  ;;  %697 = vmatmul.mubr.f32.vlgmr.msra.gmra.mxu0 %v597_v10  ;;  %v863_v10 = vld [vmem:[%s5081_s19 + $0x2f0] sm:$0xff]  ;;  %949 = vmatprep.subr.mxu1 %v858_v11 }
 0x391   :  { %989 = vmatpush1.msra.mxu0 %v831_v12  ;;  %v860_v12 = vld [vmem:[%s5081_s19 + $0x2d8] sm:$0xff] }
 0x392   :  { %v605_v17 = vpop.f32.mrf.mxu1  ;;  %990 = vmatprep.subr.mxu0 %v828_v13  ;;  %v857_v13 = vld [vmem:[%s5081_s19 + $0x2c0] sm:$0xff] }
 0x393   :  { %2719 = vmatprep.mubr.msk.f32.mxu0 %vm413_vm1, %v605_v17  ;;  %991 = vmatpush1.msra.mxu0 %v827_v15  ;;  %v854_v15 = vld [vmem:[%s5081_s19 + $0x2a8] sm:$0xff]  ;;  %v853_v17 = vld [vmem:[%s5081_s19 + $0x2a0] sm:$0xff] }
 0x394   :  { %v609_v20 = vpop.f32.mrf.mxu1  ;;  %703 = vmatmul.mubr.f32.gmra.mxu0 %v603_v14  ;;  %992 = vmatprep.subr.mxu0 %v824_v16  ;;  %v859_v14 = vld [vmem:[%s5081_s19 + $0x2d0] sm:$0xff]  ;;  %v856_v16 = vld [vmem:[%s5081_s19 + $0x2b8] sm:$0xff] }
 0x395   :  { %993 = vmatpush1.msra.mxu0 %v823_v18  ;;  %950 = vmatpush2.msra.mxu1 %v857_v13  ;;  %v855_v18 = vld [vmem:[%s5081_s19 + $0x2b0] sm:$0xff] }
 0x396   :  { %v611_v23 = vpop.f32.mrf.mxu1  ;;  %994 = vmatprep.subr.mxu0 %v820_v19  ;;  %951 = vmatprep.subr.mxu1 %v854_v15  ;;  %v850_v19 = vld [vmem:[%s5081_s19 + $0x288] sm:$0xff] }
 0x397   :  { %2720 = vmatprep.mubr.msk.f32.mxu0 %vm413_vm1, %v611_v23  ;;  %995 = vmatpush1.msra.mxu0 %v819_v21  ;;  %v849_v21 = vld [vmem:[%s5081_s19 + $0x280] sm:$0xff]  ;;  %v846_v23 = vld [vmem:[%s5081_s19 + $0x268] sm:$0xff] }
 0x398   :  { %v615_v26 = vpop.f32.mrf.mxu1  ;;  %709 = vmatmul.mubr.f32.gmra.mxu0 %v609_v20  ;;  %996 = vmatprep.subr.mxu0 %v816_v22  ;;  %v852_v20 = vld [vmem:[%s5081_s19 + $0x298] sm:$0xff]  ;;  %v851_v22 = vld [vmem:[%s5081_s19 + $0x290] sm:$0xff] }
 0x399   :  { %997 = vmatpush1.msra.mxu0 %v815_v24  ;;  %952 = vmatpush2.msra.mxu1 %v853_v17  ;;  %v848_v24 = vld [vmem:[%s5081_s19 + $0x278] sm:$0xff] }
 0x39a   :  { %v617_v29 = vpop.f32.mrf.mxu1  ;;  %998 = vmatprep.subr.mxu0 %v812_v25  ;;  %953 = vmatprep.subr.mxu1 %v850_v19  ;;  %v845_v25 = vld [vmem:[%s5081_s19 + $0x260] sm:$0xff] }
 0x39b   :  { %2721 = vmatprep.mubr.msk.f32.mxu0 %vm413_vm1, %v617_v29  ;;  %999 = vmatpush1.msra.mxu0 %v811_v27  ;;  %v842_v27 = vld [vmem:[%s5081_s19 + $0x248] sm:$0xff]  ;;  %v841_v29 = vld [vmem:[%s5081_s19 + $0x240] sm:$0xff] }
 0x39c   :  { %715 = vmatmul.mubr.f32.gmra.mxu0 %v615_v26  ;;  %1000 = vmatprep.subr.mxu0 %v808_v28  ;;  %v847_v26 = vld [vmem:[%s5081_s19 + $0x270] sm:$0xff]  ;;  %v844_v28 = vld [vmem:[%s5081_s19 + $0x258] sm:$0xff] }
 0x39d   :  { %1001 = vmatpush1.msra.mxu0 %v807_v31  ;;  %954 = vmatpush2.msra.mxu1 %v849_v21  ;;  %v843_v31 = vld [vmem:[%s5081_s19 + $0x250] sm:$0xff] }
 0x39e   :  { %1002 = vmatprep.subr.mxu0 %v804_v36  ;;  %955 = vmatprep.subr.mxu1 %v846_v23  ;;  %v838_v36 = vld [vmem:[%s5081_s19 + $0x228] sm:$0xff] }
 0x39f   :  { %1003 = vmatpush1.msra.mxu0 %v803_v38  ;;  %956 = vmatpush2.msra.mxu1 %v845_v25  ;;  %v840_v38 = vld [vmem:[%s5081_s19 + $0x238] sm:$0xff]  ;;  %v754_v25 = vld [vmem:[%s5035_s6 + $0x8] sm:$0xff] }
 0x3a0   :  { %1004 = vmatprep.subr.mxu0 %v800_v40  ;;  %957 = vmatprep.subr.mxu1 %v842_v27  ;;  %v837_v40 = vld [vmem:[%s5081_s19 + $0x220] sm:$0xff] }
 0x3a1   :  { %1005 = vmatpush1.msra.mxu0 %v799_v42  ;;  %v839_v42 = vld [vmem:[%s5081_s19 + $0x230] sm:$0xff]  ;;  %958 = vmatpush2.msra.mxu1 %v841_v29 }
 0x3a2   :  { %1006 = vmatprep.subr.mxu0 %v796_v8  ;;  %v834_v8 = vld [vmem:[%s5081_s19 + $0x208] sm:$0xff]  ;;  %959 = vmatprep.subr.mxu1 %v838_v36  ;;  %v739_v29 = vld [vmem:[%s5034_s5 + $0x10] sm:$0xff] }
 0x3a3   :  { %1007 = vmatpush1.msra.mxu0 %v795_v43  ;;  %v836_v43 = vld [vmem:[%s5081_s19 + $0x218] sm:$0xff]  ;;  %960 = vmatpush2.msra.mxu1 %v837_v40  ;;  %v755_v40 = vld [vmem:[%s5035_s6 + $0x10] sm:$0xff] }
 0x3a4   :  { %1008 = vmatprep.subr.mxu0 %v792_v44  ;;  %v833_v44 = vld [vmem:[%s5081_s19 + $0x200] sm:$0xff]  ;;  %961 = vmatprep.subr.mxu1 %v834_v8 }
 0x3a5   :  { %1009 = vmatpush1.msra.mxu0 %v791_v45  ;;  %v835_v45 = vld [vmem:[%s5081_s19 + $0x210] sm:$0xff]  ;;  %962 = vmatpush2.msra.mxu1 %v833_v44  ;;  %v1324_v44 = vld [vmem:[%s5084_s4 + $0x78] sm:$0xff] }
 0x3a6   :  { %1010 = vmatprep.subr.mxu0 %v788_v47  ;;  %v1197_v47 = vld [vmem:[%s5082_s14 + $0x8] sm:$0xff] }
 0x3a7   :  { %1011 = vmatpush1.msra.mxu0 %v787_v49  ;;  %1207 = vperm.xlu1 %2945, %v1197_v47   ;;  %v1246_v49 = vld [vmem:[%s5083_s11 + $0x8] sm:$0xff]  ;;  %v741_v47 = vld [vmem:[%s5034_s5 + $0x20] sm:$0xff] }
 0x3a8   :  { %1012 = vmatprep.subr.mxu0 %v784_v51  ;;  %v1340_v51 = vld [vmem:[%s5084_s4 + $0xf8] sm:$0xff] }
 0x3a9   :  { %1013 = vmatpush1.msra.mxu0 %v783_v56  ;;  %v1198_v56 = vld [vmem:[%s5082_s14 + $0x10] sm:$0xff]  ;;  %2756 = vmatprep.subr.mxu1 %v1340_v51  ;;  %v742_v51 = vld [vmem:[%s5034_s5 + $0x28] sm:$0xff] }
 0x3aa   :  { %1014 = vmatprep.subr.mxu0 %v780_v0  ;;  %1212 = vperm.xlu0 %2944, %v1198_v56   ;;  %v1248_v0 = vld [vmem:[%s5083_s11 + $0x18] sm:$0xff]  ;;  %v757_v56 = vld [vmem:[%s5035_s6 + $0x20] sm:$0xff] }
 0x3ab   :  { %1015 = vmatpush1.msra.mxu0 %v779_v2  ;;  %1256 = vperm.xlu1 %2945, %v1246_v49   ;;  %v1686_v2 = vld [vmem:[%s5086_s15] sm:$0xff]  ;;  %v1541_v49 = vld [vmem:[%s5085_s0 + $0xf0] sm:$0xff] }
 0x3ac   :  { %1016 = vmatprep.subr.mxu0 %v776_v4  ;;  %v1704_v4 = vld [vmem:[%s5087_s1] sm:$0xff]  ;;  %s2965_s1 = smov 64  }
 0x3ad   :  { %1017 = vmatpush1.msra.mxu0 %v775_v6 }
 0x3ae   :  { %1018 = vmatprep.subr.mxu0 %v772_v54  ;;  %1217 = vperm.xlu0 %2944, %v1199_v1   ;;  %v758_v1 = vld [vmem:[%s5035_s6 + $0x28] sm:$0xff] }
 0x3af   :  { %1019 = vmatpush1.msra.mxu0 %v771_v62  ;;  %1261 = vperm.xlu1 %2945, %v1247_v52  }
 0x3b0   :  { %1036 = vmatprep.subr.mxu0 %v864_v53 }
 0x3b1   :  { %1037 = vmatpush2.msra.mxu0 %v863_v10 }
 0x3b2   :  { %1038 = vmatprep.subr.mxu0 %v860_v12  ;;  %1690 = vperm.xlu0 %2944, %v1686_v2  }
 0x3b3   :  { %1039 = vmatpush2.msra.mxu0 %v859_v14  ;;  %1266 = vperm.xlu1 %2945, %v1248_v0  }
 0x3b4   :  { %1040 = vmatprep.subr.mxu0 %v856_v16 }
 0x3b5   :  { %1041 = vmatpush2.msra.mxu0 %v855_v18 }
 0x3b6   :  { %1042 = vmatprep.subr.mxu0 %v852_v20  ;;  %1708 = vperm.xlu0 %2944, %v1704_v4   ;;  %v737_v20 = vld [vmem:[%s5034_s5] sm:$0xff] }
 0x3b7   :  { %1043 = vmatpush2.msra.mxu0 %v851_v22  ;;  %1695 = vperm.xlu1 %2945, %v1687_v3   ;;  %v738_v22 = vld [vmem:[%s5034_s5 + $0x8] sm:$0xff]  ;;  %v1323_v3 = vld [vmem:[%s5084_s4 + $0x70] sm:$0xff] }
 0x3b8   :  { %1044 = vmatprep.subr.mxu0 %v848_v24 }
 0x3b9   :  { %1045 = vmatpush2.msra.mxu0 %v847_v26 }
 0x3ba   :  { %1046 = vmatprep.subr.mxu0 %v844_v28 }
 0x3bb   :  { %1047 = vmatpush2.msra.mxu0 %v843_v31  ;;  %1713 = vperm.xlu1 %2945, %v1705_v5  }
 0x3bc   :  { %1048 = vmatprep.subr.mxu0 %v840_v38 }
 0x3bd   :  { %1049 = vmatpush2.msra.mxu0 %v839_v42 }
 0x3be   :  { %1050 = vmatprep.subr.mxu0 %v836_v43 }
 0x3bf   :  { %1051 = vmatpush2.msra.mxu0 %v835_v45  ;;  %v1526_v45 = vld [vmem:[%s5085_s0 + $0x78] sm:$0xff] }
 0x3c0   :  { %2844 = vmatprep.subr.mxu0 %v1542_v58 }
 0x450   :  { %v698_v6 = vpop.f32.mrf.mxu0 }
 0x451   :  { %v699_v7 = vadd.f32 1e-05, %v698_v6  ;;  %v743_v6 = vld [vmem:[%s5034_s5 + $0x30] sm:$0xff] }
 0x452   :  { %v700_v54 = vpop.f32.mrf.mxu0 }
 0x453   :  { %2946 = vrsqrt.f32 %v699_v7  ;;  %v701_v63 = vadd.f32 1e-05, %v700_v54  ;;  %v1338_v7 = vld [vmem:[%s5084_s4 + $0xe8] sm:$0xff] }
 0x454   :  { %v704_v62 = vpop.f32.mrf.mxu0  ;;  %v1540_v54 = vld [vmem:[%s5085_s0 + $0xe8] sm:$0xff] }
 0x455   :  { %2948 = vrsqrt.f32 %v701_v63  ;;  %v705_v59 = vadd.f32 1e-05, %v704_v62  ;;  %v744_v62 = vld [vmem:[%s5034_s5 + $0x38] sm:$0xff] }
 0x456   :  { %v706_v53 = vpop.f32.mrf.mxu0 }
 0x457   :  { %2950 = vrsqrt.f32 %v705_v59  ;;  %v707_v9 = vadd.f32 1e-05, %v706_v53 }
 0x458   :  { %v710_v10 = vpop.f32.mrf.mxu0 }
 0x459   :  { %2952 = vrsqrt.f32 %v707_v9  ;;  %v711_v11 = vadd.f32 1e-05, %v710_v10  ;;  %v760_v9 = vld [vmem:[%s5035_s6 + $0x38] sm:$0xff] }
 0x45a   :  { %v712_v12 = vpop.f32.mrf.mxu0 }
 0x45b   :  { %2954 = vrsqrt.f32 %v711_v11  ;;  %v713_v13 = vadd.f32 1e-05, %v712_v12  ;;  %v1322_v11 = vld [vmem:[%s5084_s4 + $0x68] sm:$0xff] }
 0x45c   :  { %v716_v14 = vpop.f32.mrf.mxu0  ;;  %v1524_v12 = vld [vmem:[%s5085_s0 + $0x68] sm:$0xff] }
 0x45d   :  { %2956 = vrsqrt.f32 %v713_v13  ;;  %v717_v15 = vadd.f32 1e-05, %v716_v14  ;;  %v759_v13 = vld [vmem:[%s5035_s6 + $0x30] sm:$0xff]  ;;  %v1337_v14 = vld [vmem:[%s5084_s4 + $0xe0] sm:$0xff] }
 0x45e   :  { %v718_v16 = vpop.f32.mrf.mxu0 }
 0x45f   :  { %2958 = vrsqrt.f32 %v717_v15  ;;  %v719_v17 = vadd.f32 1e-05, %v718_v16  ;;  %v1539_v15 = vld [vmem:[%s5085_s0 + $0xe0] sm:$0xff] }
 0x460   :  { %v2947_v18 = vpop.eup %2946 }
 0x461   :  { %v729_v19 = vmul.f32 %v2947_v18, %v3745_v41  ;;  %2960 = vrsqrt.f32 %v719_v17  ;;  %v753_v41 = vld [vmem:[%s5035_s6] sm:$0xff] }
 0x462   :  { %v2949_v21 = vpop.eup %2948  ;;  %v1321_v18 = vld [vmem:[%s5084_s4 + $0x60] sm:$0xff] }
 0x463   :  { %v730_v23 = vmul.f32 %v2949_v21, %v3740_v39  ;;  %v745_v26 = vmul.f32 %v737_v20, %v729_v19  ;;  %v740_v39 = vld [vmem:[%s5034_s5 + $0x18] sm:$0xff]  ;;  %v1523_v19 = vld [vmem:[%s5085_s0 + $0x60] sm:$0xff] }
 0x464   :  { %v2951_v24 = vpop.eup %2950  ;;  %v1336_v20 = vld [vmem:[%s5084_s4 + $0xd8] sm:$0xff] }
 0x465   :  { %v746_v27 = vmul.f32 %v738_v22, %v730_v23  ;;  %v731_v28 = vmul.f32 %v2951_v24, %v3735_v37  ;;  %v761_v8 = vadd.f32 %v753_v41, %v745_v26  ;;  %v756_v37 = vld [vmem:[%s5035_s6 + $0x18] sm:$0xff]  ;;  %v1335_v23 = vld [vmem:[%s5084_s4 + $0xd0] sm:$0xff]  ;;  %v1318_v26 = vld [vmem:[%s5084_s4 + $0x48] sm:$0xff] }
 0x466   :  { %v2953_v31 = vpop.eup %2952  ;;  %v1538_v21 = vld [vmem:[%s5085_s0 + $0xd8] sm:$0xff]  ;;  %v1319_v24 = vld [vmem:[%s5084_s4 + $0x50] sm:$0xff]  ;;  %v1317_v41 = vld [vmem:[%s5084_s4 + $0x40] sm:$0xff] }
 0x467   :  { %v762_v36 = vadd.f32 %v754_v25, %v746_v27  ;;  %v732_v38 = vmul.f32 %v2953_v31, %v3730_v35  ;;  %v747_v43 = vmul.f32 %v739_v29, %v731_v28  ;;  %v1320_v22 = vld [vmem:[%s5084_s4 + $0x58] sm:$0xff]  ;;  %v1334_v25 = vld [vmem:[%s5084_s4 + $0xc8] sm:$0xff]  ;;  %v1333_v27 = vld [vmem:[%s5084_s4 + $0xc0] sm:$0xff] }
 0x468   :  { %v2955_v42 = vpop.eup %2954  ;;  %v1332_v28 = vld [vmem:[%s5084_s4 + $0xb8] sm:$0xff]  ;;  %v1331_v31 = vld [vmem:[%s5084_s4 + $0xb0] sm:$0xff] }
 0x469   :  { %2722 = vmatprep.mubr.msk.f32.mxu1 %vm413_vm1, %v762_v36  ;;  %2726 = vmatprep.mubr.msk.f32.mxu0 %vm413_vm1, %v762_v36  ;;  %v748_v35 = vmul.f32 %v740_v39, %v732_v38  ;;  %v733_v46 = vmul.f32 %v2955_v42, %v3727_v34  ;;  %v763_v0 = vadd.f32 %v755_v40, %v747_v43  ;;  %v1316_v29 = vld [vmem:[%s5084_s4 + $0x38] sm:$0xff]  ;;  %v1315_v39 = vld [vmem:[%s5084_s4 + $0x30] sm:$0xff]  ;;  %v1330_v38 = vld [vmem:[%s5084_s4 + $0xa8] sm:$0xff] }
 0x46a   :  { %v2957_v50 = vpop.eup %2956  ;;  %964 = vmatmul.mubr.f32.vlgmr.msra.gmra.mxu1 %v761_v8  ;;  %1053 = vmatmul.mubr.f32.vlgmr.msra.gmra.mxu0 %v761_v8  ;;  %v1522_v36 = vld [vmem:[%s5085_s0 + $0x58] sm:$0xff]  ;;  %v1537_v40 = vld [vmem:[%s5085_s0 + $0xd0] sm:$0xff]  ;;  %v1314_v42 = vld [vmem:[%s5084_s4 + $0x28] sm:$0xff] }
 0x46b   :  { %v764_v34 = vadd.f32 %v756_v37, %v748_v35  ;;  %v734_v52 = vmul.f32 %v2957_v50, %v3721_v32  ;;  %2757 = vmatpush3.msra.mxu1 %v1324_v44  ;;  %2845 = vmatpush3.msra.mxu0 %v1526_v45  ;;  %v749_v2 = vmul.f32 %v741_v47, %v733_v46  ;;  %v1525_v32 = vld [vmem:[%s5085_s0 + $0x70] sm:$0xff]  ;;  %v1329_v37 = vld [vmem:[%s5084_s4 + $0xa0] sm:$0xff]  ;;  %v1536_v43 = vld [vmem:[%s5085_s0 + $0xc8] sm:$0xff] }
 0x46c   :  { %v2959_v58 = vpop.eup %2958  ;;  %2758 = vmatprep.subr.mxu1 %v1339_v48  ;;  %2846 = vmatprep.subr.mxu0 %v1541_v49  ;;  %v1521_v8 = vld [vmem:[%s5085_s0 + $0x50] sm:$0xff]  ;;  %v1313_v44 = vld [vmem:[%s5084_s4 + $0x20] sm:$0xff]  ;;  %v1520_v45 = vld [vmem:[%s5085_s0 + $0x48] sm:$0xff] }
 0x46d   :  { %2723 = vmatprep.mubr.msk.f32.mxu1 %vm413_vm1, %v764_v34  ;;  %2727 = vmatprep.mubr.msk.f32.mxu0 %vm413_vm1, %v764_v34  ;;  %v750_v4 = vmul.f32 %v742_v51, %v734_v52  ;;  %v735_v5 = vmul.f32 %v2959_v58, %v3718_v30  ;;  %v765_v53 = vadd.f32 %v757_v56, %v749_v2  ;;  %v1328_v35 = vld [vmem:[%s5084_s4 + $0x98] sm:$0xff]  ;;  %v1535_v46 = vld [vmem:[%s5085_s0 + $0xc0] sm:$0xff]  ;;  %v1327_v49 = vld [vmem:[%s5084_s4 + $0x90] sm:$0xff] }
 0x46e   :  { %v2961_v63 = vpop.eup %2960  ;;  %970 = vmatmul.mubr.f32.gmra.mxu1 %v763_v0  ;;  %1059 = vmatmul.mubr.f32.gmra.mxu0 %v763_v0  ;;  %v1312_v47 = vld [vmem:[%s5084_s4 + $0x18] sm:$0xff]  ;;  %v1519_v48 = vld [vmem:[%s5085_s0 + $0x40] sm:$0xff]  ;;  %v1311_v51 = vld [vmem:[%s5084_s4 + $0x10] sm:$0xff] }
 0x46f   :  { %v766_v30 = vadd.f32 %v758_v1, %v750_v4  ;;  %v736_v59 = vmul.f32 %v2961_v63, %v3724_v33  ;;  %2759 = vmatpush3.msra.mxu1 %v1323_v3  ;;  %2847 = vmatpush3.msra.mxu0 %v1525_v32  ;;  %v751_v10 = vmul.f32 %v743_v6, %v735_v5  ;;  %v1534_v50 = vld [vmem:[%s5085_s0 + $0xb8] sm:$0xff]  ;;  %v1326_v52 = vld [vmem:[%s5084_s4 + $0x88] sm:$0xff]  ;;  %v1533_v56 = vld [vmem:[%s5085_s0 + $0xb0] sm:$0xff] }
 0x470   :  { %2760 = vmatprep.subr.mxu1 %v1338_v7  ;;  %2848 = vmatprep.subr.mxu0 %v1540_v54  ;;  %v1518_v34 = vld [vmem:[%s5085_s0 + $0x38] sm:$0xff]  ;;  %v1310_v58 = vld [vmem:[%s5084_s4 + $0x8] sm:$0xff]  ;;  %v1517_v0 = vld [vmem:[%s5085_s0 + $0x30] sm:$0xff] }
 0x471   :  { %2724 = vmatprep.mubr.msk.f32.mxu1 %vm413_vm1, %v766_v30  ;;  %2728 = vmatprep.mubr.msk.f32.mxu0 %vm413_vm1, %v766_v30  ;;  %v752_v33 = vmul.f32 %v744_v62, %v736_v59  ;;  %v767_v17 = vadd.f32 %v759_v13, %v751_v10  ;;  %v1325_v1 = vld [vmem:[%s5084_s4 + $0x80] sm:$0xff]  ;;  %v1532_v2 = vld [vmem:[%s5085_s0 + $0xa8] sm:$0xff]  ;;  %v1308_v4 = vld [vmem:[%s5036_s13 + $0xf8] sm:$0xff]  ;;  %v4356_v10 = vsub.s32 2, %v3588_v57 }
 0x472   :  { %976 = vmatmul.mubr.f32.gmra.mxu1 %v765_v53  ;;  %1065 = vmatmul.mubr.f32.gmra.mxu0 %v765_v53  ;;  %v1309_v3 = vld [vmem:[%s5084_s4] sm:$0xff]  ;;  %v1516_v32 = vld [vmem:[%s5085_s0 + $0x28] sm:$0xff]  ;;  %v1530_v7 = vld [vmem:[%s5085_s0 + $0x98] sm:$0xff] }
 0x473   :  { %v768_v16 = vadd.f32 %v760_v9, %v752_v33  ;;  %2761 = vmatpush3.msra.mxu1 %v1322_v11  ;;  %2849 = vmatpush3.msra.mxu0 %v1524_v12  ;;  %v1531_v5 = vld [vmem:[%s5085_s0 + $0xa0] sm:$0xff]  ;;  %v1514_v54 = vld [vmem:[%s5085_s0 + $0x18] sm:$0xff]  ;;  %v1529_v63 = vld [vmem:[%s5085_s0 + $0x90] sm:$0xff]  ;;  %v4362_v12 = vsub.s32 3, %v3588_v57 }
 0x474   :  { %2762 = vmatprep.subr.mxu1 %v1337_v14  ;;  %2850 = vmatprep.subr.mxu0 %v1539_v15  ;;  %v1515_v6 = vld [vmem:[%s5085_s0 + $0x20] sm:$0xff]  ;;  %v1513_v62 = vld [vmem:[%s5085_s0 + $0x10] sm:$0xff]  ;;  %v1528_v30 = vld [vmem:[%s5085_s0 + $0x88] sm:$0xff] }
 0x475   :  { %2725 = vmatprep.mubr.msk.f32.mxu1 %vm413_vm1, %v768_v16  ;;  %2729 = vmatprep.mubr.msk.f32.mxu0 %vm413_vm1, %v768_v16  ;;  %v1512_v59 = vld [vmem:[%s5085_s0 + $0x8] sm:$0xff]  ;;  %v1527_v53 = vld [vmem:[%s5085_s0 + $0x80] sm:$0xff]  ;;  %v4710_v57 = vld [vmem:[%s5046_s25 + $0x78] sm:$0xff] }
 0x476   :  { %982 = vmatmul.mubr.f32.gmra.mxu1 %v767_v17  ;;  %1071 = vmatmul.mubr.f32.gmra.mxu0 %v767_v17  ;;  %v1511_v9 = vld [vmem:[%s5085_s0] sm:$0xff] }
 0x477   :  { %2763 = vmatpush3.msra.mxu1 %v1321_v18  ;;  %2851 = vmatpush3.msra.mxu0 %v1523_v19  ;;  %v865_v11 = vld [vmem:[%s5037_s8] sm:$0xf] }
 0x478   :  { %2764 = vmatprep.subr.mxu1 %v1336_v20  ;;  %2852 = vmatprep.subr.mxu0 %v1538_v21  ;;  %v4365_v33 = vrot.slane %v865_v11, %v3594_v61  ;;  %v4368_v13 = vrot.slane %v865_v11, %v4356_v10  ;;  %v1093_v14 = vld [vmem:[%s5038_s9] sm:$0xf]  ;;  %v4377_v16 = vrot.slane %v865_v11, %v3591_v60 }
 0x479   :  { %2765 = vmatpush3.msra.mxu1 %v1320_v22  ;;  %2853 = vmatpush3.msra.mxu0 %v1522_v36  ;;  %v1131_v15 = vld [vmem:[%s5039_s10] sm:$0xf]  ;;  %v4380_v17 = vrot.slane %v865_v11, %v4362_v12  ;;  %v4384_v21 = vrot.slane %v1093_v14, %v3594_v61 }
 0x47a   :  { %2766 = vmatprep.subr.mxu1 %v1335_v23  ;;  %2854 = vmatprep.subr.mxu0 %v1537_v40  ;;  %v4388_v23 = vrot.slane %v1093_v14, %v4356_v10  ;;  %v4408_v40 = vrot.slane %v1131_v15, %v4362_v12 }
 0x47b   :  { %2767 = vmatpush3.msra.mxu1 %v1319_v24  ;;  %2855 = vmatpush3.msra.mxu0 %v1521_v8  ;;  %v4391_v24 = vrot.slane %v1131_v15, %v3594_v61 }
 0x47c   :  { %2768 = vmatprep.subr.mxu1 %v1334_v25  ;;  %2856 = vmatprep.subr.mxu0 %v1536_v43  ;;  %v4394_v25 = vrot.slane %v1131_v15, %v4356_v10 }
 0x47d   :  { %2769 = vmatpush3.msra.mxu1 %v1318_v26  ;;  %2857 = vmatpush3.msra.mxu0 %v1520_v45 }
 0x47e   :  { %2770 = vmatprep.subr.mxu1 %v1333_v27  ;;  %2858 = vmatprep.subr.mxu0 %v1535_v46  ;;  %v4397_v27 = vrot.slane %v1093_v14, %v3591_v60 }
 0x47f   :  { %2771 = vmatpush3.msra.mxu1 %v1317_v41  ;;  %2859 = vmatpush3.msra.mxu0 %v1519_v48 }
 0x480   :  { %2772 = vmatprep.subr.mxu1 %v1332_v28  ;;  %2860 = vmatprep.subr.mxu0 %v1534_v50  ;;  %v4400_v28 = vrot.slane %v1093_v14, %v4362_v12 }
 0x481   :  { %2773 = vmatpush3.msra.mxu1 %v1316_v29  ;;  %2861 = vmatpush3.msra.mxu0 %v1518_v34 }
 0x482   :  { %2774 = vmatprep.subr.mxu1 %v1331_v31  ;;  %2862 = vmatprep.subr.mxu0 %v1533_v56 }
 0x483   :  { %2775 = vmatpush3.msra.mxu1 %v1315_v39  ;;  %2863 = vmatpush3.msra.mxu0 %v1517_v0 }
 0x484   :  { %2776 = vmatprep.subr.mxu1 %v1330_v38  ;;  %2864 = vmatprep.subr.mxu0 %v1532_v2  ;;  %v4405_v38 = vrot.slane %v1131_v15, %v3591_v60 }
 0x485   :  { %2777 = vmatpush3.msra.mxu1 %v1314_v42  ;;  %2865 = vmatpush3.msra.mxu0 %v1516_v32 }
 0x486   :  { %2778 = vmatprep.subr.mxu1 %v1329_v37  ;;  %2866 = vmatprep.subr.mxu0 %v1531_v5 }
 0x487   :  { %2779 = vmatpush3.msra.mxu1 %v1313_v44  ;;  %2867 = vmatpush3.msra.mxu0 %v1515_v6 }
 0x488   :  { %2780 = vmatprep.subr.mxu1 %v1328_v35  ;;  %2868 = vmatprep.subr.mxu0 %v1530_v7 }
 0x489   :  { %2781 = vmatpush3.msra.mxu1 %v1312_v47  ;;  %2869 = vmatpush3.msra.mxu0 %v1514_v54 }
 0x48a   :  { %2782 = vmatprep.subr.mxu1 %v1327_v49  ;;  %2870 = vmatprep.subr.mxu0 %v1529_v63 }
 0x48b   :  { %2783 = vmatpush3.msra.mxu1 %v1311_v51  ;;  %2871 = vmatpush3.msra.mxu0 %v1513_v62 }
 0x48c   :  { %2784 = vmatprep.subr.mxu1 %v1326_v52  ;;  %2872 = vmatprep.subr.mxu0 %v1528_v30 }
 0x48d   :  { %2785 = vmatpush3.msra.mxu1 %v1310_v58  ;;  %2873 = vmatpush3.msra.mxu0 %v1512_v59 }
 0x48e   :  { %2786 = vmatprep.subr.mxu1 %v1325_v1  ;;  %2874 = vmatprep.subr.mxu0 %v1527_v53 }
 0x48f   :  { %2787 = vmatpush3.msra.mxu1 %v1309_v3  ;;  %2875 = vmatpush3.msra.mxu0 %v1511_v9 }
 0x490   :  { %2800 = vmatprep.subr.mxu1 %v1308_v4 }
 0x52a   :  { %v965_v18 = vpop.f32.mrf.mxu1  ;;  %v1054_v19 = vpop.f32.mrf.mxu0 }
 0x52b   :  { %v966_v20 = vadd.f32 %v965_v18, %v4365_v33  ;;  %v1055_v22 = vadd.f32 %v1054_v19, %v4368_v13 }
 0x52c   :  { %v967_v26 = vpop.f32.mrf.mxu1  ;;  %v1056_v41 = vpop.f32.mrf.mxu0 }
 0x52d   :  { %v1077_v29 = vmax.f32 %v966_v20, 0.0  ;;  %v1079_v31 = vmax.f32 %v1055_v22, 0.0  ;;  %v968_v39 = vadd.f32 %v967_v26, %v4377_v16  ;;  %v1057_v36 = vadd.f32 %v1056_v41, %v4380_v17  ;;  %v1292_v26 = vld [vmem:[%s5036_s13 + $0x78] sm:$0xff] }
 0x52e   :  { %v971_v42 = vpop.f32.mrf.mxu1  ;;  %v1060_v8 = vpop.f32.mrf.mxu0 }
 0x52f   :  { %v1115_v37 = vmul.f32 %v4384_v21, %v1077_v29  ;;  %v1117_v43 = vmul.f32 %v4388_v23, %v1079_v31  ;;  %v1078_v44 = vmax.f32 %v968_v39, 0.0  ;;  %v1080_v45 = vmax.f32 %v1057_v36, 0.0  ;;  %v1307_v36 = vld [vmem:[%s5036_s13 + $0xf0] sm:$0xff] }
 0x530   :  { %v972_v35 = vadd.f32 %v971_v42, %v4365_v33  ;;  %v1061_v46 = vadd.f32 %v1060_v8, %v4368_v13  ;;  %v973_v47 = vpop.f32.mrf.mxu1  ;;  %v1062_v48 = vpop.f32.mrf.mxu0 }
 0x531   :  { %v1153_v49 = vadd.f32 %v4391_v24, %v1115_v37  ;;  %v1155_v50 = vadd.f32 %v4394_v25, %v1117_v43  ;;  %v1116_v51 = vmul.f32 %v4397_v27, %v1078_v44  ;;  %v1118_v34 = vmul.f32 %v4400_v28, %v1080_v45  ;;  %v1291_v43 = vld [vmem:[%s5036_s13 + $0x70] sm:$0xff] }
 0x532   :  { %v1081_v52 = vmax.f32 %v972_v35, 0.0  ;;  %v1083_v56 = vmax.f32 %v1061_v46, 0.0  ;;  %v974_v58 = vadd.f32 %v973_v47, %v4377_v16  ;;  %v1063_v0 = vadd.f32 %v1062_v48, %v4380_v17  ;;  %v977_v1 = vpop.f32.mrf.mxu1  ;;  %v1066_v2 = vpop.f32.mrf.mxu0  ;;  %v1306_v46 = vld [vmem:[%s5036_s13 + $0xe8] sm:$0xff] }
 0x533   :  { %v4420_v3 = vmax.f32 %v1153_v49, %v1155_v50  ;;  %v1154_v32 = vadd.f32 %v4405_v38, %v1116_v51  ;;  %v1156_v4 = vadd.f32 %v4408_v40, %v1118_v34  ;;  %v978_v5 = vadd.f32 %v977_v1, %v4365_v33 }
 0x534   :  { %v1119_v6 = vmul.f32 %v4384_v21, %v1081_v52  ;;  %v1121_v7 = vmul.f32 %v4388_v23, %v1083_v56  ;;  %v1082_v54 = vmax.f32 %v974_v58, 0.0  ;;  %v1084_v63 = vmax.f32 %v1063_v0, 0.0  ;;  %v979_v62 = vpop.f32.mrf.mxu1  ;;  %v1068_v30 = vpop.f32.mrf.mxu0  ;;  %v1290_v0 = vld [vmem:[%s5036_s13 + $0x68] sm:$0xff] }
 0x535   :  { %v4427_v59 = vmax.f32 %v1154_v32, %v1156_v4  ;;  %v1085_v53 = vmax.f32 %v978_v5, 0.0  ;;  %v1067_v9 = vadd.f32 %v1066_v2, %v4368_v13  ;;  %v980_v11 = vadd.f32 %v979_v62, %v4377_v16  ;;  %v4474_v4 = vpop.permute.xlu1 %1207 }
 0x536   :  { %v1157_v14 = vadd.f32 %v4391_v24, %v1119_v6  ;;  %v1159_v15 = vadd.f32 %v4394_v25, %v1121_v7  ;;  %v1120_v18 = vmul.f32 %v4397_v27, %v1082_v54  ;;  %v1122_v19 = vmul.f32 %v4400_v28, %v1084_v63  ;;  %v983_v20 = vpop.f32.mrf.mxu1  ;;  %v1072_v22 = vpop.f32.mrf.mxu0  ;;  %v1304_v63 = vld [vmem:[%s5036_s13 + $0xd8] sm:$0xff] }
 0x537   :  { %v1123_v41 = vmul.f32 %v4384_v21, %v1085_v53  ;;  %v1087_v29 = vmax.f32 %v1067_v9, 0.0  ;;  %v1086_v31 = vmax.f32 %v980_v11, 0.0  ;;  %v1069_v39 = vadd.f32 %v1068_v30, %v4380_v17  ;;  %1405 = vmatprep.mubr.f32.mxu1 %v4427_v59  ;;  %v4483_v54 = vpop.permute.xlu0 %1202  ;;  %v1288_v11 = vld [vmem:[%s5036_s13 + $0x58] sm:$0xff] }
 0x538   :  { %v1158_v42 = vadd.f32 %v4405_v38, %v1120_v18  ;;  %v1160_v8 = vadd.f32 %v4408_v40, %v1122_v19  ;;  %v984_v37 = vadd.f32 %v983_v20, %v4365_v33  ;;  %1406 = vmatmul.mubr.f32.vlgmr.msra.gmra.mxu1 %v4420_v3  ;;  %v4456_v47 = vmax.f32 %v1157_v14, %v1159_v15  ;;  %v985_v50 = vpop.f32.mrf.mxu1  ;;  %v1074_v51 = vpop.f32.mrf.mxu0 }
 0x539   :  { %v1125_v44 = vmul.f32 %v4388_v23, %v1087_v29  ;;  %v1124_v45 = vmul.f32 %v4397_v27, %v1086_v31  ;;  %v1088_v35 = vmax.f32 %v1069_v39, 0.0  ;;  %2801 = vmatpush3.msra.mxu1 %v1292_v26  ;;  %v1073_v49 = vadd.f32 %v1072_v22, %v4368_v13  ;;  %v1305_v13 = vld [vmem:[%s5036_s13 + $0xe0] sm:$0xff]  ;;  %v1257_v22 = vpop.permute.xlu1 %1256 }
 0x53a   :  { %v4458_v48 = vmax.f32 %v1158_v42, %v1160_v8  ;;  %v1089_v33 = vmax.f32 %v984_v37, 0.0  ;;  %2802 = vmatprep.subr.mxu1 %v1307_v36  ;;  %v1161_v34 = vadd.f32 %v4391_v24, %v1123_v41  ;;  %v986_v5 = vadd.f32 %v985_v50, %v4377_v16  ;;  %v1286_v42 = vld [vmem:[%s5036_s13 + $0x48] sm:$0xff] }
 0x53b   :  { %v1163_v52 = vadd.f32 %v4394_v25, %v1125_v44  ;;  %v1162_v56 = vadd.f32 %v4405_v38, %v1124_v45  ;;  %v1126_v58 = vmul.f32 %v4400_v28, %v1088_v35  ;;  %2803 = vmatpush3.msra.mxu1 %v1291_v43  ;;  %v1091_v2 = vmax.f32 %v1073_v49, 0.0  ;;  %v1252_v36 = vpop.permute.xlu0 %1251  ;;  %v1301_v45 = vld [vmem:[%s5036_s13 + $0xc0] sm:$0xff] }
 0x53c   :  { %v1127_v1 = vmul.f32 %v4384_v21, %v1089_v33  ;;  %1410 = vmatprep.mubr.f32.mxu1 %v4458_v48  ;;  %2804 = vmatprep.subr.mxu1 %v1306_v46  ;;  %v1075_v6 = vadd.f32 %v1074_v51, %v4380_v17  ;;  %v1289_v21 = vld [vmem:[%s5036_s13 + $0x60] sm:$0xff]  ;;  %v1090_v17 = vmax.f32 %v986_v5, 0.0  ;;  %v1231_v15 = vrot.slane %v4458_v48, 1 }
 0x53d   :  { %v1164_v32 = vadd.f32 %v4408_v40, %v1126_v58  ;;  %1411 = vmatmul.mubr.f32.gmra.mxu1 %v4456_v47  ;;  %v1129_v7 = vmul.f32 %v4388_v23, %v1091_v2  ;;  %v4488_v62 = vmax.f32 %v1161_v34, %v1163_v52  ;;  %v1230_v23 = vrot.slane %v4456_v47, 1  ;;  %v1285_v49 = vld [vmem:[%s5036_s13 + $0x40] sm:$0xff]  ;;  %v1262_v51 = vpop.permute.xlu1 %1261  ;;  %v1300_v52 = vld [vmem:[%s5036_s13 + $0xb8] sm:$0xff] }
 0x53e   :  { %2805 = vmatpush3.msra.mxu1 %v1290_v0  ;;  %v1165_v30 = vadd.f32 %v4391_v24, %v1127_v1  ;;  %v1092_v9 = vmax.f32 %v1075_v6, 0.0  ;;  %v1128_v14 = vmul.f32 %v4397_v27, %v1090_v17  ;;  %v1303_v24 = vld [vmem:[%s5036_s13 + $0xd0] sm:$0xff]  ;;  %v1228_v19 = vrot.slane %v4420_v3, 1  ;;  %v1282_v17 = vld [vmem:[%s5036_s13 + $0x28] sm:$0xff] }
 0x53f   :  { %v4490_v16 = vmax.f32 %v1162_v56, %v1164_v32  ;;  %2806 = vmatprep.subr.mxu1 %v1305_v13  ;;  %v1167_v53 = vadd.f32 %v4394_v25, %v1129_v7  ;;  %v1287_v27 = vld [vmem:[%s5036_s13 + $0x50] sm:$0xff]  ;;  %v1229_v41 = vrot.slane %v4427_v59, 1  ;;  %v1232_v39 = vrot.slane %v4488_v62, 1 }
 0x540   :  { %2807 = vmatpush3.msra.mxu1 %v1289_v21  ;;  %v1130_v25 = vmul.f32 %v4400_v28, %v1092_v9  ;;  %v1166_v20 = vadd.f32 %v4405_v38, %v1128_v14  ;;  %v1302_v28 = vld [vmem:[%s5036_s13 + $0xc8] sm:$0xff]  ;;  %v1241_v38 = vsel %vm1236_vm2, %v1228_v19, %v1230_v23  ;;  %v1178_v50 = vrot.slane %v4427_v59, 7  ;;  %v1284_v59 = vld [vmem:[%s5036_s13 + $0x38] sm:$0xff]  ;;  %v1299_v32 = vld [vmem:[%s5036_s13 + $0xb0] sm:$0xff] }
 0x541   :  { %v1233_v18 = vrot.slane %v4490_v16, 1  ;;  %1415 = vmatprep.mubr.f32.mxu1 %v4490_v16  ;;  %2808 = vmatprep.subr.mxu1 %v1304_v63  ;;  %v4519_v29 = vmax.f32 %v1165_v30, %v1167_v53  ;;  %v1242_v8 = vsel %vm1236_vm2, %v1229_v41, %v1231_v15  ;;  %v1239_v35 = vsel %vm1236_vm2, %v1230_v23, %v1232_v39  ;;  %v1283_v6 = vld [vmem:[%s5036_s13 + $0x30] sm:$0xff]  ;;  %v1298_v21 = vld [vmem:[%s5036_s13 + $0xa8] sm:$0xff]  ;;  %v1267_v63 = vpop.permute.xlu1 %1266  ;;  %v1297_v9 = vld [vmem:[%s5036_s13 + $0xa0] sm:$0xff] }
 0x542   :  { %1416 = vmatmul.mubr.f32.gmra.mxu1 %v4488_v62  ;;  %v1168_v31 = vadd.f32 %v4408_v40, %v1130_v25  ;;  %v1270_v44 = vmul.f32 %v1252_v36, %v1242_v8  ;;  %v1269_v40 = vmul.f32 %v1252_v36, %v1241_v38  ;;  %v1271_v58 = vmul.f32 %v1257_v22, %v1239_v35  ;;  %v1281_v23 = vld [vmem:[%s5036_s13 + $0x20] sm:$0xff]  ;;  %v1213_v38 = vpop.permute.xlu0 %1212  ;;  %v1721_v35 = vld [vmem:[%s5040_s21 + $0x18] sm:$0xff] }
 0x543   :  { %v1240_v26 = vsel %vm1236_vm2, %v1231_v15, %v1233_v18  ;;  %2809 = vmatpush3.msra.mxu1 %v1288_v11  ;;  %v1234_v46 = vrot.slane %v4519_v29, 1  ;;  %v1296_v11 = vld [vmem:[%s5036_s13 + $0x98] sm:$0xff]  ;;  %v1180_v25 = vrot.slane %v4458_v48, 7  ;;  %v1179_v48 = vrot.slane %v4456_v47, 7  ;;  %2917 = vmatprep.subr.mxu0 %v1721_v35 }
 0x544   :  { %2810 = vmatprep.subr.mxu1 %v1303_v24  ;;  %v4530_v37 = vmax.f32 %v1166_v20, %v1168_v31  ;;  %v1272_v43 = vmul.f32 %v1257_v22, %v1240_v26  ;;  %1607 = vmatprep.mubr.f32.mxu0 %v1270_v44  ;;  %v1280_v15 = vld [vmem:[%s5036_s13 + $0x18] sm:$0xff]  ;;  %v1295_v24 = vld [vmem:[%s5036_s13 + $0x90] sm:$0xff]  ;;  %v1294_v20 = vld [vmem:[%s5036_s13 + $0x88] sm:$0xff]  ;;  %v1181_v36 = vrot.slane %v4488_v62, 7 }
 0x545   :  { %2811 = vmatpush3.msra.mxu1 %v1287_v27  ;;  %1608 = vmatmul.mubr.f32.vlgmr.msra.gmra.mxu0 %v1269_v40  ;;  %v1237_v2 = vsel %vm1236_vm2, %v1232_v39, %v1234_v46  ;;  %v1243_v30 = vsel %vm1236_vm2, %v1234_v46, %v1228_v19  ;;  %v1279_v19 = vld [vmem:[%s5036_s13 + $0x10] sm:$0xff]  ;;  %v1177_v27 = vrot.slane %v4420_v3, 7  ;;  %v1278_v22 = vld [vmem:[%s5036_s13 + $0x8] sm:$0xff]  ;;  %v1293_v3 = vld [vmem:[%s5036_s13 + $0x80] sm:$0xff] }
 0x546   :  { %2812 = vmatprep.subr.mxu1 %v1302_v28  ;;  %v1235_v33 = vrot.slane %v4530_v37, 1  ;;  %1420 = vmatprep.mubr.f32.mxu1 %v4530_v37  ;;  %v1184_v34 = vrot.slane %v4530_v37, 7  ;;  %v1273_v7 = vmul.f32 %v1262_v51, %v1237_v2  ;;  %v1275_v14 = vmul.f32 %v1267_v63, %v1243_v30  ;;  %v1218_v44 = vpop.permute.xlu0 %1217  ;;  %v1720_v37 = vld [vmem:[%s5040_s21 + $0x10] sm:$0xff]  ;;  %v1719_v46 = vld [vmem:[%s5040_s21 + $0x8] sm:$0xff] }
 0x547   :  { %2813 = vmatpush3.msra.mxu1 %v1286_v42  ;;  %1612 = vmatprep.mubr.f32.mxu0 %v1272_v43  ;;  %v1182_v28 = vrot.slane %v4490_v16, 7  ;;  %v1192_v31 = vsel %vm1187_vm3, %v1177_v27, %v1179_v48 }
 0x548   :  { %1421 = vmatmul.mubr.f32.gmra.mxu1 %v4519_v29  ;;  %v1238_v56 = vsel %vm1236_vm2, %v1233_v18, %v1235_v33  ;;  %2814 = vmatprep.subr.mxu1 %v1301_v45  ;;  %v1195_v1 = vsel %vm1187_vm3, %v1184_v34, %v1178_v50  ;;  %v1244_v5 = vsel %vm1236_vm2, %v1235_v33, %v1229_v41  ;;  %v1183_v18 = vrot.slane %v4519_v29, 7  ;;  %v1277_v29 = vld [vmem:[%s5036_s13] sm:$0xff]  ;;  %v1725_v33 = vld [vmem:[%s5041_s22 + $0x18] sm:$0xff] }
 0x549   :  { %v1274_v0 = vmul.f32 %v1262_v51, %v1238_v56  ;;  %2815 = vmatpush3.msra.mxu1 %v1285_v49  ;;  %v1221_v13 = vmul.f32 %v4483_v54, %v1195_v1  ;;  %1613 = vmatmul.mubr.f32.gmra.mxu0 %v1271_v58  ;;  %v1276_v53 = vmul.f32 %v1267_v63, %v1244_v5  ;;  %v1724_v49 = vld [vmem:[%s5041_s22 + $0x10] sm:$0xff]  ;;  %v1723_v51 = vld [vmem:[%s5041_s22 + $0x8] sm:$0xff] }
 0x54a   :  { %2816 = vmatprep.subr.mxu1 %v1300_v52  ;;  %v1194_v26 = vsel %vm1187_vm3, %v1183_v18, %v1177_v27  ;;  %v1193_v41 = vsel %vm1187_vm3, %v1178_v50, %v1180_v25  ;;  %v1191_v16 = vsel %vm1187_vm3, %v1180_v25, %v1182_v28  ;;  %v1222_v42 = vmul.f32 %v4474_v4, %v1192_v31  ;;  %v1718_v50 = vld [vmem:[%s5040_s21] sm:$0xff]  ;;  %v4660_v52 = vld [vmem:[%s5042_s23 + $0x18] sm:$0xff] }
 0x54b   :  { %2817 = vmatpush3.msra.mxu1 %v1284_v59  ;;  %1490 = vmatprep.mubr.f32.mxu1 %v1221_v13  ;;  %v1220_v47 = vmul.f32 %v4483_v54, %v1194_v26  ;;  %v1223_v39 = vmul.f32 %v4474_v4, %v1193_v41  ;;  %v1190_v54 = vsel %vm1187_vm3, %v1179_v48, %v1181_v36  ;;  %v2731_v41 = vld [vmem:[%s5044_s17] ss:$0 sm:$0xff] }
 0x54c   :  { %1617 = vmatprep.mubr.f32.mxu0 %v1274_v0  ;;  %2818 = vmatprep.subr.mxu1 %v1299_v32  ;;  %v1225_v8 = vmul.f32 %v1213_v38, %v1191_v16  ;;  %v1189_v43 = vsel %vm1187_vm3, %v1182_v28, %v1184_v34  ;;  %v1224_v62 = vmul.f32 %v1213_v38, %v1190_v54  ;;  %v1722_v34 = vld [vmem:[%s5041_s22] sm:$0xff] }
 0x54d   :  { %2819 = vmatpush3.msra.mxu1 %v1283_v6  ;;  %1618 = vmatmul.mubr.f32.gmra.mxu0 %v1273_v7  ;;  %v1188_v40 = vsel %vm1187_vm3, %v1181_v36, %v1183_v18  ;;  %v1227_v45 = vmul.f32 %v1218_v44, %v1189_v43  ;;  %v2730_v18 = vld [vmem:[%s5043_s16] ss:$0 sm:$0xff] }
 0x54e   :  { %2820 = vmatprep.subr.mxu1 %v1298_v21  ;;  %1622 = vmatprep.mubr.f32.mxu0 %v1276_v53  ;;  %v1226_v4 = vmul.f32 %v1218_v44, %v1188_v40  ;;  %v2732_v36 = vld [vmem:[%s5045_s18] ss:$0 sm:$0xff] }
 0x54f   :  { %2821 = vmatpush3.msra.mxu1 %v1282_v17  ;;  %2918 = vmatpush3.msra.mxu0 %v1721_v35 }
 0x550   :  { %2822 = vmatprep.subr.mxu1 %v1297_v9  ;;  %2919 = vmatprep.subr.mxu0 %v1720_v37 }
 0x551   :  { %2823 = vmatpush3.msra.mxu1 %v1281_v23  ;;  %1623 = vmatmul.mubr.f32.gmra.mxu0 %v1275_v14 }
 0x552   :  { %2824 = vmatprep.subr.mxu1 %v1296_v11  ;;  %2920 = vmatpush3.msra.mxu0 %v1720_v37 }
 0x553   :  { %2825 = vmatpush3.msra.mxu1 %v1280_v15  ;;  %2921 = vmatprep.subr.mxu0 %v1719_v46 }
 0x554   :  { %2826 = vmatprep.subr.mxu1 %v1295_v24  ;;  %2922 = vmatpush3.msra.mxu0 %v1719_v46 }
 0x555   :  { %2827 = vmatpush3.msra.mxu1 %v1279_v19  ;;  %2923 = vmatprep.subr.mxu0 %v1718_v50 }
 0x556   :  { %2828 = vmatprep.subr.mxu1 %v1294_v20  ;;  %2924 = vmatpush3.msra.mxu0 %v1718_v50 }
 0x557   :  { %2829 = vmatpush3.msra.mxu1 %v1278_v22 }
 0x558   :  { %2830 = vmatprep.subr.mxu1 %v1293_v3 }
 0x559   :  { %2831 = vmatpush3.msra.mxu1 %v1277_v29 }
 0x55a   :  { %1491 = vmatmul.mubr.f32.vlgmr.msra.gmra.mxu1 %v1220_v47  ;;  %2906 = vmatprep.subr.mxu1 %v1725_v33 }
 0x55b   :  { %1495 = vmatprep.mubr.f32.mxu1 %v1223_v39  ;;  %2907 = vmatpush3.msra.mxu1 %v1725_v33 }
 0x55c   :  { %2908 = vmatprep.subr.mxu1 %v1724_v49 }
 0x55d   :  { %2909 = vmatpush3.msra.mxu1 %v1724_v49 }
 0x55e   :  { %1496 = vmatmul.mubr.f32.gmra.mxu1 %v1222_v42  ;;  %2910 = vmatprep.subr.mxu1 %v1723_v51 }
 0x55f   :  { %1500 = vmatprep.mubr.f32.mxu1 %v1225_v8  ;;  %2911 = vmatpush3.msra.mxu1 %v1723_v51 }
 0x560   :  { %2912 = vmatprep.subr.mxu1 %v1722_v34 }
 0x561   :  { %2913 = vmatpush3.msra.mxu1 %v1722_v34 }
 0x562   :  { %1501 = vmatmul.mubr.f32.gmra.mxu1 %v1224_v62  ;;  %2928 = vmatprep.subr.mxu1 %v4660_v52 }
 0x563   :  { %1505 = vmatprep.mubr.f32.mxu1 %v1227_v45 }
 0x566   :  { %1506 = vmatmul.mubr.f32.gmra.mxu1 %v1226_v4 }
 0x5f8   :  { %v2788_v56 = vpop.f32.mrf.mxu1 }
 0x5fa   :  { %v2789_v59 = vpop.f32.mrf.mxu1 }
 0x5fb   :  { %v2790_v53 = vadd.f32 %v2789_v59, %v2788_v56 }
 0x5fd   :  { %v2791_v58 = vpop.f32.mrf.mxu1 }
 0x5ff   :  { %v2792_v0 = vpop.f32.mrf.mxu1 }
 0x600   :  { %v2793_v25 = vadd.f32 %v2792_v0, %v2791_v58 }
 0x602   :  { %v2794_v1 = vpop.f32.mrf.mxu1 }
 0x604   :  { %v2795_v13 = vpop.f32.mrf.mxu1 }
 0x605   :  { %v2876_v2 = vpop.f32.mrf.mxu0  ;;  %v2796_v29 = vadd.f32 %v2795_v13, %v2794_v1 }
 0x607   :  { %v2877_v32 = vpop.f32.mrf.mxu0 }
 0x608   :  { %v2797_v5 = vpop.f32.mrf.mxu1  ;;  %v2878_v11 = vadd.f32 %v2877_v32, %v2876_v2 }
 0x609   :  { %v2879_v6 = vpop.f32.mrf.mxu0 }
 0x60a   :  { %v2798_v21 = vpop.f32.mrf.mxu1 }
 0x60b   :  { %v2880_v7 = vpop.f32.mrf.mxu0  ;;  %v2799_v43 = vadd.f32 %v2798_v21, %v2797_v5 }
 0x60c   :  { %v2881_v22 = vadd.f32 %v2880_v7, %v2879_v6  ;;  %v1691_v7 = vpop.permute.xlu0 %1690 }
 0x60d   :  { %v2882_v17 = vpop.f32.mrf.mxu0 }
 0x60f   :  { %v2883_v15 = vpop.f32.mrf.mxu0 }
 0x610   :  { %v2884_v16 = vadd.f32 %v2883_v15, %v2882_v17 }
 0x611   :  { %v2885_v3 = vpop.f32.mrf.mxu0 }
 0x613   :  { %v2886_v62 = vpop.f32.mrf.mxu0 }
 0x614   :  { %v2887_v37 = vadd.f32 %v2886_v62, %v2885_v3  ;;  %v4705_v3 = vld [vmem:[%s5046_s25 + $0x68] sm:$0xff]  ;;  %v4790_v62 = vld [vmem:[%s5046_s25 + $0x10] sm:$0xff] }
 0x615   :  { %2054 = vmatprep.subr.mxu0 %v4705_v3 }
 0x61a   :  { %v2832_v63 = vpop.f32.mrf.mxu1 }
 0x61c   :  { %v2833_v30 = vpop.f32.mrf.mxu1 }
 0x61d   :  { %v2834_v9 = vadd.f32 %v2833_v30, %v2832_v63 }
 0x61e   :  { %v2835_v23 = vpop.f32.mrf.mxu1 }
 0x61f   :  { %v1493_v14 = vadd.f32 %v2834_v9, %v2790_v53 }
 0x620   :  { %v2836_v24 = vpop.f32.mrf.mxu1 }
 0x621   :  { %v1628_v19 = vadd.f32 %v2878_v11, %v1493_v14  ;;  %v2837_v27 = vadd.f32 %v2836_v24, %v2835_v23  ;;  %v1696_v23 = vpop.permute.xlu1 %1695 }
 0x622   :  { %v2838_v20 = vpop.f32.mrf.mxu1 }
 0x623   :  { %v1639_v48 = vadd.f32 %v2730_v18, %v1628_v19  ;;  %v1498_v26 = vadd.f32 %v2837_v27, %v2793_v25  ;;  %v1709_v25 = vpop.permute.xlu0 %1708  ;;  %v1890_v19 = vld [vmem:[%s5042_s23 + $0x10] sm:$0xff] }
 0x624   :  { %v2839_v28 = vpop.f32.mrf.mxu1 }
 0x625   :  { %v1643_v47 = vmax.f32 %v1639_v48, 0.0  ;;  %v1629_v31 = vadd.f32 %v2881_v22, %v1498_v26  ;;  %v2840_v39 = vadd.f32 %v2839_v28, %v2838_v20  ;;  %v1889_v20 = vld [vmem:[%s5042_s23 + $0x8] sm:$0xff]  ;;  %v1888_v22 = vld [vmem:[%s5042_s23] sm:$0xff]  ;;  %v1714_v26 = vpop.permute.xlu1 %1713  ;;  %v4722_v28 = vld [vmem:[%s5046_s25 + $0x70] sm:$0xff] }
 0x626   :  { %v2841_v38 = vpop.f32.mrf.mxu1 }
 0x627   :  { %v1654_v42 = vmul.f32 %v2731_v41, %v1643_v47  ;;  %v1640_v54 = vadd.f32 %v2730_v18, %v1629_v31  ;;  %v1503_v8 = vadd.f32 %v2840_v39, %v2796_v29  ;;  %v4729_v29 = vld [vmem:[%s5046_s25 + $0x48] sm:$0xff]  ;;  %v4734_v47 = vld [vmem:[%s5046_s25 + $0x58] sm:$0xff]  ;;  %v4739_v31 = vld [vmem:[%s5046_s25 + $0x40] sm:$0xff] }
 0x628   :  { %v2842_v44 = vpop.f32.mrf.mxu1  ;;  %v4746_v39 = vld [vmem:[%s5046_s25 + $0x50] sm:$0xff] }
 0x629   :  { %v1665_v40 = vadd.f32 %v2732_v36, %v1654_v42  ;;  %v1644_v45 = vmax.f32 %v1640_v54, 0.0  ;;  %v1630_v4 = vadd.f32 %v2884_v16, %v1503_v8  ;;  %v2843_v35 = vadd.f32 %v2842_v44, %v2841_v38  ;;  %v4756_v38 = vld [vmem:[%s5046_s25 + $0x38] sm:$0xff]  ;;  %v4763_v16 = vld [vmem:[%s5046_s25 + $0x20] sm:$0xff]  ;;  %v4768_v42 = vld [vmem:[%s5046_s25 + $0x30] sm:$0xff] }
 0x62a   :  { %v4773_v54 = vld [vmem:[%s5046_s25 + $0x8] sm:$0xff]  ;;  %v4780_v8 = vld [vmem:[%s5046_s25 + $0x18] sm:$0xff] }
 0x62b   :  { %1669 = vst.msk [vmem:[#allocation2] sm:$0xff] %vm263_vm0, %v1665_v40  ;;  %v1655_v46 = vmul.f32 %v2731_v41, %v1644_v45  ;;  %v1641_v33 = vadd.f32 %v2730_v18, %v1630_v4  ;;  %v1508_v49 = vadd.f32 %v2843_v35, %v2799_v43  ;;  %v4785_v43 = vld [vmem:[%s5046_s25] sm:$0xff] }
 0x62d   :  { %v1666_v50 = vadd.f32 %v2732_v36, %v1655_v46  ;;  %v1645_v51 = vmax.f32 %v1641_v33, 0.0  ;;  %v1631_v34 = vadd.f32 %v2887_v37, %v1508_v49  ;;  %v2739_v46 = vld [vmem:[%s5047_s24] ss:$0 sm:$0xff]  ;;  %s2966_s24 = smov 32  }
 0x62f   :  { %1670 = vst.msk [vmem:[#allocation2 + $0x8] sm:$0xff] %vm263_vm0, %v1666_v50  ;;  %v1656_v56 = vmul.f32 %v2731_v41, %v1645_v51  ;;  %v1642_v59 = vadd.f32 %v2730_v18, %v1631_v34 }
 0x631   :  { %v1667_v58 = vadd.f32 %v2732_v36, %v1656_v56  ;;  %v1646_v0 = vmax.f32 %v1642_v59, 0.0 }
 0x633   :  { %1671 = vst.msk [vmem:[#allocation2 + $0x10] sm:$0xff] %vm263_vm0, %v1667_v58  ;;  %v1657_v1 = vmul.f32 %v2731_v41, %v1646_v0  ;;  %v4717_v41 = vld [vmem:[%s5046_s25 + $0x60] sm:$0xff] }
 0x635   :  { %v1668_v2 = vadd.f32 %v2732_v36, %v1657_v1  ;;  %v4751_v36 = vld [vmem:[%s5046_s25 + $0x28] sm:$0xff] }
 0x636   :  { %v1673_v13 = vld [vmem:[#allocation2] ss:$2 sm:$0xff]  ;;  %v1677_v32 = vld [vmem:[#allocation2 + $0x1] ss:$2 sm:$0xff] }
 0x637   :  { %1672 = vst.msk [vmem:[#allocation2 + $0x18] sm:$0xff] %vm263_vm0, %v1668_v2  ;;  %v1680_v5 = vmax.f32 %v1673_v13, %v1677_v32 }
 0x639   :  { %2925 = vmatprep.mubr.msk.f32.mxu0 %vm263_vm0, %v1680_v5  ;;  %v1682_v17 = vrot.slane %v1680_v5, 7  ;;  %v1700_v30 = vrot.slane %v1680_v5, 1 }
 0x63e   :  { %v1675_v6 = vld [vmem:[#allocation2 + $0x10] ss:$2 sm:$0xff]  ;;  %v1679_v21 = vld [vmem:[#allocation2 + $0x11] ss:$2 sm:$0xff] }
 0x63f   :  { %v1681_v63 = vmax.f32 %v1675_v6, %v1679_v21  ;;  %v2002_v6 = vld [vmem:[%s5048_s26] sm:$0xf] }
 0x640   :  { %v4883_v21 = vrot.slane %v2002_v6, %v3594_v61 }
 0x641   :  { %2926 = vmatmul.mubr.msk.f32.vlgmr.msra.gmra.mxu0 %vm263_vm0, %v1681_v63  ;;  %v1683_v53 = vrot.slane %v1681_v63, 7  ;;  %v1701_v9 = vrot.slane %v1681_v63, 1  ;;  %v4889_v63 = vrot.slane %v2002_v6, %v3591_v60 }
 0x642   :  { %2094 = vmatprep.mubr.f32.mxu0 %v5080_v55  ;;  %2055 = vmatpush1.msra.mxu0 %v4717_v41 }
 0x643   :  { %v1684_v11 = vsel %vm1187_vm3, %v1682_v17, %v1683_v53  ;;  %v1685_v14 = vsel %vm1187_vm3, %v1683_v53, %v1682_v17  ;;  %v1702_v15 = vsel %vm1236_vm2, %v1700_v30, %v1701_v9  ;;  %v1703_v48 = vsel %vm1236_vm2, %v1701_v9, %v1700_v30  ;;  %2056 = vmatprep.subr.mxu0 %v4729_v29 }
 0x644   :  { %v1698_v18 = vmul.f32 %v1691_v7, %v1685_v14  ;;  %v1699_v24 = vmul.f32 %v1696_v23, %v1684_v11  ;;  %v1716_v27 = vmul.f32 %v1709_v25, %v1702_v15  ;;  %2057 = vmatpush1.msra.mxu0 %v4739_v31  ;;  %v4886_v7 = vrot.slane %v2002_v6, %v4356_v10 }
 0x645   :  { %2058 = vmatprep.subr.mxu0 %v4751_v36 }
 0x646   :  { %2914 = vmatprep.mubr.msk.f32.mxu1 %vm263_vm0, %v1698_v18  ;;  %2059 = vmatpush1.msra.mxu0 %v4763_v16 }
 0x647   :  { %2915 = vmatmul.mubr.msk.f32.vlgmr.msra.gmra.mxu1 %vm263_vm0, %v1699_v24  ;;  %2060 = vmatprep.subr.mxu0 %v4773_v54 }
 0x648   :  { %2929 = vmatpush3.msra.mxu1 %v4660_v52  ;;  %2936 = vmatprep.mubr.msk.f32.mxu1 %vm263_vm0, %v1716_v27  ;;  %v1717_v52 = vmul.f32 %v1714_v26, %v1703_v48 }
 0x649   :  { %2930 = vmatprep.subr.mxu1 %v1890_v19  ;;  %2061 = vmatpush1.msra.mxu0 %v4785_v43 }
 0x64a   :  { %2931 = vmatpush3.msra.mxu1 %v1890_v19  ;;  %2224 = vmatprep.subr.mxu0 %v4705_v3 }
 0x64b   :  { %2932 = vmatprep.subr.mxu1 %v1889_v20 }
 0x64c   :  { %2933 = vmatpush3.msra.mxu1 %v1889_v20 }
 0x64d   :  { %2934 = vmatprep.subr.mxu1 %v1888_v22 }
 0x64e   :  { %2935 = vmatpush3.msra.mxu1 %v1888_v22 }
 0x64f   :  { %2937 = vmatmul.mubr.msk.f32.vlgmr.msra.gmra.mxu1 %vm263_vm0, %v1717_v52  ;;  %2131 = vmatprep.subr.mxu1 %v4710_v57 }
 0x650   :  { %2171 = vmatprep.mubr.f32.mxu1 %v5080_v55  ;;  %2132 = vmatpush1.msra.mxu1 %v4722_v28 }
 0x651   :  { %2133 = vmatprep.subr.mxu1 %v4734_v47 }
 0x652   :  { %2134 = vmatpush1.msra.mxu1 %v4746_v39 }
 0x653   :  { %2135 = vmatprep.subr.mxu1 %v4756_v38 }
 0x654   :  { %2136 = vmatpush1.msra.mxu1 %v4768_v42 }
 0x655   :  { %2137 = vmatprep.subr.mxu1 %v4780_v8 }
 0x656   :  { %2138 = vmatpush1.msra.mxu1 %v4790_v62 }
 0x657   :  { %2301 = vmatprep.subr.mxu1 %v4710_v57 }
 0x701   :  { %v2927_v40 = vpop.f32.mrf.mxu0 }
 0x703   :  { %v1879_v35 = vpop.f32.mrf.mxu0 }
 0x707   :  { %v2916_v44 = vpop.f32.mrf.mxu1 }
 0x708   :  { %v1885_v4 = vadd.f32 %v2927_v40, %v2916_v44 }
 0x709   :  { %v1798_v45 = vpop.f32.mrf.mxu1 }
 0x70a   :  { %v1880_v33 = vadd.f32 %v1879_v35, %v1798_v45 }
 0x70f   :  { %v2938_v37 = vpop.f32.mrf.mxu1 }
 0x710   :  { %v1974_v49 = vadd.f32 %v2938_v37, %v1885_v4 }
 0x711   :  { %v1964_v50 = vpop.f32.mrf.mxu1 }
 0x712   :  { %v1983_v51 = vadd.f32 %v2739_v46, %v1974_v49  ;;  %v1973_v34 = vadd.f32 %v1964_v50, %v1880_v33 }
 0x714   :  { %v1985_v56 = vmax.f32 %v1983_v51, 0.0  ;;  %v1982_v59 = vadd.f32 %v2739_v46, %v1973_v34 }
 0x716   :  { %v1984_v58 = vmax.f32 %v1982_v59, 0.0  ;;  %2194 = vrot.lane.b32.xlu1 %v1985_v56, %s2964_s3 }
 0x718   :  { %2192 = vrot.lane.b32.xlu0 %v1984_v58, %s2964_s3  ;;  %2740 = vmatmul.mubr.msk.f32.vlgmr.msra.gmra.mxu0 %vm263_vm0, %v1984_v58 }
 0x719   :  { %2742 = vmatmul.mubr.msk.f32.vlgmr.msra.gmra.mxu1 %vm263_vm0, %v1984_v58  ;;  %2100 = vmatprep.mubr.f32.mxu0 %v5080_v55 }
 0x71a   :  { %2364 = vrot.lane.b32.xlu1 %v1985_v56, %s2965_s1  ;;  %2177 = vmatprep.mubr.f32.mxu1 %v5080_v55 }
 0x71b   :  { %2225 = vmatpush1.msra.mxu0 %v4717_v41  ;;  %2302 = vmatpush1.msra.mxu1 %v4722_v28 }
 0x71c   :  { %2362 = vrot.lane.b32.xlu0 %v1984_v58, %s2965_s1  ;;  %2741 = vmatmul.mubr.msk.f32.gmra.mxu0 %vm263_vm0, %v1985_v56 }
 0x71d   :  { %2743 = vmatmul.mubr.msk.f32.gmra.mxu1 %vm263_vm0, %v1985_v56  ;;  %2226 = vmatprep.subr.mxu0 %v4729_v29 }
 0x71e   :  { %2534 = vrot.lane.b32.xlu1 %v1985_v56, %s2966_s24  ;;  %2303 = vmatprep.subr.mxu1 %v4734_v47 }
 0x71f   :  { %2227 = vmatpush1.msra.mxu0 %v4739_v31  ;;  %2304 = vmatpush1.msra.mxu1 %v4746_v39 }
 0x720   :  { %2532 = vrot.lane.b32.xlu0 %v1984_v58, %s2966_s24  ;;  %2228 = vmatprep.subr.mxu0 %v4751_v36 }
 0x721   :  { %2305 = vmatprep.subr.mxu1 %v4756_v38  ;;  %2229 = vmatpush1.msra.mxu0 %v4763_v16 }
 0x722   :  { %2306 = vmatpush1.msra.mxu1 %v4768_v42  ;;  %2230 = vmatprep.subr.mxu0 %v4773_v54 }
 0x723   :  { %2307 = vmatprep.subr.mxu1 %v4780_v8  ;;  %2231 = vmatpush1.msra.mxu0 %v4785_v43 }
 0x724   :  { %2264 = vmatprep.mubr.f32.mxu0 %v5080_v55  ;;  %2308 = vmatpush1.msra.mxu1 %v4790_v62 }
 0x725   :  { %2341 = vmatprep.mubr.f32.mxu1 %v5080_v55  ;;  %2394 = vmatprep.subr.mxu0 %v4705_v3 }
 0x726   :  { %2471 = vmatprep.subr.mxu1 %v4710_v57 }
 0x788   :  { %v2195_v1 = vpop.permute.xlu1 %2194 }
 0x78a   :  { %v2193_v0 = vpop.permute.xlu0 %2192 }
 0x78b   :  { %2744 = vmatmul.mubr.msk.f32.vlgmr.msra.gmra.mxu0 %vm263_vm0, %v2193_v0  ;;  %2746 = vmatmul.mubr.msk.f32.vlgmr.msra.gmra.mxu1 %vm263_vm0, %v2193_v0 }
 0x78c   :  { %2395 = vmatpush1.msra.mxu0 %v4717_v41  ;;  %2472 = vmatpush1.msra.mxu1 %v4722_v28  ;;  %v2365_v13 = vpop.permute.xlu1 %2364 }
 0x78d   :  { %2396 = vmatprep.subr.mxu0 %v4729_v29  ;;  %2473 = vmatprep.subr.mxu1 %v4734_v47 }
 0x78e   :  { %2270 = vmatprep.mubr.f32.mxu0 %v5080_v55  ;;  %2347 = vmatprep.mubr.f32.mxu1 %v5080_v55  ;;  %v2363_v2 = vpop.permute.xlu0 %2362 }
 0x78f   :  { %2397 = vmatpush1.msra.mxu0 %v4739_v31  ;;  %2474 = vmatpush1.msra.mxu1 %v4746_v39 }
 0x790   :  { %2745 = vmatmul.mubr.msk.f32.gmra.mxu0 %vm263_vm0, %v2195_v1  ;;  %2747 = vmatmul.mubr.msk.f32.gmra.mxu1 %vm263_vm0, %v2195_v1  ;;  %v2535_v5 = vpop.permute.xlu1 %2534 }
 0x791   :  { %2398 = vmatprep.subr.mxu0 %v4751_v36  ;;  %2475 = vmatprep.subr.mxu1 %v4756_v38 }
 0x792   :  { %2399 = vmatpush1.msra.mxu0 %v4763_v16  ;;  %2476 = vmatpush1.msra.mxu1 %v4768_v42  ;;  %v2533_v32 = vpop.permute.xlu0 %2532 }
 0x793   :  { %2400 = vmatprep.subr.mxu0 %v4773_v54  ;;  %2477 = vmatprep.subr.mxu1 %v4780_v8 }
 0x794   :  { %2401 = vmatpush1.msra.mxu0 %v4785_v43  ;;  %2434 = vmatprep.mubr.f32.mxu0 %v5080_v55 }
 0x795   :  { %2478 = vmatpush1.msra.mxu1 %v4790_v62  ;;  %2511 = vmatprep.mubr.f32.mxu1 %v5080_v55 }
 0x796   :  { %2748 = vmatmul.mubr.msk.f32.vlgmr.msra.gmra.mxu0 %vm263_vm0, %v2363_v2  ;;  %2750 = vmatmul.mubr.msk.f32.vlgmr.msra.gmra.mxu1 %vm263_vm0, %v2363_v2 }
 0x797   :  { %2564 = vmatprep.subr.mxu0 %v4705_v3  ;;  %2641 = vmatprep.subr.mxu1 %v4710_v57 }
 0x798   :  { %2565 = vmatpush1.msra.mxu0 %v4717_v41  ;;  %2642 = vmatpush1.msra.mxu1 %v4722_v28 }
 0x799   :  { %2566 = vmatprep.subr.mxu0 %v4729_v29  ;;  %2643 = vmatprep.subr.mxu1 %v4734_v47 }
 0x79a   :  { %2440 = vmatprep.mubr.f32.mxu0 %v5080_v55  ;;  %2517 = vmatprep.mubr.f32.mxu1 %v5080_v55 }
 0x79b   :  { %2567 = vmatpush1.msra.mxu0 %v4739_v31  ;;  %2644 = vmatpush1.msra.mxu1 %v4746_v39 }
 0x79c   :  { %2749 = vmatmul.mubr.msk.f32.gmra.mxu0 %vm263_vm0, %v2365_v13  ;;  %2751 = vmatmul.mubr.msk.f32.gmra.mxu1 %vm263_vm0, %v2365_v13 }
 0x79d   :  { %2568 = vmatprep.subr.mxu0 %v4751_v36  ;;  %2645 = vmatprep.subr.mxu1 %v4756_v38 }
 0x79e   :  { %2569 = vmatpush1.msra.mxu0 %v4763_v16  ;;  %2646 = vmatpush1.msra.mxu1 %v4768_v42 }
 0x79f   :  { %2570 = vmatprep.subr.mxu0 %v4773_v54  ;;  %2647 = vmatprep.subr.mxu1 %v4780_v8 }
 0x7a0   :  { %2571 = vmatpush1.msra.mxu0 %v4785_v43  ;;  %2604 = vmatprep.mubr.f32.mxu0 %v5080_v55 }
 0x7a1   :  { %2648 = vmatpush1.msra.mxu1 %v4790_v62  ;;  %2681 = vmatprep.mubr.f32.mxu1 %v5080_v55 }
 0x7a2   :  { %2752 = vmatmul.mubr.msk.f32.vlgmr.msra.gmra.mxu0 %vm263_vm0, %v2533_v32  ;;  %2754 = vmatmul.mubr.msk.f32.vlgmr.msra.gmra.mxu1 %vm263_vm0, %v2533_v32 }
 0x7a3   :  { %2610 = vmatprep.mubr.f32.mxu0 %v5080_v55  ;;  %2687 = vmatprep.mubr.f32.mxu1 %v5080_v55  ;;  %v4892_v55 = vrot.slane %v2002_v6, %v4362_v12 }
 0x7a6   :  { %2753 = vmatmul.mubr.msk.f32.gmra.mxu0 %vm263_vm0, %v2535_v5  ;;  %2755 = vmatmul.mubr.msk.f32.gmra.mxu1 %vm263_vm0, %v2535_v5 }
 0x7d8   :  { %v2096_v17 = vpop.f32.mrf.mxu0 }
 0x7d9   :  { %v2097_v30 = vadd.f32 %v2096_v17, %v4883_v21  ;;  %v2173_v53 = vpop.f32.mrf.mxu1 }
 0x7da   :  { %v2174_v9 = vadd.f32 %v2173_v53, %v4886_v7  ;;  %v2098_v23 = vpop.f32.mrf.mxu0 }
 0x7db   :  { %2184 = vst [vmem:[%s5049_s27] sm:$0xff] %v2097_v30  ;;  %v2099_v61 = vadd.f32 %v2098_v23, %v4889_v63  ;;  %v2175_v10 = vpop.f32.mrf.mxu1 }
 0x7dc   :  { %2186 = vst [vmem:[%s5049_s27 + $0x10] sm:$0xff] %v2174_v9  ;;  %v2176_v60 = vadd.f32 %v2175_v10, %v4892_v55  ;;  %v2102_v12 = vpop.f32.mrf.mxu0 }
 0x7dd   :  { %2185 = vst [vmem:[%s5049_s27 + $0x8] sm:$0xff] %v2099_v61  ;;  %v2103_v11 = vadd.f32 %v2102_v12, %v4883_v21  ;;  %v2179_v14 = vpop.f32.mrf.mxu1 }
 0x7de   :  { %2187 = vst [vmem:[%s5049_s27 + $0x18] sm:$0xff] %v2176_v60  ;;  %v2180_v15 = vadd.f32 %v2179_v14, %v4886_v7  ;;  %v2104_v18 = vpop.f32.mrf.mxu0 }
 0x7df   :  { %2188 = vst [vmem:[%s5049_s27 + $0x80] sm:$0xff] %v2103_v11  ;;  %v2105_v24 = vadd.f32 %v2104_v18, %v4889_v63  ;;  %v2181_v25 = vpop.f32.mrf.mxu1 }
 0x7e0   :  { %2190 = vst [vmem:[%s5049_s27 + $0x90] sm:$0xff] %v2180_v15  ;;  %v2182_v19 = vadd.f32 %v2181_v25, %v4892_v55 }
 0x7e1   :  { %2189 = vst [vmem:[%s5049_s27 + $0x88] sm:$0xff] %v2105_v24 }
 0x7e2   :  { %2191 = vst [vmem:[%s5049_s27 + $0x98] sm:$0xff] %v2182_v19 }
 0x84b   :  { %v2266_v27 = vpop.f32.mrf.mxu0  ;;  %v2343_v20 = vpop.f32.mrf.mxu1 }
 0x84c   :  { %v2267_v22 = vadd.f32 %v2266_v27, %v4883_v21  ;;  %v2344_v48 = vadd.f32 %v2343_v20, %v4886_v7 }
 0x84d   :  { %v2268_v26 = vpop.f32.mrf.mxu0  ;;  %v2345_v52 = vpop.f32.mrf.mxu1 }
 0x84e   :  { %2354 = vst [vmem:[%s5049_s27 + $0x20] sm:$0xff] %v2267_v22  ;;  %2356 = vst [vmem:[%s5049_s27 + $0x30] sm:$0xff] %v2344_v48  ;;  %v2269_v3 = vadd.f32 %v2268_v26, %v4889_v63  ;;  %v2346_v57 = vadd.f32 %v2345_v52, %v4892_v55 }
 0x850   :  { %2355 = vst [vmem:[%s5049_s27 + $0x28] sm:$0xff] %v2269_v3  ;;  %2357 = vst [vmem:[%s5049_s27 + $0x38] sm:$0xff] %v2346_v57  ;;  %v2272_v41 = vpop.f32.mrf.mxu0  ;;  %v2349_v28 = vpop.f32.mrf.mxu1 }
 0x851   :  { %v2273_v29 = vadd.f32 %v2272_v41, %v4883_v21  ;;  %v2350_v47 = vadd.f32 %v2349_v28, %v4886_v7 }
 0x852   :  { %v2274_v31 = vpop.f32.mrf.mxu0  ;;  %v2351_v39 = vpop.f32.mrf.mxu1 }
 0x853   :  { %2358 = vst [vmem:[%s5049_s27 + $0xa0] sm:$0xff] %v2273_v29  ;;  %2360 = vst [vmem:[%s5049_s27 + $0xb0] sm:$0xff] %v2350_v47  ;;  %v2275_v36 = vadd.f32 %v2274_v31, %v4889_v63  ;;  %v2352_v38 = vadd.f32 %v2351_v39, %v4892_v55 }
 0x855   :  { %2359 = vst [vmem:[%s5049_s27 + $0xa8] sm:$0xff] %v2275_v36  ;;  %2361 = vst [vmem:[%s5049_s27 + $0xb8] sm:$0xff] %v2352_v38 }
 0x856   :  { %v2436_v16 = vpop.f32.mrf.mxu0  ;;  %v2513_v42 = vpop.f32.mrf.mxu1 }
 0x857   :  { %v2437_v54 = vadd.f32 %v2436_v16, %v4883_v21  ;;  %v2514_v8 = vadd.f32 %v2513_v42, %v4886_v7 }
 0x858   :  { %v2438_v43 = vpop.f32.mrf.mxu0  ;;  %v2515_v62 = vpop.f32.mrf.mxu1 }
 0x859   :  { %2524 = vst [vmem:[%s5049_s27 + $0x40] sm:$0xff] %v2437_v54  ;;  %2526 = vst [vmem:[%s5049_s27 + $0x50] sm:$0xff] %v2514_v8  ;;  %v2439_v44 = vadd.f32 %v2438_v43, %v4889_v63  ;;  %v2516_v40 = vadd.f32 %v2515_v62, %v4892_v55 }
 0x85b   :  { %2525 = vst [vmem:[%s5049_s27 + $0x48] sm:$0xff] %v2439_v44  ;;  %2527 = vst [vmem:[%s5049_s27 + $0x58] sm:$0xff] %v2516_v40 }
 0x85c   :  { %v2442_v45 = vpop.f32.mrf.mxu0  ;;  %v2519_v4 = vpop.f32.mrf.mxu1 }
 0x85d   :  { %v2443_v35 = vadd.f32 %v2442_v45, %v4883_v21  ;;  %v2520_v37 = vadd.f32 %v2519_v4, %v4886_v7 }
 0x85e   :  { %v2444_v46 = vpop.f32.mrf.mxu0  ;;  %v2521_v33 = vpop.f32.mrf.mxu1 }
 0x85f   :  { %2528 = vst [vmem:[%s5049_s27 + $0xc0] sm:$0xff] %v2443_v35  ;;  %2530 = vst [vmem:[%s5049_s27 + $0xd0] sm:$0xff] %v2520_v37  ;;  %v2445_v49 = vadd.f32 %v2444_v46, %v4889_v63  ;;  %v2522_v50 = vadd.f32 %v2521_v33, %v4892_v55 }
 0x861   :  { %2529 = vst [vmem:[%s5049_s27 + $0xc8] sm:$0xff] %v2445_v49  ;;  %2531 = vst [vmem:[%s5049_s27 + $0xd8] sm:$0xff] %v2522_v50 }
 0x862   :  { %v2606_v51 = vpop.f32.mrf.mxu0  ;;  %v2683_v34 = vpop.f32.mrf.mxu1 }
 0x863   :  { %v2607_v56 = vadd.f32 %v2606_v51, %v4883_v21  ;;  %v2684_v59 = vadd.f32 %v2683_v34, %v4886_v7 }
 0x864   :  { %v2608_v58 = vpop.f32.mrf.mxu0  ;;  %v2685_v0 = vpop.f32.mrf.mxu1 }
 0x865   :  { %2694 = vst [vmem:[%s5049_s27 + $0x60] sm:$0xff] %v2607_v56  ;;  %2696 = vst [vmem:[%s5049_s27 + $0x70] sm:$0xff] %v2684_v59  ;;  %v2609_v1 = vadd.f32 %v2608_v58, %v4889_v63  ;;  %v2686_v2 = vadd.f32 %v2685_v0, %v4892_v55 }
 0x866   :  { %v2612_v13 = vpop.f32.mrf.mxu0  ;;  %v2689_v32 = vpop.f32.mrf.mxu1 }
 0x867   :  { %2695 = vst [vmem:[%s5049_s27 + $0x68] sm:$0xff] %v2609_v1  ;;  %2697 = vst [vmem:[%s5049_s27 + $0x78] sm:$0xff] %v2686_v2  ;;  %v2613_v5 = vadd.f32 %v2612_v13, %v4883_v21  ;;  %v2690_v6 = vadd.f32 %v2689_v32, %v4886_v7 }
 0x868   :  { %v2614_v17 = vpop.f32.mrf.mxu0  ;;  %v2691_v30 = vpop.f32.mrf.mxu1 }
 0x869   :  { %2698 = vst [vmem:[%s5049_s27 + $0xe0] sm:$0xff] %v2613_v5  ;;  %2700 = vst [vmem:[%s5049_s27 + $0xf0] sm:$0xff] %v2690_v6  ;;  %v2615_v53 = vadd.f32 %v2614_v17, %v4889_v63  ;;  %v2692_v9 = vadd.f32 %v2691_v30, %v4892_v55 }
 0x86b   :  { %2699 = vst [vmem:[%s5049_s27 + $0xe8] sm:$0xff] %v2615_v53  ;;  %2701 = vst [vmem:[%s5049_s27 + $0xf8] sm:$0xff] %v2692_v9 }

</bundles_post_ra>
